<compile_context>
chip_gen: v7x
topology: tpu7x:2x2x1
jax: 0.10.0
libtpu: 0.0.40
codegen_flags: <defaults>
</compile_context>

<pallas_src>
import functools

import jax
import jax.numpy as jnp
from jax import lax
from jax.experimental import pallas as pl
from jax.experimental.pallas import tpu as pltpu


# -----------------------------------------------------------------------------
# Pallas kernel
# -----------------------------------------------------------------------------
def _make_lstm_decoder_kernel(num_layers: int, B: int, T: int, D_in: int,
                              Hp: int, out_dim: int):
    """Kernel body for fixed (num_layers, B, T, D_in, Hp, out_dim)."""
    G = 4 * Hp

    def kernel(*refs):
        # refs layout:
        #   x_ref                                   (T*B, D_in)   rows = t*B + b
        #   [w_in, bias, w_hh] * num_layers         (K_l, 4Hp), (1, 4Hp), (Hp, 4Hp)
        #   w_mlp, b_mlp                            (Hp, out), (1, out)
        #   out_ref                                 (B, out)
        #   seq_ref (scratch)                       (T*B, Hp)     rows = t*B + b
        x_ref = refs[0]
        layer_refs = [(refs[1 + 3 * l], refs[2 + 3 * l], refs[3 + 3 * l])
                      for l in range(num_layers)]
        w_mlp_ref = refs[1 + 3 * num_layers]
        b_mlp_ref = refs[2 + 3 * num_layers]
        out_ref = refs[3 + 3 * num_layers]
        seq_ref = refs[4 + 3 * num_layers]

        h_top = None
        for l in range(num_layers):
            w_in_ref, b_ref, w_hh_ref = layer_refs[l]

            # Hoisted full-sequence input projection + bias: ONE MXU op per
            # layer (time-major rows, so the per-step slice below is a
            # contiguous, copy-free view).
            src = x_ref[...] if l == 0 else seq_ref[...]
            proj = (jnp.dot(src, w_in_ref[...],
                            preferred_element_type=jnp.float32)
                    + b_ref[...]).reshape(T, B, G)        # (T, B, 4Hp)

            # Padded gate lanes stay exactly zero ONLY because h0/c0 are zero
            # here (zero weight/bias padding + sigmoid(0)*tanh(0) == 0).  If a
            # nonzero initial state is ever supported, pad lanes must be
            # masked before the next layer's projection.
            h = jnp.zeros((B, Hp), jnp.float32)           # carried in vregs
            c = jnp.zeros((B, Hp), jnp.float32)
            is_top = (l == num_layers - 1)

            for t in range(T):                            # fully unrolled (T=8)
                gates = proj[t] + jnp.dot(
                    h, w_hh_ref[...], preferred_element_type=jnp.float32)
                # PyTorch gate order i, f, g, o; each gate is a full,
                # 128-lane-aligned slice of width Hp.
                i_g = jax.nn.sigmoid(gates[:, 0 * Hp:1 * Hp])
                f_g = jax.nn.sigmoid(gates[:, 1 * Hp:2 * Hp])
                g_g = jnp.tanh(gates[:, 2 * Hp:3 * Hp])
                o_g = jax.nn.sigmoid(gates[:, 3 * Hp:4 * Hp])
                c = f_g * c + i_g * g_g
                h = o_g * jnp.tanh(c)
                if not is_top:
                    # Contiguous, lane-dense handoff row block for the next
                    # layer's hoisted projection (static t => static slice).
                    seq_ref[t * B:(t + 1) * B, :] = h

            if is_top:
                h_top = h

        # Final linear on the top layer's last hidden state.
        out_ref[...] = (jnp.dot(h_top, w_mlp_ref[...],
                                preferred_element_type=jnp.float32)
                        + b_mlp_ref[...])

    return kernel


# -----------------------------------------------------------------------------
# One-time weight packing (outside the hot path)
# -----------------------------------------------------------------------------
def prepare_lstm_decoder_params(lstm_params, mlp_params, *, input_size,
                                hidden, out_dim):
    """Pack PyTorch-layout LSTM/Linear weights once: transpose, pad each gate
    to Hp lanes, fold b_ih + b_hh into a single bias row.  Returns
    (packed_params_tuple, Hp)."""
    H = hidden
    Hp = ((H + 127) // 128) * 128
    G = 4 * Hp

    packed = []
    for l, (w_ih, w_hh, b_ih, b_hh) in enumerate(lstm_params):
        in_size = input_size if l == 0 else H
        k_rows = input_size if l == 0 else Hp
        w_in = jnp.zeros((k_rows, G), jnp.float32)
        w_hh_p = jnp.zeros((Hp, G), jnp.float32)
        bias = jnp.zeros((1, G), jnp.float32)
        b = (b_ih + b_hh).astype(jnp.float32)
        for g in range(4):
            w_in = w_in.at[:in_size, g * Hp:g * Hp + H].set(
                jnp.transpose(w_ih[g * H:(g + 1) * H, :]).astype(jnp.float32))
            w_hh_p = w_hh_p.at[:H, g * Hp:g * Hp + H].set(
                jnp.transpose(w_hh[g * H:(g + 1) * H, :]).astype(jnp.float32))
            bias = bias.at[0, g * Hp:g * Hp + H].set(b[g * H:(g + 1) * H])
        packed += [w_in, bias, w_hh_p]

    w_mlp, b_mlp = mlp_params
    w_mlp_p = jnp.zeros((Hp, out_dim), jnp.float32).at[:H, :].set(
        jnp.transpose(w_mlp).astype(jnp.float32))
    packed += [w_mlp_p, b_mlp.reshape(1, out_dim).astype(jnp.float32)]
    return tuple(packed), Hp


# -----------------------------------------------------------------------------
# Hot-path forward (takes already-packed params)
# -----------------------------------------------------------------------------
@functools.partial(jax.jit,
                   static_argnames=("num_layers", "hidden_padded", "out_dim"))
def lstm_decoder_forward(x, packed_params, *, num_layers, hidden_padded,
                         out_dim):
    """x: (B, T, D_in) float32  ->  (B, 1, out_dim) float32."""
    B, T, D_in = x.shape
    Hp = hidden_padded
    G = 4 * Hp

    # One-time per call: time-major flat slab (row = t*B + b).
    x_tm = jnp.transpose(x, (1, 0, 2)).reshape(T * B, D_in).astype(jnp.float32)

    kernel = _make_lstm_decoder_kernel(num_layers, B, T, D_in, Hp, out_dim)

    # Advisory cost estimate (helps XLA schedule this tiny kernel).
    flops = 0
    transcendentals = 0
    k = D_in
    for _ in range(num_layers):
        flops += 2 * T * B * k * G          # hoisted input projection
        flops += 2 * T * B * Hp * G         # recurrent h @ W_hh chain
        transcendentals += T * B * 5 * Hp   # 3 sigmoid + 2 tanh per step
        k = Hp
    flops += 2 * B * Hp * out_dim           # final linear
    bytes_accessed = (x_tm.size * 4
                      + sum(int(p.size) * 4 for p in packed_params)
                      + B * out_dim * 4)

    # Explicit VMEM budget (inputs + output + scratch, with headroom); don't
    # rely on the default scoped limit (differs across v5e/v6e/v7x).
    vmem_needed = bytes_accessed + T * B * Hp * 4
    vmem_limit = min(64 << 20, max(16 << 20, 2 * vmem_needed + (1 << 20)))

    out = pl.pallas_call(
        kernel,
        out_shape=jax.ShapeDtypeStruct((B, out_dim), jnp.float32),
        in_specs=[pl.BlockSpec(memory_space=pltpu.MemorySpace.VMEM)]
        * (1 + len(packed_params)),
        out_specs=pl.BlockSpec(memory_space=pltpu.MemorySpace.VMEM),
        scratch_shapes=[pltpu.VMEM((T * B, Hp), jnp.float32)],
        compiler_params=pltpu.CompilerParams(vmem_limit_bytes=vmem_limit),
        cost_estimate=pl.CostEstimate(flops=flops,
                                      transcendentals=transcendentals,
                                      bytes_accessed=bytes_accessed),
    )(x_tm, *packed_params)

    return out.reshape(B, 1, out_dim)                     # matches x[:, [-1]]


# -----------------------------------------------------------------------------
# Pure-JAX reference (for correctness check)
# -----------------------------------------------------------------------------
def lstm_decoder_reference(x, lstm_params, mlp_params, *, hidden):
    B, T, _ = x.shape
    H = hidden
    inp = x.astype(jnp.float32)
    for (w_ih, w_hh, b_ih, b_hh) in lstm_params:
        def cell(carry, x_t):
            h, c = carry
            gates = x_t @ w_ih.T + b_ih + h @ w_hh.T + b_hh
            i = jax.nn.sigmoid(gates[:, 0 * H:1 * H])
            f = jax.nn.sigmoid(gates[:, 1 * H:2 * H])
            g = jnp.tanh(gates[:, 2 * H:3 * H])
            o = jax.nn.sigmoid(gates[:, 3 * H:4 * H])
            c = f * c + i * g
            h = o * jnp.tanh(c)
            return (h, c), h
        init = (jnp.zeros((B, H), jnp.float32), jnp.zeros((B, H), jnp.float32))
        _, ys = lax.scan(cell, init, jnp.transpose(inp, (1, 0, 2)))
        inp = jnp.transpose(ys, (1, 0, 2))
    last = inp[:, -1, :]
    w_mlp, b_mlp = mlp_params
    return (last @ w_mlp.T + b_mlp)[:, None, :]


# -----------------------------------------------------------------------------
# Deterministic parameter construction (PyTorch-style uniform init)
# -----------------------------------------------------------------------------
def make_params(key, layers):
    D_in, H, out_dim = layers[0], layers[1], layers[-1]
    num_layers = len(layers) - 2
    k = 1.0 / jnp.sqrt(jnp.float32(H))
    lstm_params = []
    for l in range(num_layers):
        in_size = D_in if l == 0 else H
        key, k1, k2, k3, k4 = jax.random.split(key, 5)
        lstm_params.append((
            jax.random.uniform(k1, (4 * H, in_size), jnp.float32, -k, k),
            jax.random.uniform(k2, (4 * H, H), jnp.float32, -k, k),
            jax.random.uniform(k3, (4 * H,), jnp.float32, -k, k),
            jax.random.uniform(k4, (4 * H,), jnp.float32, -k, k),
        ))
    key, k1, k2 = jax.random.split(key, 3)
    mlp_params = (
        jax.random.uniform(k1, (out_dim, H), jnp.float32, -k, k),
        jax.random.uniform(k2, (out_dim,), jnp.float32, -k, k),
    )
    return lstm_params, mlp_params


if __name__ == "__main__":
    # layers = [input_size, hidden, hidden, out] -> num_layers = 2 LSTM layers
    layers = [16, 32, 32, 8]
    B, T = 2, 8
    D_in, H, out_dim = layers[0], layers[1], layers[-1]
    num_layers = len(layers) - 2

    key = jax.random.PRNGKey(0)
    key, xkey = jax.random.split(key)
    x = jax.random.normal(xkey, (B, T, D_in), jnp.float32)

    lstm_params, mlp_params = make_params(key, layers)

    # One-time packing outside the hot path.
    packed_params, Hp = prepare_lstm_decoder_params(
        lstm_params, mlp_params, input_size=D_in, hidden=H, out_dim=out_dim)
    packed_params = jax.block_until_ready(packed_params)

    out = lstm_decoder_forward(x, packed_params, num_layers=num_layers,
                               hidden_padded=Hp, out_dim=out_dim)
    out = jax.block_until_ready(out)

    ref = lstm_decoder_reference(x, lstm_params, mlp_params, hidden=H)
    ref = jax.block_until_ready(ref)

    assert out.shape == (B, 1, out_dim), out.shape
    assert jnp.allclose(out, ref, atol=5e-5, rtol=5e-5), (
        float(jnp.max(jnp.abs(out - ref))))

    print("KERNEL_OK")
</pallas_src>

<mosaic_0001>
module attributes {stable_mosaic.version = 11 : i64} {
  func.func @kernel(%arg0: memref<16x16xf32, #tpu.memory_space<vmem>>, %arg1: memref<16x512xf32, #tpu.memory_space<vmem>>, %arg2: memref<1x512xf32, #tpu.memory_space<vmem>>, %arg3: memref<128x512xf32, #tpu.memory_space<vmem>>, %arg4: memref<128x512xf32, #tpu.memory_space<vmem>>, %arg5: memref<1x512xf32, #tpu.memory_space<vmem>>, %arg6: memref<128x512xf32, #tpu.memory_space<vmem>>, %arg7: memref<128x8xf32, #tpu.memory_space<vmem>>, %arg8: memref<1x8xf32, #tpu.memory_space<vmem>>, %arg9: memref<2x8xf32, #tpu.memory_space<vmem>>, %arg10: memref<16x128xf32, #tpu.memory_space<vmem>>) attributes {dimension_semantics = [], scalar_prefetch = 0 : i64, scratch_operands = 1 : i64, tpu.core_type = #tpu.core_type<tc>} {
    %c0 = arith.constant 0 : index
    %c0_0 = arith.constant 0 : index
    %0 = vector.load %arg0[%c0, %c0_0] : memref<16x16xf32, #tpu.memory_space<vmem>>, vector<16x16xf32>
    %c0_1 = arith.constant 0 : index
    %c0_2 = arith.constant 0 : index
    %1 = vector.load %arg1[%c0_1, %c0_2] : memref<16x512xf32, #tpu.memory_space<vmem>>, vector<16x512xf32>
    %cst = arith.constant dense<0.000000e+00> : vector<16x512xf32>
    %2 = tpu.matmul %0, %1, %cst {dimension_numbers = #tpu.dot_dimension_numbers<[1], [0], [0], [1], [0, 0, 1, 1], [], []>} : vector<16x16xf32>, vector<16x512xf32>, vector<16x512xf32> -> vector<16x512xf32>
    %c0_3 = arith.constant 0 : index
    %c0_4 = arith.constant 0 : index
    %3 = vector.load %arg2[%c0_3, %c0_4] : memref<1x512xf32, #tpu.memory_space<vmem>>, vector<1x512xf32>
    %4 = vector.broadcast %3 : vector<1x512xf32> to vector<16x512xf32>
    %5 = arith.addf %2, %4 : vector<16x512xf32>
    %6 = vector.shape_cast %5 : vector<16x512xf32> to vector<8x2x512xf32>
    %cst_5 = arith.constant 0.000000e+00 : f32
    %7 = vector.broadcast %cst_5 : f32 to vector<2x128xf32>
    %cst_6 = arith.constant 0.000000e+00 : f32
    %8 = vector.broadcast %cst_6 : f32 to vector<2x128xf32>
    %9 = vector.extract_strided_slice %6 {offsets = [0, 0, 0], sizes = [1, 2, 512], strides = [1, 1, 1]} : vector<8x2x512xf32> to vector<1x2x512xf32>
    %10 = vector.shape_cast %9 : vector<1x2x512xf32> to vector<2x512xf32>
    %c0_7 = arith.constant 0 : index
    %c0_8 = arith.constant 0 : index
    %11 = vector.load %arg3[%c0_7, %c0_8] : memref<128x512xf32, #tpu.memory_space<vmem>>, vector<128x512xf32>
    %cst_9 = arith.constant dense<0.000000e+00> : vector<2x512xf32>
    %12 = tpu.matmul %7, %11, %cst_9 {dimension_numbers = #tpu.dot_dimension_numbers<[1], [0], [0], [1], [0, 0, 1, 1], [], []>} : vector<2x128xf32>, vector<128x512xf32>, vector<2x512xf32> -> vector<2x512xf32>
    %13 = arith.addf %10, %12 : vector<2x512xf32>
    %14 = vector.extract_strided_slice %13 {offsets = [0, 0], sizes = [2, 128], strides = [1, 1]} : vector<2x512xf32> to vector<2x128xf32>
    %15 = arith.negf %14 : vector<2x128xf32>
    %16 = math.exp %15 : vector<2x128xf32>
    %cst_10 = arith.constant 1.000000e+00 : f32
    %17 = vector.broadcast %cst_10 : f32 to vector<2x128xf32>
    %18 = arith.addf %17, %16 : vector<2x128xf32>
    %19 = arith.divf %17, %18 : vector<2x128xf32>
    %20 = vector.extract_strided_slice %13 {offsets = [0, 128], sizes = [2, 128], strides = [1, 1]} : vector<2x512xf32> to vector<2x128xf32>
    %21 = arith.negf %20 : vector<2x128xf32>
    %22 = math.exp %21 : vector<2x128xf32>
    %cst_11 = arith.constant 1.000000e+00 : f32
    %23 = vector.broadcast %cst_11 : f32 to vector<2x128xf32>
    %24 = arith.addf %23, %22 : vector<2x128xf32>
    %25 = arith.divf %23, %24 : vector<2x128xf32>
    %26 = vector.extract_strided_slice %13 {offsets = [0, 256], sizes = [2, 128], strides = [1, 1]} : vector<2x512xf32> to vector<2x128xf32>
    %27 = math.tanh %26 : vector<2x128xf32>
    %28 = vector.extract_strided_slice %13 {offsets = [0, 384], sizes = [2, 128], strides = [1, 1]} : vector<2x512xf32> to vector<2x128xf32>
    %29 = arith.negf %28 : vector<2x128xf32>
    %30 = math.exp %29 : vector<2x128xf32>
    %cst_12 = arith.constant 1.000000e+00 : f32
    %31 = vector.broadcast %cst_12 : f32 to vector<2x128xf32>
    %32 = arith.addf %31, %30 : vector<2x128xf32>
    %33 = arith.divf %31, %32 : vector<2x128xf32>
    %34 = arith.mulf %25, %8 : vector<2x128xf32>
    %35 = arith.mulf %19, %27 : vector<2x128xf32>
    %36 = arith.addf %34, %35 : vector<2x128xf32>
    %37 = math.tanh %36 : vector<2x128xf32>
    %38 = arith.mulf %33, %37 : vector<2x128xf32>
    %c0_13 = arith.constant 0 : index
    %c0_14 = arith.constant 0 : index
    %39 = vector.load %arg10[%c0_13, %c0_14] : memref<16x128xf32, #tpu.memory_space<vmem>>, vector<2x128xf32>
    tpu.vector_store %arg10[%c0_13, %c0_14], %38 {strides = array<i32>} : memref<16x128xf32, #tpu.memory_space<vmem>>, vector<2x128xf32>,
    %40 = vector.extract_strided_slice %6 {offsets = [1, 0, 0], sizes = [1, 2, 512], strides = [1, 1, 1]} : vector<8x2x512xf32> to vector<1x2x512xf32>
    %41 = vector.shape_cast %40 : vector<1x2x512xf32> to vector<2x512xf32>
    %c0_15 = arith.constant 0 : index
    %c0_16 = arith.constant 0 : index
    %42 = vector.load %arg3[%c0_15, %c0_16] : memref<128x512xf32, #tpu.memory_space<vmem>>, vector<128x512xf32>
    %cst_17 = arith.constant dense<0.000000e+00> : vector<2x512xf32>
    %43 = tpu.matmul %38, %42, %cst_17 {dimension_numbers = #tpu.dot_dimension_numbers<[1], [0], [0], [1], [0, 0, 1, 1], [], []>} : vector<2x128xf32>, vector<128x512xf32>, vector<2x512xf32> -> vector<2x512xf32>
    %44 = arith.addf %41, %43 : vector<2x512xf32>
    %45 = vector.extract_strided_slice %44 {offsets = [0, 0], sizes = [2, 128], strides = [1, 1]} : vector<2x512xf32> to vector<2x128xf32>
    %46 = arith.negf %45 : vector<2x128xf32>
    %47 = math.exp %46 : vector<2x128xf32>
    %cst_18 = arith.constant 1.000000e+00 : f32
    %48 = vector.broadcast %cst_18 : f32 to vector<2x128xf32>
    %49 = arith.addf %48, %47 : vector<2x128xf32>
    %50 = arith.divf %48, %49 : vector<2x128xf32>
    %51 = vector.extract_strided_slice %44 {offsets = [0, 128], sizes = [2, 128], strides = [1, 1]} : vector<2x512xf32> to vector<2x128xf32>
    %52 = arith.negf %51 : vector<2x128xf32>
    %53 = math.exp %52 : vector<2x128xf32>
    %cst_19 = arith.constant 1.000000e+00 : f32
    %54 = vector.broadcast %cst_19 : f32 to vector<2x128xf32>
    %55 = arith.addf %54, %53 : vector<2x128xf32>
    %56 = arith.divf %54, %55 : vector<2x128xf32>
    %57 = vector.extract_strided_slice %44 {offsets = [0, 256], sizes = [2, 128], strides = [1, 1]} : vector<2x512xf32> to vector<2x128xf32>
    %58 = math.tanh %57 : vector<2x128xf32>
    %59 = vector.extract_strided_slice %44 {offsets = [0, 384], sizes = [2, 128], strides = [1, 1]} : vector<2x512xf32> to vector<2x128xf32>
    %60 = arith.negf %59 : vector<2x128xf32>
    %61 = math.exp %60 : vector<2x128xf32>
    %cst_20 = arith.constant 1.000000e+00 : f32
    %62 = vector.broadcast %cst_20 : f32 to vector<2x128xf32>
    %63 = arith.addf %62, %61 : vector<2x128xf32>
    %64 = arith.divf %62, %63 : vector<2x128xf32>
    %65 = arith.mulf %56, %36 : vector<2x128xf32>
    %66 = arith.mulf %50, %58 : vector<2x128xf32>
    %67 = arith.addf %65, %66 : vector<2x128xf32>
    %68 = math.tanh %67 : vector<2x128xf32>
    %69 = arith.mulf %64, %68 : vector<2x128xf32>
    %c2 = arith.constant 2 : index
    %c0_21 = arith.constant 0 : index
    %70 = vector.load %arg10[%c2, %c0_21] : memref<16x128xf32, #tpu.memory_space<vmem>>, vector<2x128xf32>
    tpu.vector_store %arg10[%c2, %c0_21], %69 {strides = array<i32>} : memref<16x128xf32, #tpu.memory_space<vmem>>, vector<2x128xf32>,
    %71 = vector.extract_strided_slice %6 {offsets = [2, 0, 0], sizes = [1, 2, 512], strides = [1, 1, 1]} : vector<8x2x512xf32> to vector<1x2x512xf32>
    %72 = vector.shape_cast %71 : vector<1x2x512xf32> to vector<2x512xf32>
    %c0_22 = arith.constant 0 : index
    %c0_23 = arith.constant 0 : index
    %73 = vector.load %arg3[%c0_22, %c0_23] : memref<128x512xf32, #tpu.memory_space<vmem>>, vector<128x512xf32>
    %cst_24 = arith.constant dense<0.000000e+00> : vector<2x512xf32>
    %74 = tpu.matmul %69, %73, %cst_24 {dimension_numbers = #tpu.dot_dimension_numbers<[1], [0], [0], [1], [0, 0, 1, 1], [], []>} : vector<2x128xf32>, vector<128x512xf32>, vector<2x512xf32> -> vector<2x512xf32>
    %75 = arith.addf %72, %74 : vector<2x512xf32>
    %76 = vector.extract_strided_slice %75 {offsets = [0, 0], sizes = [2, 128], strides = [1, 1]} : vector<2x512xf32> to vector<2x128xf32>
    %77 = arith.negf %76 : vector<2x128xf32>
    %78 = math.exp %77 : vector<2x128xf32>
    %cst_25 = arith.constant 1.000000e+00 : f32
    %79 = vector.broadcast %cst_25 : f32 to vector<2x128xf32>
    %80 = arith.addf %79, %78 : vector<2x128xf32>
    %81 = arith.divf %79, %80 : vector<2x128xf32>
    %82 = vector.extract_strided_slice %75 {offsets = [0, 128], sizes = [2, 128], strides = [1, 1]} : vector<2x512xf32> to vector<2x128xf32>
    %83 = arith.negf %82 : vector<2x128xf32>
    %84 = math.exp %83 : vector<2x128xf32>
    %cst_26 = arith.constant 1.000000e+00 : f32
    %85 = vector.broadcast %cst_26 : f32 to vector<2x128xf32>
    %86 = arith.addf %85, %84 : vector<2x128xf32>
    %87 = arith.divf %85, %86 : vector<2x128xf32>
    %88 = vector.extract_strided_slice %75 {offsets = [0, 256], sizes = [2, 128], strides = [1, 1]} : vector<2x512xf32> to vector<2x128xf32>
    %89 = math.tanh %88 : vector<2x128xf32>
    %90 = vector.extract_strided_slice %75 {offsets = [0, 384], sizes = [2, 128], strides = [1, 1]} : vector<2x512xf32> to vector<2x128xf32>
    %91 = arith.negf %90 : vector<2x128xf32>
    %92 = math.exp %91 : vector<2x128xf32>
    %cst_27 = arith.constant 1.000000e+00 : f32
    %93 = vector.broadcast %cst_27 : f32 to vector<2x128xf32>
    %94 = arith.addf %93, %92 : vector<2x128xf32>
    %95 = arith.divf %93, %94 : vector<2x128xf32>
    %96 = arith.mulf %87, %67 : vector<2x128xf32>
    %97 = arith.mulf %81, %89 : vector<2x128xf32>
    %98 = arith.addf %96, %97 : vector<2x128xf32>
    %99 = math.tanh %98 : vector<2x128xf32>
    %100 = arith.mulf %95, %99 : vector<2x128xf32>
    %c4 = arith.constant 4 : index
    %c0_28 = arith.constant 0 : index
    %101 = vector.load %arg10[%c4, %c0_28] : memref<16x128xf32, #tpu.memory_space<vmem>>, vector<2x128xf32>
    tpu.vector_store %arg10[%c4, %c0_28], %100 {strides = array<i32>} : memref<16x128xf32, #tpu.memory_space<vmem>>, vector<2x128xf32>,
    %102 = vector.extract_strided_slice %6 {offsets = [3, 0, 0], sizes = [1, 2, 512], strides = [1, 1, 1]} : vector<8x2x512xf32> to vector<1x2x512xf32>
    %103 = vector.shape_cast %102 : vector<1x2x512xf32> to vector<2x512xf32>
    %c0_29 = arith.constant 0 : index
    %c0_30 = arith.constant 0 : index
    %104 = vector.load %arg3[%c0_29, %c0_30] : memref<128x512xf32, #tpu.memory_space<vmem>>, vector<128x512xf32>
    %cst_31 = arith.constant dense<0.000000e+00> : vector<2x512xf32>
    %105 = tpu.matmul %100, %104, %cst_31 {dimension_numbers = #tpu.dot_dimension_numbers<[1], [0], [0], [1], [0, 0, 1, 1], [], []>} : vector<2x128xf32>, vector<128x512xf32>, vector<2x512xf32> -> vector<2x512xf32>
    %106 = arith.addf %103, %105 : vector<2x512xf32>
    %107 = vector.extract_strided_slice %106 {offsets = [0, 0], sizes = [2, 128], strides = [1, 1]} : vector<2x512xf32> to vector<2x128xf32>
    %108 = arith.negf %107 : vector<2x128xf32>
    %109 = math.exp %108 : vector<2x128xf32>
    %cst_32 = arith.constant 1.000000e+00 : f32
    %110 = vector.broadcast %cst_32 : f32 to vector<2x128xf32>
    %111 = arith.addf %110, %109 : vector<2x128xf32>
    %112 = arith.divf %110, %111 : vector<2x128xf32>
    %113 = vector.extract_strided_slice %106 {offsets = [0, 128], sizes = [2, 128], strides = [1, 1]} : vector<2x512xf32> to vector<2x128xf32>
    %114 = arith.negf %113 : vector<2x128xf32>
    %115 = math.exp %114 : vector<2x128xf32>
    %cst_33 = arith.constant 1.000000e+00 : f32
    %116 = vector.broadcast %cst_33 : f32 to vector<2x128xf32>
    %117 = arith.addf %116, %115 : vector<2x128xf32>
    %118 = arith.divf %116, %117 : vector<2x128xf32>
    %119 = vector.extract_strided_slice %106 {offsets = [0, 256], sizes = [2, 128], strides = [1, 1]} : vector<2x512xf32> to vector<2x128xf32>
    %120 = math.tanh %119 : vector<2x128xf32>
    %121 = vector.extract_strided_slice %106 {offsets = [0, 384], sizes = [2, 128], strides = [1, 1]} : vector<2x512xf32> to vector<2x128xf32>
    %122 = arith.negf %121 : vector<2x128xf32>
    %123 = math.exp %122 : vector<2x128xf32>
    %cst_34 = arith.constant 1.000000e+00 : f32
    %124 = vector.broadcast %cst_34 : f32 to vector<2x128xf32>
    %125 = arith.addf %124, %123 : vector<2x128xf32>
    %126 = arith.divf %124, %125 : vector<2x128xf32>
    %127 = arith.mulf %118, %98 : vector<2x128xf32>
    %128 = arith.mulf %112, %120 : vector<2x128xf32>
    %129 = arith.addf %127, %128 : vector<2x128xf32>
    %130 = math.tanh %129 : vector<2x128xf32>
    %131 = arith.mulf %126, %130 : vector<2x128xf32>
    %c6 = arith.constant 6 : index
    %c0_35 = arith.constant 0 : index
    %132 = vector.load %arg10[%c6, %c0_35] : memref<16x128xf32, #tpu.memory_space<vmem>>, vector<2x128xf32>
    tpu.vector_store %arg10[%c6, %c0_35], %131 {strides = array<i32>} : memref<16x128xf32, #tpu.memory_space<vmem>>, vector<2x128xf32>,
    %133 = vector.extract_strided_slice %6 {offsets = [4, 0, 0], sizes = [1, 2, 512], strides = [1, 1, 1]} : vector<8x2x512xf32> to vector<1x2x512xf32>
    %134 = vector.shape_cast %133 : vector<1x2x512xf32> to vector<2x512xf32>
    %c0_36 = arith.constant 0 : index
    %c0_37 = arith.constant 0 : index
    %135 = vector.load %arg3[%c0_36, %c0_37] : memref<128x512xf32, #tpu.memory_space<vmem>>, vector<128x512xf32>
    %cst_38 = arith.constant dense<0.000000e+00> : vector<2x512xf32>
    %136 = tpu.matmul %131, %135, %cst_38 {dimension_numbers = #tpu.dot_dimension_numbers<[1], [0], [0], [1], [0, 0, 1, 1], [], []>} : vector<2x128xf32>, vector<128x512xf32>, vector<2x512xf32> -> vector<2x512xf32>
    %137 = arith.addf %134, %136 : vector<2x512xf32>
    %138 = vector.extract_strided_slice %137 {offsets = [0, 0], sizes = [2, 128], strides = [1, 1]} : vector<2x512xf32> to vector<2x128xf32>
    %139 = arith.negf %138 : vector<2x128xf32>
    %140 = math.exp %139 : vector<2x128xf32>
    %cst_39 = arith.constant 1.000000e+00 : f32
    %141 = vector.broadcast %cst_39 : f32 to vector<2x128xf32>
    %142 = arith.addf %141, %140 : vector<2x128xf32>
    %143 = arith.divf %141, %142 : vector<2x128xf32>
    %144 = vector.extract_strided_slice %137 {offsets = [0, 128], sizes = [2, 128], strides = [1, 1]} : vector<2x512xf32> to vector<2x128xf32>
    %145 = arith.negf %144 : vector<2x128xf32>
    %146 = math.exp %145 : vector<2x128xf32>
    %cst_40 = arith.constant 1.000000e+00 : f32
    %147 = vector.broadcast %cst_40 : f32 to vector<2x128xf32>
    %148 = arith.addf %147, %146 : vector<2x128xf32>
    %149 = arith.divf %147, %148 : vector<2x128xf32>
    %150 = vector.extract_strided_slice %137 {offsets = [0, 256], sizes = [2, 128], strides = [1, 1]} : vector<2x512xf32> to vector<2x128xf32>
    %151 = math.tanh %150 : vector<2x128xf32>
    %152 = vector.extract_strided_slice %137 {offsets = [0, 384], sizes = [2, 128], strides = [1, 1]} : vector<2x512xf32> to vector<2x128xf32>
    %153 = arith.negf %152 : vector<2x128xf32>
    %154 = math.exp %153 : vector<2x128xf32>
    %cst_41 = arith.constant 1.000000e+00 : f32
    %155 = vector.broadcast %cst_41 : f32 to vector<2x128xf32>
    %156 = arith.addf %155, %154 : vector<2x128xf32>
    %157 = arith.divf %155, %156 : vector<2x128xf32>
    %158 = arith.mulf %149, %129 : vector<2x128xf32>
    %159 = arith.mulf %143, %151 : vector<2x128xf32>
    %160 = arith.addf %158, %159 : vector<2x128xf32>
    %161 = math.tanh %160 : vector<2x128xf32>
    %162 = arith.mulf %157, %161 : vector<2x128xf32>
    %c8 = arith.constant 8 : index
    %c0_42 = arith.constant 0 : index
    %163 = vector.load %arg10[%c8, %c0_42] : memref<16x128xf32, #tpu.memory_space<vmem>>, vector<2x128xf32>
    tpu.vector_store %arg10[%c8, %c0_42], %162 {strides = array<i32>} : memref<16x128xf32, #tpu.memory_space<vmem>>, vector<2x128xf32>,
    %164 = vector.extract_strided_slice %6 {offsets = [5, 0, 0], sizes = [1, 2, 512], strides = [1, 1, 1]} : vector<8x2x512xf32> to vector<1x2x512xf32>
    %165 = vector.shape_cast %164 : vector<1x2x512xf32> to vector<2x512xf32>
    %c0_43 = arith.constant 0 : index
    %c0_44 = arith.constant 0 : index
    %166 = vector.load %arg3[%c0_43, %c0_44] : memref<128x512xf32, #tpu.memory_space<vmem>>, vector<128x512xf32>
    %cst_45 = arith.constant dense<0.000000e+00> : vector<2x512xf32>
    %167 = tpu.matmul %162, %166, %cst_45 {dimension_numbers = #tpu.dot_dimension_numbers<[1], [0], [0], [1], [0, 0, 1, 1], [], []>} : vector<2x128xf32>, vector<128x512xf32>, vector<2x512xf32> -> vector<2x512xf32>
    %168 = arith.addf %165, %167 : vector<2x512xf32>
    %169 = vector.extract_strided_slice %168 {offsets = [0, 0], sizes = [2, 128], strides = [1, 1]} : vector<2x512xf32> to vector<2x128xf32>
    %170 = arith.negf %169 : vector<2x128xf32>
    %171 = math.exp %170 : vector<2x128xf32>
    %cst_46 = arith.constant 1.000000e+00 : f32
    %172 = vector.broadcast %cst_46 : f32 to vector<2x128xf32>
    %173 = arith.addf %172, %171 : vector<2x128xf32>
    %174 = arith.divf %172, %173 : vector<2x128xf32>
    %175 = vector.extract_strided_slice %168 {offsets = [0, 128], sizes = [2, 128], strides = [1, 1]} : vector<2x512xf32> to vector<2x128xf32>
    %176 = arith.negf %175 : vector<2x128xf32>
    %177 = math.exp %176 : vector<2x128xf32>
    %cst_47 = arith.constant 1.000000e+00 : f32
    %178 = vector.broadcast %cst_47 : f32 to vector<2x128xf32>
    %179 = arith.addf %178, %177 : vector<2x128xf32>
    %180 = arith.divf %178, %179 : vector<2x128xf32>
    %181 = vector.extract_strided_slice %168 {offsets = [0, 256], sizes = [2, 128], strides = [1, 1]} : vector<2x512xf32> to vector<2x128xf32>
    %182 = math.tanh %181 : vector<2x128xf32>
    %183 = vector.extract_strided_slice %168 {offsets = [0, 384], sizes = [2, 128], strides = [1, 1]} : vector<2x512xf32> to vector<2x128xf32>
    %184 = arith.negf %183 : vector<2x128xf32>
    %185 = math.exp %184 : vector<2x128xf32>
    %cst_48 = arith.constant 1.000000e+00 : f32
    %186 = vector.broadcast %cst_48 : f32 to vector<2x128xf32>
    %187 = arith.addf %186, %185 : vector<2x128xf32>
    %188 = arith.divf %186, %187 : vector<2x128xf32>
    %189 = arith.mulf %180, %160 : vector<2x128xf32>
    %190 = arith.mulf %174, %182 : vector<2x128xf32>
    %191 = arith.addf %189, %190 : vector<2x128xf32>
    %192 = math.tanh %191 : vector<2x128xf32>
    %193 = arith.mulf %188, %192 : vector<2x128xf32>
    %c10 = arith.constant 10 : index
    %c0_49 = arith.constant 0 : index
    %194 = vector.load %arg10[%c10, %c0_49] : memref<16x128xf32, #tpu.memory_space<vmem>>, vector<2x128xf32>
    tpu.vector_store %arg10[%c10, %c0_49], %193 {strides = array<i32>} : memref<16x128xf32, #tpu.memory_space<vmem>>, vector<2x128xf32>,
    %195 = vector.extract_strided_slice %6 {offsets = [6, 0, 0], sizes = [1, 2, 512], strides = [1, 1, 1]} : vector<8x2x512xf32> to vector<1x2x512xf32>
    %196 = vector.shape_cast %195 : vector<1x2x512xf32> to vector<2x512xf32>
    %c0_50 = arith.constant 0 : index
    %c0_51 = arith.constant 0 : index
    %197 = vector.load %arg3[%c0_50, %c0_51] : memref<128x512xf32, #tpu.memory_space<vmem>>, vector<128x512xf32>
    %cst_52 = arith.constant dense<0.000000e+00> : vector<2x512xf32>
    %198 = tpu.matmul %193, %197, %cst_52 {dimension_numbers = #tpu.dot_dimension_numbers<[1], [0], [0], [1], [0, 0, 1, 1], [], []>} : vector<2x128xf32>, vector<128x512xf32>, vector<2x512xf32> -> vector<2x512xf32>
    %199 = arith.addf %196, %198 : vector<2x512xf32>
    %200 = vector.extract_strided_slice %199 {offsets = [0, 0], sizes = [2, 128], strides = [1, 1]} : vector<2x512xf32> to vector<2x128xf32>
    %201 = arith.negf %200 : vector<2x128xf32>
    %202 = math.exp %201 : vector<2x128xf32>
    %cst_53 = arith.constant 1.000000e+00 : f32
    %203 = vector.broadcast %cst_53 : f32 to vector<2x128xf32>
    %204 = arith.addf %203, %202 : vector<2x128xf32>
    %205 = arith.divf %203, %204 : vector<2x128xf32>
    %206 = vector.extract_strided_slice %199 {offsets = [0, 128], sizes = [2, 128], strides = [1, 1]} : vector<2x512xf32> to vector<2x128xf32>
    %207 = arith.negf %206 : vector<2x128xf32>
    %208 = math.exp %207 : vector<2x128xf32>
    %cst_54 = arith.constant 1.000000e+00 : f32
    %209 = vector.broadcast %cst_54 : f32 to vector<2x128xf32>
    %210 = arith.addf %209, %208 : vector<2x128xf32>
    %211 = arith.divf %209, %210 : vector<2x128xf32>
    %212 = vector.extract_strided_slice %199 {offsets = [0, 256], sizes = [2, 128], strides = [1, 1]} : vector<2x512xf32> to vector<2x128xf32>
    %213 = math.tanh %212 : vector<2x128xf32>
    %214 = vector.extract_strided_slice %199 {offsets = [0, 384], sizes = [2, 128], strides = [1, 1]} : vector<2x512xf32> to vector<2x128xf32>
    %215 = arith.negf %214 : vector<2x128xf32>
    %216 = math.exp %215 : vector<2x128xf32>
    %cst_55 = arith.constant 1.000000e+00 : f32
    %217 = vector.broadcast %cst_55 : f32 to vector<2x128xf32>
    %218 = arith.addf %217, %216 : vector<2x128xf32>
    %219 = arith.divf %217, %218 : vector<2x128xf32>
    %220 = arith.mulf %211, %191 : vector<2x128xf32>
    %221 = arith.mulf %205, %213 : vector<2x128xf32>
    %222 = arith.addf %220, %221 : vector<2x128xf32>
    %223 = math.tanh %222 : vector<2x128xf32>
    %224 = arith.mulf %219, %223 : vector<2x128xf32>
    %c12 = arith.constant 12 : index
    %c0_56 = arith.constant 0 : index
    %225 = vector.load %arg10[%c12, %c0_56] : memref<16x128xf32, #tpu.memory_space<vmem>>, vector<2x128xf32>
    tpu.vector_store %arg10[%c12, %c0_56], %224 {strides = array<i32>} : memref<16x128xf32, #tpu.memory_space<vmem>>, vector<2x128xf32>,
    %226 = vector.extract_strided_slice %6 {offsets = [7, 0, 0], sizes = [1, 2, 512], strides = [1, 1, 1]} : vector<8x2x512xf32> to vector<1x2x512xf32>
    %227 = vector.shape_cast %226 : vector<1x2x512xf32> to vector<2x512xf32>
    %c0_57 = arith.constant 0 : index
    %c0_58 = arith.constant 0 : index
    %228 = vector.load %arg3[%c0_57, %c0_58] : memref<128x512xf32, #tpu.memory_space<vmem>>, vector<128x512xf32>
    %cst_59 = arith.constant dense<0.000000e+00> : vector<2x512xf32>
    %229 = tpu.matmul %224, %228, %cst_59 {dimension_numbers = #tpu.dot_dimension_numbers<[1], [0], [0], [1], [0, 0, 1, 1], [], []>} : vector<2x128xf32>, vector<128x512xf32>, vector<2x512xf32> -> vector<2x512xf32>
    %230 = arith.addf %227, %229 : vector<2x512xf32>
    %231 = vector.extract_strided_slice %230 {offsets = [0, 0], sizes = [2, 128], strides = [1, 1]} : vector<2x512xf32> to vector<2x128xf32>
    %232 = arith.negf %231 : vector<2x128xf32>
    %233 = math.exp %232 : vector<2x128xf32>
    %cst_60 = arith.constant 1.000000e+00 : f32
    %234 = vector.broadcast %cst_60 : f32 to vector<2x128xf32>
    %235 = arith.addf %234, %233 : vector<2x128xf32>
    %236 = arith.divf %234, %235 : vector<2x128xf32>
    %237 = vector.extract_strided_slice %230 {offsets = [0, 128], sizes = [2, 128], strides = [1, 1]} : vector<2x512xf32> to vector<2x128xf32>
    %238 = arith.negf %237 : vector<2x128xf32>
    %239 = math.exp %238 : vector<2x128xf32>
    %cst_61 = arith.constant 1.000000e+00 : f32
    %240 = vector.broadcast %cst_61 : f32 to vector<2x128xf32>
    %241 = arith.addf %240, %239 : vector<2x128xf32>
    %242 = arith.divf %240, %241 : vector<2x128xf32>
    %243 = vector.extract_strided_slice %230 {offsets = [0, 256], sizes = [2, 128], strides = [1, 1]} : vector<2x512xf32> to vector<2x128xf32>
    %244 = math.tanh %243 : vector<2x128xf32>
    %245 = vector.extract_strided_slice %230 {offsets = [0, 384], sizes = [2, 128], strides = [1, 1]} : vector<2x512xf32> to vector<2x128xf32>
    %246 = arith.negf %245 : vector<2x128xf32>
    %247 = math.exp %246 : vector<2x128xf32>
    %cst_62 = arith.constant 1.000000e+00 : f32
    %248 = vector.broadcast %cst_62 : f32 to vector<2x128xf32>
    %249 = arith.addf %248, %247 : vector<2x128xf32>
    %250 = arith.divf %248, %249 : vector<2x128xf32>
    %251 = arith.mulf %242, %222 : vector<2x128xf32>
    %252 = arith.mulf %236, %244 : vector<2x128xf32>
    %253 = arith.addf %251, %252 : vector<2x128xf32>
    %254 = math.tanh %253 : vector<2x128xf32>
    %255 = arith.mulf %250, %254 : vector<2x128xf32>
    %c14 = arith.constant 14 : index
    %c0_63 = arith.constant 0 : index
    %256 = vector.load %arg10[%c14, %c0_63] : memref<16x128xf32, #tpu.memory_space<vmem>>, vector<2x128xf32>
    tpu.vector_store %arg10[%c14, %c0_63], %255 {strides = array<i32>} : memref<16x128xf32, #tpu.memory_space<vmem>>, vector<2x128xf32>,
    %c0_64 = arith.constant 0 : index
    %c0_65 = arith.constant 0 : index
    %257 = vector.load %arg10[%c0_64, %c0_65] : memref<16x128xf32, #tpu.memory_space<vmem>>, vector<16x128xf32>
    %c0_66 = arith.constant 0 : index
    %c0_67 = arith.constant 0 : index
    %258 = vector.load %arg4[%c0_66, %c0_67] : memref<128x512xf32, #tpu.memory_space<vmem>>, vector<128x512xf32>
    %cst_68 = arith.constant dense<0.000000e+00> : vector<16x512xf32>
    %259 = tpu.matmul %257, %258, %cst_68 {dimension_numbers = #tpu.dot_dimension_numbers<[1], [0], [0], [1], [0, 0, 1, 1], [], []>} : vector<16x128xf32>, vector<128x512xf32>, vector<16x512xf32> -> vector<16x512xf32>
    %c0_69 = arith.constant 0 : index
    %c0_70 = arith.constant 0 : index
    %260 = vector.load %arg5[%c0_69, %c0_70] : memref<1x512xf32, #tpu.memory_space<vmem>>, vector<1x512xf32>
    %261 = vector.broadcast %260 : vector<1x512xf32> to vector<16x512xf32>
    %262 = arith.addf %259, %261 : vector<16x512xf32>
    %263 = vector.shape_cast %262 : vector<16x512xf32> to vector<8x2x512xf32>
    %cst_71 = arith.constant 0.000000e+00 : f32
    %264 = vector.broadcast %cst_71 : f32 to vector<2x128xf32>
    %cst_72 = arith.constant 0.000000e+00 : f32
    %265 = vector.broadcast %cst_72 : f32 to vector<2x128xf32>
    %266 = vector.extract_strided_slice %263 {offsets = [0, 0, 0], sizes = [1, 2, 512], strides = [1, 1, 1]} : vector<8x2x512xf32> to vector<1x2x512xf32>
    %267 = vector.shape_cast %266 : vector<1x2x512xf32> to vector<2x512xf32>
    %c0_73 = arith.constant 0 : index
    %c0_74 = arith.constant 0 : index
    %268 = vector.load %arg6[%c0_73, %c0_74] : memref<128x512xf32, #tpu.memory_space<vmem>>, vector<128x512xf32>
    %cst_75 = arith.constant dense<0.000000e+00> : vector<2x512xf32>
    %269 = tpu.matmul %264, %268, %cst_75 {dimension_numbers = #tpu.dot_dimension_numbers<[1], [0], [0], [1], [0, 0, 1, 1], [], []>} : vector<2x128xf32>, vector<128x512xf32>, vector<2x512xf32> -> vector<2x512xf32>
    %270 = arith.addf %267, %269 : vector<2x512xf32>
    %271 = vector.extract_strided_slice %270 {offsets = [0, 0], sizes = [2, 128], strides = [1, 1]} : vector<2x512xf32> to vector<2x128xf32>
    %272 = arith.negf %271 : vector<2x128xf32>
    %273 = math.exp %272 : vector<2x128xf32>
    %cst_76 = arith.constant 1.000000e+00 : f32
    %274 = vector.broadcast %cst_76 : f32 to vector<2x128xf32>
    %275 = arith.addf %274, %273 : vector<2x128xf32>
    %276 = arith.divf %274, %275 : vector<2x128xf32>
    %277 = vector.extract_strided_slice %270 {offsets = [0, 128], sizes = [2, 128], strides = [1, 1]} : vector<2x512xf32> to vector<2x128xf32>
    %278 = arith.negf %277 : vector<2x128xf32>
    %279 = math.exp %278 : vector<2x128xf32>
    %cst_77 = arith.constant 1.000000e+00 : f32
    %280 = vector.broadcast %cst_77 : f32 to vector<2x128xf32>
    %281 = arith.addf %280, %279 : vector<2x128xf32>
    %282 = arith.divf %280, %281 : vector<2x128xf32>
    %283 = vector.extract_strided_slice %270 {offsets = [0, 256], sizes = [2, 128], strides = [1, 1]} : vector<2x512xf32> to vector<2x128xf32>
    %284 = math.tanh %283 : vector<2x128xf32>
    %285 = vector.extract_strided_slice %270 {offsets = [0, 384], sizes = [2, 128], strides = [1, 1]} : vector<2x512xf32> to vector<2x128xf32>
    %286 = arith.negf %285 : vector<2x128xf32>
    %287 = math.exp %286 : vector<2x128xf32>
    %cst_78 = arith.constant 1.000000e+00 : f32
    %288 = vector.broadcast %cst_78 : f32 to vector<2x128xf32>
    %289 = arith.addf %288, %287 : vector<2x128xf32>
    %290 = arith.divf %288, %289 : vector<2x128xf32>
    %291 = arith.mulf %282, %265 : vector<2x128xf32>
    %292 = arith.mulf %276, %284 : vector<2x128xf32>
    %293 = arith.addf %291, %292 : vector<2x128xf32>
    %294 = math.tanh %293 : vector<2x128xf32>
    %295 = arith.mulf %290, %294 : vector<2x128xf32>
    %296 = vector.extract_strided_slice %263 {offsets = [1, 0, 0], sizes = [1, 2, 512], strides = [1, 1, 1]} : vector<8x2x512xf32> to vector<1x2x512xf32>
    %297 = vector.shape_cast %296 : vector<1x2x512xf32> to vector<2x512xf32>
    %c0_79 = arith.constant 0 : index
    %c0_80 = arith.constant 0 : index
    %298 = vector.load %arg6[%c0_79, %c0_80] : memref<128x512xf32, #tpu.memory_space<vmem>>, vector<128x512xf32>
    %cst_81 = arith.constant dense<0.000000e+00> : vector<2x512xf32>
    %299 = tpu.matmul %295, %298, %cst_81 {dimension_numbers = #tpu.dot_dimension_numbers<[1], [0], [0], [1], [0, 0, 1, 1], [], []>} : vector<2x128xf32>, vector<128x512xf32>, vector<2x512xf32> -> vector<2x512xf32>
    %300 = arith.addf %297, %299 : vector<2x512xf32>
    %301 = vector.extract_strided_slice %300 {offsets = [0, 0], sizes = [2, 128], strides = [1, 1]} : vector<2x512xf32> to vector<2x128xf32>
    %302 = arith.negf %301 : vector<2x128xf32>
    %303 = math.exp %302 : vector<2x128xf32>
    %cst_82 = arith.constant 1.000000e+00 : f32
    %304 = vector.broadcast %cst_82 : f32 to vector<2x128xf32>
    %305 = arith.addf %304, %303 : vector<2x128xf32>
    %306 = arith.divf %304, %305 : vector<2x128xf32>
    %307 = vector.extract_strided_slice %300 {offsets = [0, 128], sizes = [2, 128], strides = [1, 1]} : vector<2x512xf32> to vector<2x128xf32>
    %308 = arith.negf %307 : vector<2x128xf32>
    %309 = math.exp %308 : vector<2x128xf32>
    %cst_83 = arith.constant 1.000000e+00 : f32
    %310 = vector.broadcast %cst_83 : f32 to vector<2x128xf32>
    %311 = arith.addf %310, %309 : vector<2x128xf32>
    %312 = arith.divf %310, %311 : vector<2x128xf32>
    %313 = vector.extract_strided_slice %300 {offsets = [0, 256], sizes = [2, 128], strides = [1, 1]} : vector<2x512xf32> to vector<2x128xf32>
    %314 = math.tanh %313 : vector<2x128xf32>
    %315 = vector.extract_strided_slice %300 {offsets = [0, 384], sizes = [2, 128], strides = [1, 1]} : vector<2x512xf32> to vector<2x128xf32>
    %316 = arith.negf %315 : vector<2x128xf32>
    %317 = math.exp %316 : vector<2x128xf32>
    %cst_84 = arith.constant 1.000000e+00 : f32
    %318 = vector.broadcast %cst_84 : f32 to vector<2x128xf32>
    %319 = arith.addf %318, %317 : vector<2x128xf32>
    %320 = arith.divf %318, %319 : vector<2x128xf32>
    %321 = arith.mulf %312, %293 : vector<2x128xf32>
    %322 = arith.mulf %306, %314 : vector<2x128xf32>
    %323 = arith.addf %321, %322 : vector<2x128xf32>
    %324 = math.tanh %323 : vector<2x128xf32>
    %325 = arith.mulf %320, %324 : vector<2x128xf32>
    %326 = vector.extract_strided_slice %263 {offsets = [2, 0, 0], sizes = [1, 2, 512], strides = [1, 1, 1]} : vector<8x2x512xf32> to vector<1x2x512xf32>
    %327 = vector.shape_cast %326 : vector<1x2x512xf32> to vector<2x512xf32>
    %c0_85 = arith.constant 0 : index
    %c0_86 = arith.constant 0 : index
    %328 = vector.load %arg6[%c0_85, %c0_86] : memref<128x512xf32, #tpu.memory_space<vmem>>, vector<128x512xf32>
    %cst_87 = arith.constant dense<0.000000e+00> : vector<2x512xf32>
    %329 = tpu.matmul %325, %328, %cst_87 {dimension_numbers = #tpu.dot_dimension_numbers<[1], [0], [0], [1], [0, 0, 1, 1], [], []>} : vector<2x128xf32>, vector<128x512xf32>, vector<2x512xf32> -> vector<2x512xf32>
    %330 = arith.addf %327, %329 : vector<2x512xf32>
    %331 = vector.extract_strided_slice %330 {offsets = [0, 0], sizes = [2, 128], strides = [1, 1]} : vector<2x512xf32> to vector<2x128xf32>
    %332 = arith.negf %331 : vector<2x128xf32>
    %333 = math.exp %332 : vector<2x128xf32>
    %cst_88 = arith.constant 1.000000e+00 : f32
    %334 = vector.broadcast %cst_88 : f32 to vector<2x128xf32>
    %335 = arith.addf %334, %333 : vector<2x128xf32>
    %336 = arith.divf %334, %335 : vector<2x128xf32>
    %337 = vector.extract_strided_slice %330 {offsets = [0, 128], sizes = [2, 128], strides = [1, 1]} : vector<2x512xf32> to vector<2x128xf32>
    %338 = arith.negf %337 : vector<2x128xf32>
    %339 = math.exp %338 : vector<2x128xf32>
    %cst_89 = arith.constant 1.000000e+00 : f32
    %340 = vector.broadcast %cst_89 : f32 to vector<2x128xf32>
    %341 = arith.addf %340, %339 : vector<2x128xf32>
    %342 = arith.divf %340, %341 : vector<2x128xf32>
    %343 = vector.extract_strided_slice %330 {offsets = [0, 256], sizes = [2, 128], strides = [1, 1]} : vector<2x512xf32> to vector<2x128xf32>
    %344 = math.tanh %343 : vector<2x128xf32>
    %345 = vector.extract_strided_slice %330 {offsets = [0, 384], sizes = [2, 128], strides = [1, 1]} : vector<2x512xf32> to vector<2x128xf32>
    %346 = arith.negf %345 : vector<2x128xf32>
    %347 = math.exp %346 : vector<2x128xf32>
    %cst_90 = arith.constant 1.000000e+00 : f32
    %348 = vector.broadcast %cst_90 : f32 to vector<2x128xf32>
    %349 = arith.addf %348, %347 : vector<2x128xf32>
    %350 = arith.divf %348, %349 : vector<2x128xf32>
    %351 = arith.mulf %342, %323 : vector<2x128xf32>
    %352 = arith.mulf %336, %344 : vector<2x128xf32>
    %353 = arith.addf %351, %352 : vector<2x128xf32>
    %354 = math.tanh %353 : vector<2x128xf32>
    %355 = arith.mulf %350, %354 : vector<2x128xf32>
    %356 = vector.extract_strided_slice %263 {offsets = [3, 0, 0], sizes = [1, 2, 512], strides = [1, 1, 1]} : vector<8x2x512xf32> to vector<1x2x512xf32>
    %357 = vector.shape_cast %356 : vector<1x2x512xf32> to vector<2x512xf32>
    %c0_91 = arith.constant 0 : index
    %c0_92 = arith.constant 0 : index
    %358 = vector.load %arg6[%c0_91, %c0_92] : memref<128x512xf32, #tpu.memory_space<vmem>>, vector<128x512xf32>
    %cst_93 = arith.constant dense<0.000000e+00> : vector<2x512xf32>
    %359 = tpu.matmul %355, %358, %cst_93 {dimension_numbers = #tpu.dot_dimension_numbers<[1], [0], [0], [1], [0, 0, 1, 1], [], []>} : vector<2x128xf32>, vector<128x512xf32>, vector<2x512xf32> -> vector<2x512xf32>
    %360 = arith.addf %357, %359 : vector<2x512xf32>
    %361 = vector.extract_strided_slice %360 {offsets = [0, 0], sizes = [2, 128], strides = [1, 1]} : vector<2x512xf32> to vector<2x128xf32>
    %362 = arith.negf %361 : vector<2x128xf32>
    %363 = math.exp %362 : vector<2x128xf32>
    %cst_94 = arith.constant 1.000000e+00 : f32
    %364 = vector.broadcast %cst_94 : f32 to vector<2x128xf32>
    %365 = arith.addf %364, %363 : vector<2x128xf32>
    %366 = arith.divf %364, %365 : vector<2x128xf32>
    %367 = vector.extract_strided_slice %360 {offsets = [0, 128], sizes = [2, 128], strides = [1, 1]} : vector<2x512xf32> to vector<2x128xf32>
    %368 = arith.negf %367 : vector<2x128xf32>
    %369 = math.exp %368 : vector<2x128xf32>
    %cst_95 = arith.constant 1.000000e+00 : f32
    %370 = vector.broadcast %cst_95 : f32 to vector<2x128xf32>
    %371 = arith.addf %370, %369 : vector<2x128xf32>
    %372 = arith.divf %370, %371 : vector<2x128xf32>
    %373 = vector.extract_strided_slice %360 {offsets = [0, 256], sizes = [2, 128], strides = [1, 1]} : vector<2x512xf32> to vector<2x128xf32>
    %374 = math.tanh %373 : vector<2x128xf32>
    %375 = vector.extract_strided_slice %360 {offsets = [0, 384], sizes = [2, 128], strides = [1, 1]} : vector<2x512xf32> to vector<2x128xf32>
    %376 = arith.negf %375 : vector<2x128xf32>
    %377 = math.exp %376 : vector<2x128xf32>
    %cst_96 = arith.constant 1.000000e+00 : f32
    %378 = vector.broadcast %cst_96 : f32 to vector<2x128xf32>
    %379 = arith.addf %378, %377 : vector<2x128xf32>
    %380 = arith.divf %378, %379 : vector<2x128xf32>
    %381 = arith.mulf %372, %353 : vector<2x128xf32>
    %382 = arith.mulf %366, %374 : vector<2x128xf32>
    %383 = arith.addf %381, %382 : vector<2x128xf32>
    %384 = math.tanh %383 : vector<2x128xf32>
    %385 = arith.mulf %380, %384 : vector<2x128xf32>
    %386 = vector.extract_strided_slice %263 {offsets = [4, 0, 0], sizes = [1, 2, 512], strides = [1, 1, 1]} : vector<8x2x512xf32> to vector<1x2x512xf32>
    %387 = vector.shape_cast %386 : vector<1x2x512xf32> to vector<2x512xf32>
    %c0_97 = arith.constant 0 : index
    %c0_98 = arith.constant 0 : index
    %388 = vector.load %arg6[%c0_97, %c0_98] : memref<128x512xf32, #tpu.memory_space<vmem>>, vector<128x512xf32>
    %cst_99 = arith.constant dense<0.000000e+00> : vector<2x512xf32>
    %389 = tpu.matmul %385, %388, %cst_99 {dimension_numbers = #tpu.dot_dimension_numbers<[1], [0], [0], [1], [0, 0, 1, 1], [], []>} : vector<2x128xf32>, vector<128x512xf32>, vector<2x512xf32> -> vector<2x512xf32>
    %390 = arith.addf %387, %389 : vector<2x512xf32>
    %391 = vector.extract_strided_slice %390 {offsets = [0, 0], sizes = [2, 128], strides = [1, 1]} : vector<2x512xf32> to vector<2x128xf32>
    %392 = arith.negf %391 : vector<2x128xf32>
    %393 = math.exp %392 : vector<2x128xf32>
    %cst_100 = arith.constant 1.000000e+00 : f32
    %394 = vector.broadcast %cst_100 : f32 to vector<2x128xf32>
    %395 = arith.addf %394, %393 : vector<2x128xf32>
    %396 = arith.divf %394, %395 : vector<2x128xf32>
    %397 = vector.extract_strided_slice %390 {offsets = [0, 128], sizes = [2, 128], strides = [1, 1]} : vector<2x512xf32> to vector<2x128xf32>
    %398 = arith.negf %397 : vector<2x128xf32>
    %399 = math.exp %398 : vector<2x128xf32>
    %cst_101 = arith.constant 1.000000e+00 : f32
    %400 = vector.broadcast %cst_101 : f32 to vector<2x128xf32>
    %401 = arith.addf %400, %399 : vector<2x128xf32>
    %402 = arith.divf %400, %401 : vector<2x128xf32>
    %403 = vector.extract_strided_slice %390 {offsets = [0, 256], sizes = [2, 128], strides = [1, 1]} : vector<2x512xf32> to vector<2x128xf32>
    %404 = math.tanh %403 : vector<2x128xf32>
    %405 = vector.extract_strided_slice %390 {offsets = [0, 384], sizes = [2, 128], strides = [1, 1]} : vector<2x512xf32> to vector<2x128xf32>
    %406 = arith.negf %405 : vector<2x128xf32>
    %407 = math.exp %406 : vector<2x128xf32>
    %cst_102 = arith.constant 1.000000e+00 : f32
    %408 = vector.broadcast %cst_102 : f32 to vector<2x128xf32>
    %409 = arith.addf %408, %407 : vector<2x128xf32>
    %410 = arith.divf %408, %409 : vector<2x128xf32>
    %411 = arith.mulf %402, %383 : vector<2x128xf32>
    %412 = arith.mulf %396, %404 : vector<2x128xf32>
    %413 = arith.addf %411, %412 : vector<2x128xf32>
    %414 = math.tanh %413 : vector<2x128xf32>
    %415 = arith.mulf %410, %414 : vector<2x128xf32>
    %416 = vector.extract_strided_slice %263 {offsets = [5, 0, 0], sizes = [1, 2, 512], strides = [1, 1, 1]} : vector<8x2x512xf32> to vector<1x2x512xf32>
    %417 = vector.shape_cast %416 : vector<1x2x512xf32> to vector<2x512xf32>
    %c0_103 = arith.constant 0 : index
    %c0_104 = arith.constant 0 : index
    %418 = vector.load %arg6[%c0_103, %c0_104] : memref<128x512xf32, #tpu.memory_space<vmem>>, vector<128x512xf32>
    %cst_105 = arith.constant dense<0.000000e+00> : vector<2x512xf32>
    %419 = tpu.matmul %415, %418, %cst_105 {dimension_numbers = #tpu.dot_dimension_numbers<[1], [0], [0], [1], [0, 0, 1, 1], [], []>} : vector<2x128xf32>, vector<128x512xf32>, vector<2x512xf32> -> vector<2x512xf32>
    %420 = arith.addf %417, %419 : vector<2x512xf32>
    %421 = vector.extract_strided_slice %420 {offsets = [0, 0], sizes = [2, 128], strides = [1, 1]} : vector<2x512xf32> to vector<2x128xf32>
    %422 = arith.negf %421 : vector<2x128xf32>
    %423 = math.exp %422 : vector<2x128xf32>
    %cst_106 = arith.constant 1.000000e+00 : f32
    %424 = vector.broadcast %cst_106 : f32 to vector<2x128xf32>
    %425 = arith.addf %424, %423 : vector<2x128xf32>
    %426 = arith.divf %424, %425 : vector<2x128xf32>
    %427 = vector.extract_strided_slice %420 {offsets = [0, 128], sizes = [2, 128], strides = [1, 1]} : vector<2x512xf32> to vector<2x128xf32>
    %428 = arith.negf %427 : vector<2x128xf32>
    %429 = math.exp %428 : vector<2x128xf32>
    %cst_107 = arith.constant 1.000000e+00 : f32
    %430 = vector.broadcast %cst_107 : f32 to vector<2x128xf32>
    %431 = arith.addf %430, %429 : vector<2x128xf32>
    %432 = arith.divf %430, %431 : vector<2x128xf32>
    %433 = vector.extract_strided_slice %420 {offsets = [0, 256], sizes = [2, 128], strides = [1, 1]} : vector<2x512xf32> to vector<2x128xf32>
    %434 = math.tanh %433 : vector<2x128xf32>
    %435 = vector.extract_strided_slice %420 {offsets = [0, 384], sizes = [2, 128], strides = [1, 1]} : vector<2x512xf32> to vector<2x128xf32>
    %436 = arith.negf %435 : vector<2x128xf32>
    %437 = math.exp %436 : vector<2x128xf32>
    %cst_108 = arith.constant 1.000000e+00 : f32
    %438 = vector.broadcast %cst_108 : f32 to vector<2x128xf32>
    %439 = arith.addf %438, %437 : vector<2x128xf32>
    %440 = arith.divf %438, %439 : vector<2x128xf32>
    %441 = arith.mulf %432, %413 : vector<2x128xf32>
    %442 = arith.mulf %426, %434 : vector<2x128xf32>
    %443 = arith.addf %441, %442 : vector<2x128xf32>
    %444 = math.tanh %443 : vector<2x128xf32>
    %445 = arith.mulf %440, %444 : vector<2x128xf32>
    %446 = vector.extract_strided_slice %263 {offsets = [6, 0, 0], sizes = [1, 2, 512], strides = [1, 1, 1]} : vector<8x2x512xf32> to vector<1x2x512xf32>
    %447 = vector.shape_cast %446 : vector<1x2x512xf32> to vector<2x512xf32>
    %c0_109 = arith.constant 0 : index
    %c0_110 = arith.constant 0 : index
    %448 = vector.load %arg6[%c0_109, %c0_110] : memref<128x512xf32, #tpu.memory_space<vmem>>, vector<128x512xf32>
    %cst_111 = arith.constant dense<0.000000e+00> : vector<2x512xf32>
    %449 = tpu.matmul %445, %448, %cst_111 {dimension_numbers = #tpu.dot_dimension_numbers<[1], [0], [0], [1], [0, 0, 1, 1], [], []>} : vector<2x128xf32>, vector<128x512xf32>, vector<2x512xf32> -> vector<2x512xf32>
    %450 = arith.addf %447, %449 : vector<2x512xf32>
    %451 = vector.extract_strided_slice %450 {offsets = [0, 0], sizes = [2, 128], strides = [1, 1]} : vector<2x512xf32> to vector<2x128xf32>
    %452 = arith.negf %451 : vector<2x128xf32>
    %453 = math.exp %452 : vector<2x128xf32>
    %cst_112 = arith.constant 1.000000e+00 : f32
    %454 = vector.broadcast %cst_112 : f32 to vector<2x128xf32>
    %455 = arith.addf %454, %453 : vector<2x128xf32>
    %456 = arith.divf %454, %455 : vector<2x128xf32>
    %457 = vector.extract_strided_slice %450 {offsets = [0, 128], sizes = [2, 128], strides = [1, 1]} : vector<2x512xf32> to vector<2x128xf32>
    %458 = arith.negf %457 : vector<2x128xf32>
    %459 = math.exp %458 : vector<2x128xf32>
    %cst_113 = arith.constant 1.000000e+00 : f32
    %460 = vector.broadcast %cst_113 : f32 to vector<2x128xf32>
    %461 = arith.addf %460, %459 : vector<2x128xf32>
    %462 = arith.divf %460, %461 : vector<2x128xf32>
    %463 = vector.extract_strided_slice %450 {offsets = [0, 256], sizes = [2, 128], strides = [1, 1]} : vector<2x512xf32> to vector<2x128xf32>
    %464 = math.tanh %463 : vector<2x128xf32>
    %465 = vector.extract_strided_slice %450 {offsets = [0, 384], sizes = [2, 128], strides = [1, 1]} : vector<2x512xf32> to vector<2x128xf32>
    %466 = arith.negf %465 : vector<2x128xf32>
    %467 = math.exp %466 : vector<2x128xf32>
    %cst_114 = arith.constant 1.000000e+00 : f32
    %468 = vector.broadcast %cst_114 : f32 to vector<2x128xf32>
    %469 = arith.addf %468, %467 : vector<2x128xf32>
    %470 = arith.divf %468, %469 : vector<2x128xf32>
    %471 = arith.mulf %462, %443 : vector<2x128xf32>
    %472 = arith.mulf %456, %464 : vector<2x128xf32>
    %473 = arith.addf %471, %472 : vector<2x128xf32>
    %474 = math.tanh %473 : vector<2x128xf32>
    %475 = arith.mulf %470, %474 : vector<2x128xf32>
    %476 = vector.extract_strided_slice %263 {offsets = [7, 0, 0], sizes = [1, 2, 512], strides = [1, 1, 1]} : vector<8x2x512xf32> to vector<1x2x512xf32>
    %477 = vector.shape_cast %476 : vector<1x2x512xf32> to vector<2x512xf32>
    %c0_115 = arith.constant 0 : index
    %c0_116 = arith.constant 0 : index
    %478 = vector.load %arg6[%c0_115, %c0_116] : memref<128x512xf32, #tpu.memory_space<vmem>>, vector<128x512xf32>
    %cst_117 = arith.constant dense<0.000000e+00> : vector<2x512xf32>
    %479 = tpu.matmul %475, %478, %cst_117 {dimension_numbers = #tpu.dot_dimension_numbers<[1], [0], [0], [1], [0, 0, 1, 1], [], []>} : vector<2x128xf32>, vector<128x512xf32>, vector<2x512xf32> -> vector<2x512xf32>
    %480 = arith.addf %477, %479 : vector<2x512xf32>
    %481 = vector.extract_strided_slice %480 {offsets = [0, 0], sizes = [2, 128], strides = [1, 1]} : vector<2x512xf32> to vector<2x128xf32>
    %482 = arith.negf %481 : vector<2x128xf32>
    %483 = math.exp %482 : vector<2x128xf32>
    %cst_118 = arith.constant 1.000000e+00 : f32
    %484 = vector.broadcast %cst_118 : f32 to vector<2x128xf32>
    %485 = arith.addf %484, %483 : vector<2x128xf32>
    %486 = arith.divf %484, %485 : vector<2x128xf32>
    %487 = vector.extract_strided_slice %480 {offsets = [0, 128], sizes = [2, 128], strides = [1, 1]} : vector<2x512xf32> to vector<2x128xf32>
    %488 = arith.negf %487 : vector<2x128xf32>
    %489 = math.exp %488 : vector<2x128xf32>
    %cst_119 = arith.constant 1.000000e+00 : f32
    %490 = vector.broadcast %cst_119 : f32 to vector<2x128xf32>
    %491 = arith.addf %490, %489 : vector<2x128xf32>
    %492 = arith.divf %490, %491 : vector<2x128xf32>
    %493 = vector.extract_strided_slice %480 {offsets = [0, 256], sizes = [2, 128], strides = [1, 1]} : vector<2x512xf32> to vector<2x128xf32>
    %494 = math.tanh %493 : vector<2x128xf32>
    %495 = vector.extract_strided_slice %480 {offsets = [0, 384], sizes = [2, 128], strides = [1, 1]} : vector<2x512xf32> to vector<2x128xf32>
    %496 = arith.negf %495 : vector<2x128xf32>
    %497 = math.exp %496 : vector<2x128xf32>
    %cst_120 = arith.constant 1.000000e+00 : f32
    %498 = vector.broadcast %cst_120 : f32 to vector<2x128xf32>
    %499 = arith.addf %498, %497 : vector<2x128xf32>
    %500 = arith.divf %498, %499 : vector<2x128xf32>
    %501 = arith.mulf %492, %473 : vector<2x128xf32>
    %502 = arith.mulf %486, %494 : vector<2x128xf32>
    %503 = arith.addf %501, %502 : vector<2x128xf32>
    %504 = math.tanh %503 : vector<2x128xf32>
    %505 = arith.mulf %500, %504 : vector<2x128xf32>
    %c0_121 = arith.constant 0 : index
    %c0_122 = arith.constant 0 : index
    %506 = vector.load %arg7[%c0_121, %c0_122] : memref<128x8xf32, #tpu.memory_space<vmem>>, vector<128x8xf32>
    %cst_123 = arith.constant dense<0.000000e+00> : vector<2x8xf32>
    %507 = tpu.matmul %505, %506, %cst_123 {dimension_numbers = #tpu.dot_dimension_numbers<[1], [0], [0], [1], [0, 0, 1, 1], [], []>} : vector<2x128xf32>, vector<128x8xf32>, vector<2x8xf32> -> vector<2x8xf32>
    %c0_124 = arith.constant 0 : index
    %c0_125 = arith.constant 0 : index
    %508 = vector.load %arg8[%c0_124, %c0_125] : memref<1x8xf32, #tpu.memory_space<vmem>>, vector<1x8xf32>
    %509 = vector.broadcast %508 : vector<1x8xf32> to vector<2x8xf32>
    %510 = arith.addf %507, %509 : vector<2x8xf32>
    %c0_126 = arith.constant 0 : index
    %c0_127 = arith.constant 0 : index
    %511 = vector.load %arg9[%c0_126, %c0_127] : memref<2x8xf32, #tpu.memory_space<vmem>>, vector<2x8xf32>
    tpu.vector_store %arg9[%c0_126, %c0_127], %510 {strides = array<i32>} : memref<2x8xf32, #tpu.memory_space<vmem>>, vector<2x8xf32>,
    return
  }
}

</mosaic_0001>

<bundles_post_ra>
// kernel: lstm_decoder_forward.1
= control target key start
LH: loop header
LB: loop body
LE: loop exit
PB: predicated region body
PF: predicated region fallthrough
CT: control target
= control target key end

     0   :  { %14 = vsyncpa [#allocation4], 0  ;;  %s7287_s0 = inlined_call_operand.vmem [shape: f32[16,16], index: 0, kind: input, shape index: {}]   ;;  %s7288_s1 = inlined_call_operand.vmem [shape: f32[16,512], index: 1, kind: input, shape index: {}]   ;;  %s7289_s2 = inlined_call_operand.vmem [shape: f32[1,512], index: 2, kind: input, shape index: {}]   ;;  %s7290_s3 = inlined_call_operand.hbm [shape: f32[128,512], index: 3, kind: input, shape index: {}]   ;;  %s7291_s4 = inlined_call_operand.hbm [shape: f32[128,512], index: 4, kind: input, shape index: {}]   ;;  %s7292_s5 = inlined_call_operand.vmem [shape: f32[1,512], index: 5, kind: input, shape index: {}]   ;;  %s7293_s6 = inlined_call_operand.hbm [shape: f32[128,512], index: 6, kind: input, shape index: {}]   ;;  %s7294_s7 = inlined_call_operand.vmem [shape: f32[128,8], index: 7, kind: input, shape index: {}]   ;;  %s7295_s8 = inlined_call_operand.vmem [shape: f32[1,8], index: 8, kind: input, shape index: {}]   ;;  %s7296_s9 = inlined_call_operand.hbm [shape: f32[2,8], index: 9, kind: output, shape index: {}]  }
   0x1   :  { %15 = vsyncpa [#allocation7], 0 }
   0x2   :  { %16 = vsyncpa [#allocation5], 0  ;;  %s6101_s30 = smov [#allocation6]   ;;  %s6102_s11 = smov [#allocation3]  }
   0x3   :  { %s40_s10 = sshll.u32 %s6101_s30, 4  ;;  %s28_s12 = sshll.u32 %s6102_s11, 4  ;;  %s41_s10 = int_to_ptr.vmem [resolvable:$true] %s40_s10  ;;  %s6161_s12 = int_to_ptr.vmem [resolvable:$true] %s28_s12 }
   0x4   :  { %s6007_s15 = scalar_lea.hbm %s7291_s4, 8192 }
   0x5   :  { %p6008_p0 = scmp.ne.s32.totalorder %s7291_s4, %s6007_s15  ;;  %p6011_p1 = scmp.lt.u32.totalorder %s6007_s15, %s7291_s4 }
   0x7   :  { %p6013_p2 = pnand %p6011_p1, %p6008_p0 }
   0x9   :  { %6016 = shalt.err (!%p6013_p2)
}
   0xa   :  { %s6017_s20 = scalar_lea.vmem %s41_s10, 8192  ;;  %p6022_p4 = scmp.lt.s32.totalorder %s41_s10, %s41_s10 }
   0xb   :  { %p6018_p3 = scmp.ne.s32.totalorder %s41_s10, %s6017_s20  ;;  %p6023_p5 = scmp.lt.s32.totalorder %s6017_s20, %s6017_s20 }
   0xd   :  { %p6024_p6 = por %p6023_p5, %p6022_p4 }
   0xf   :  { %p6025_p7 = pnand %p6024_p6, %p6018_p3 }
  0x11   :  { %6028 = shalt.err (!%p6025_p7)
}
  0x12   :  { %s6103_s21 = smov 512   ;;  %s6104_s22 = smov 32  }
  0x13   :  { %46 = dma.hbm_to_vmem [thread:$0]  %s7291_s4, 8192, %s41_s10, [#allocation7], %s6103_s21, %s6103_s21, %s6104_s22  }
  0x14   :  { %s6029_s27 = scalar_lea.hbm %s7290_s3, 8192 }
  0x15   :  { %p6030_p8 = scmp.ne.s32.totalorder %s7290_s3, %s6029_s27  ;;  %p6033_p9 = scmp.lt.u32.totalorder %s6029_s27, %s7290_s3 }
  0x17   :  { %p6035_p10 = pnand %p6033_p9, %p6030_p8 }
  0x19   :  { %6038 = shalt.err (!%p6035_p10)
}
  0x1a   :  { %s6039_s13 = scalar_lea.vmem %s6161_s12, 8192  ;;  %p6044_p12 = scmp.lt.s32.totalorder %s6161_s12, %s6161_s12 }
  0x1b   :  { %p6040_p11 = scmp.ne.s32.totalorder %s6161_s12, %s6039_s13  ;;  %p6045_p13 = scmp.lt.s32.totalorder %s6039_s13, %s6039_s13 }
  0x1d   :  { %p6046_p0 = por %p6045_p13, %p6044_p12 }
  0x1f   :  { %p6047_p1 = pnand %p6046_p0, %p6040_p11 }
  0x21   :  { %6050 = shalt.err (!%p6047_p1)
}
  0x22   :  { %34 = dma.hbm_to_vmem [thread:$0]  %s7290_s3, 8192, %s6161_s12, [#allocation4], %s6103_s21, %s6103_s21, %s6104_s22  }
  0x23   :  { %s6105_s14 = smov [#allocation8]   ;;  %s6051_s18 = scalar_lea.hbm %s7293_s6, 8192 }
  0x24   :  { %s54_s15 = sshll.u32 %s6105_s14, 4  ;;  %p6052_p2 = scmp.ne.s32.totalorder %s7293_s6, %s6051_s18  ;;  %s55_s15 = int_to_ptr.vmem [resolvable:$true] %s54_s15 }
  0x25   :  { %p6055_p3 = scmp.lt.u32.totalorder %s6051_s18, %s7293_s6 }
  0x27   :  { %p6057_p4 = pnand %p6055_p3, %p6052_p2 }
  0x29   :  { %6060 = shalt.err (!%p6057_p4)
}
  0x2a   :  { %s6061_s25 = scalar_lea.vmem %s55_s15, 8192  ;;  %p6066_p6 = scmp.lt.s32.totalorder %s55_s15, %s55_s15 }
  0x2b   :  { %p6062_p5 = scmp.ne.s32.totalorder %s55_s15, %s6061_s25  ;;  %p6067_p7 = scmp.lt.s32.totalorder %s6061_s25, %s6061_s25 }
  0x2d   :  { %p6068_p8 = por %p6067_p7, %p6066_p6 }
  0x2f   :  { %p6069_p9 = pnand %p6068_p8, %p6062_p5 }
  0x31   :  { %6072 = shalt.err (!%p6069_p9)
}
  0x32   :  { %60 = dma.hbm_to_vmem [thread:$0]  %s7293_s6, 8192, %s55_s15, [#allocation7], %s6103_s21, %s6103_s21, %s6104_s22  }
  0x33   :  { %6095 = dma.done.wait [#allocation4], 8192  }
  0x34   :  { %6096 = vsyncadd [#allocation4], 4294959104 }
  0x35   :  { %6097 = dma.done.wait [#allocation7], 16384  }
  0x36   :  { %6098 = vsyncadd [#allocation7], 4294950912  ;;  %v6106_v0 = vmov 0.0   ;;  %v77_v1 = vld [vmem:[%s7288_s1 + $0x8] sm:$0xff]  ;;  %v76_v3 = vld [vmem:[%s7288_s1] sm:$0xff]  ;;  %vm106_vm0 = vcmask 130048  }
  0x37   :  { %177 = vmatprep.mubr.f32.mxu1 %v6106_v0  ;;  %483 = vmatprep.mubr.f32.mxu0 %v6106_v0  ;;  %v81_v2 = vld [vmem:[%s7288_s1 + $0x28] sm:$0xff]  ;;  %v80_v5 = vld [vmem:[%s7288_s1 + $0x20] sm:$0xff]  ;;  %v79_v6 = vld [vmem:[%s7288_s1 + $0x18] sm:$0xff]  ;;  %vm6109_vm1 = vmmov 0   ;;  %s6110_s27 = smov [#allocation9]   ;;  %vm4498_vm2 = vcmask 58368  }
  0x38   :  { %v4621_v4 = vpack.c.bf16 %v81_v2, %v77_v1  ;;  %v4623_v7 = vpack.c.bf16 %v80_v5, %v76_v3  ;;  %v83_v8 = vld [vmem:[%s7288_s1 + $0x38] sm:$0xff]  ;;  %v78_v9 = vld [vmem:[%s7288_s1 + $0x10] sm:$0xff]  ;;  %v74_v11 = vld [vmem:[%s7287_s0] sm:$0xff]  ;;  %s4506_s28 = sshll.u32 %s6110_s27, 4  ;;  %s4507_s28 = int_to_ptr.vmem [resolvable:$true] %s4506_s28 }
  0x39   :  { %v82_v10 = vld [vmem:[%s7288_s1 + $0x30] sm:$0xff]  ;;  %v4625_v12 = vpack.c.bf16 %v83_v8, %v79_v6  ;;  %v356_v13 = vld [vmem:[#allocation3 + $0x8] sm:$0xff]  ;;  %v358_v17 = vld [vmem:[#allocation3 + $0x18] sm:$0xff]  ;;  %s6073_s29 = scalar_lea.vmem %s4507_s28, 32  ;;  %p6078_p11 = scmp.lt.s32.totalorder %s4507_s28, %s4507_s28 }
  0x3a   :  { %4622 = vmatprep.subr.bf16.mxu1 %v4621_v4  ;;  %v360_v14 = vld [vmem:[#allocation3 + $0x28] sm:$0xff]  ;;  %v4627_v15 = vpack.c.bf16 %v82_v10, %v78_v9  ;;  %v362_v18 = vld [vmem:[#allocation3 + $0x38] sm:$0xff]  ;;  %v355_v19 = vld [vmem:[#allocation3] sm:$0xff]  ;;  %p6074_p10 = scmp.ne.s32.totalorder %s4507_s28, %s6073_s29  ;;  %p6079_p12 = scmp.lt.s32.totalorder %s6073_s29, %s6073_s29 }
  0x3b   :  { %4624 = vmatpush1.bf16.msra.mxu1 %v4623_v7  ;;  %v6242_v16 = vpack.c.bf16 %v360_v14, %v356_v13  ;;  %v6244_v20 = vpack.c.bf16 %v362_v18, %v358_v17  ;;  %v359_v21 = vld [vmem:[#allocation3 + $0x20] sm:$0xff]  ;;  %v364_v23 = vld [vmem:[#allocation3 + $0x48] sm:$0xff]  ;;  %v75_v28 = vld [vmem:[%s7287_s0 + $0x8] sm:$0xff] }
  0x3c   :  { %4626 = vmatprep.subr.bf16.mxu1 %v4625_v12  ;;  %v6247_v22 = vpack.c.bf16 %v359_v21, %v355_v19  ;;  %v368_v24 = vld [vmem:[#allocation3 + $0x68] sm:$0xff]  ;;  %v363_v26 = vld [vmem:[#allocation3 + $0x40] sm:$0xff]  ;;  %v357_v29 = vld [vmem:[#allocation3 + $0x10] sm:$0xff]  ;;  %p6080_p13 = por %p6079_p12, %p6078_p11 }
  0x3d   :  { %4630 = vmatprep.subr.bf16.mxu0 %v6242_v16  ;;  %v6250_v25 = vpack.c.bf16 %v368_v24, %v364_v23  ;;  %v367_v27 = vld [vmem:[#allocation3 + $0x60] sm:$0xff]  ;;  %v372_v30 = vld [vmem:[#allocation3 + $0x88] sm:$0xff]  ;;  %v361_v31 = vld [vmem:[#allocation3 + $0x30] sm:$0xff] }
  0x3e   :  { %4516 = vmatmul.mubr.msk.f32.vlgmr.msra.gmra.mrb[0].mxu1 %vm106_vm0, %v74_v11  ;;  %4632 = vmatpush1.bf16.msra.mxu0 %v6247_v22  ;;  %v366_v32 = vld [vmem:[#allocation3 + $0x58] sm:$0xff]  ;;  %v6258_v33 = vpack.c.bf16 %v367_v27, %v363_v26  ;;  %v376_v34 = vld [vmem:[#allocation3 + $0xa8] sm:$0xff]  ;;  %v371_v37 = vld [vmem:[#allocation3 + $0x80] sm:$0xff]  ;;  %v6265_v41 = vpack.c.bf16 %v361_v31, %v357_v29  ;;  %p6081_p0 = pnand %p6080_p13, %p6074_p10 }
  0x3f   :  { %4628 = vmatpush1.bf16.msra.mxu1 %v4627_v15  ;;  %183 = vmatprep.mubr.f32.mxu1 %v6106_v0  ;;  %v370_v35 = vld [vmem:[#allocation3 + $0x78] sm:$0xff]  ;;  %v6261_v36 = vpack.c.bf16 %v376_v34, %v372_v30  ;;  %v375_v38 = vld [vmem:[#allocation3 + $0xa0] sm:$0xff]  ;;  %v380_v39 = vld [vmem:[#allocation3 + $0xc8] sm:$0xff] }
  0x40   :  { %4662 = vmatprep.subr.bf16.mxu1 %v6244_v20  ;;  %4634 = vmatprep.subr.bf16.mxu0 %v6250_v25  ;;  %v384_v40 = vld [vmem:[#allocation3 + $0xe8] sm:$0xff]  ;;  %v6267_v42 = vpack.c.bf16 %v370_v35, %v366_v32  ;;  %v365_v43 = vld [vmem:[#allocation3 + $0x50] sm:$0xff]  ;;  %v374_v45 = vld [vmem:[#allocation3 + $0x98] sm:$0xff]  ;;  %v6270_v46 = vpack.c.bf16 %v375_v38, %v371_v37 }
  0x41   :  { %v369_v44 = vld [vmem:[#allocation3 + $0x70] sm:$0xff]  ;;  %v378_v47 = vld [vmem:[#allocation3 + $0xb8] sm:$0xff]  ;;  %v6273_v48 = vpack.c.bf16 %v384_v40, %v380_v39  ;;  %v379_v49 = vld [vmem:[#allocation3 + $0xc0] sm:$0xff] }
  0x42   :  { %4517 = vmatmul.mubr.msk.f32.gmra.mrb[2].mxu1 %vm106_vm0, %v75_v28  ;;  %4636 = vmatpush1.bf16.msra.mxu0 %v6258_v33  ;;  %v383_v50 = vld [vmem:[#allocation3 + $0xe0] sm:$0xff]  ;;  %v388_v51 = vld [vmem:[#allocation3 + $0x108] sm:$0xff]  ;;  %v6278_v53 = vpack.c.bf16 %v369_v44, %v365_v43  ;;  %v6281_v54 = vpack.c.bf16 %v378_v47, %v374_v45  ;;  %v373_v55 = vld [vmem:[#allocation3 + $0x90] sm:$0xff] }
  0x43   :  { %254 = vmatprep.mubr.f32.mxu1 %v6106_v0  ;;  %4638 = vmatprep.subr.bf16.mxu0 %v6261_v36  ;;  %v392_v52 = vld [vmem:[#allocation3 + $0x128] sm:$0xff]  ;;  %v377_v56 = vld [vmem:[#allocation3 + $0xb0] sm:$0xff]  ;;  %v382_v57 = vld [vmem:[#allocation3 + $0xd8] sm:$0xff]  ;;  %v6284_v58 = vpack.c.bf16 %v383_v50, %v379_v49 }
  0x44   :  { %v386_v59 = vld [vmem:[#allocation3 + $0xf8] sm:$0xff]  ;;  %v6287_v60 = vpack.c.bf16 %v392_v52, %v388_v51  ;;  %v387_v61 = vld [vmem:[#allocation3 + $0x100] sm:$0xff]  ;;  %v396_v63 = vld [vmem:[#allocation3 + $0x148] sm:$0xff]  ;;  %v6291_v2 = vpack.c.bf16 %v377_v56, %v373_v55 }
  0x45   :  { %v391_v62 = vld [vmem:[#allocation3 + $0x120] sm:$0xff]  ;;  %v400_v1 = vld [vmem:[#allocation3 + $0x168] sm:$0xff]  ;;  %v6295_v3 = vpack.c.bf16 %v386_v59, %v382_v57  ;;  %v381_v4 = vld [vmem:[#allocation3 + $0xd0] sm:$0xff] }
  0x46   :  { %4518 = vmatmul.mubr.msk.f32.vlgmr.msra.gmra.mrb[4].mxu1 %vm106_vm0, %v74_v11  ;;  %4640 = vmatpush1.bf16.msra.mxu0 %v6270_v46  ;;  %v385_v5 = vld [vmem:[#allocation3 + $0xf0] sm:$0xff]  ;;  %v390_v6 = vld [vmem:[#allocation3 + $0x118] sm:$0xff]  ;;  %v6298_v7 = vpack.c.bf16 %v391_v62, %v387_v61  ;;  %v6301_v9 = vpack.c.bf16 %v400_v1, %v396_v63  ;;  %v395_v10 = vld [vmem:[#allocation3 + $0x140] sm:$0xff]  ;;  %v86_v62 = vlaneseq }
  0x47   :  { %4664 = vmatpush1.bf16.msra.mxu1 %v6265_v41  ;;  %260 = vmatprep.mubr.f32.mxu1 %v6106_v0  ;;  %v394_v8 = vld [vmem:[#allocation3 + $0x138] sm:$0xff]  ;;  %v399_v11 = vld [vmem:[#allocation3 + $0x160] sm:$0xff]  ;;  %v404_v12 = vld [vmem:[#allocation3 + $0x188] sm:$0xff]  ;;  %v6304_v14 = vpack.c.bf16 %v385_v5, %v381_v4 }
  0x48   :  { %4666 = vmatprep.subr.bf16.mxu1 %v6267_v42  ;;  %4642 = vmatprep.subr.bf16.mxu0 %v6273_v48  ;;  %v408_v13 = vld [vmem:[#allocation3 + $0x1a8] sm:$0xff]  ;;  %v6307_v15 = vpack.c.bf16 %v394_v8, %v390_v6  ;;  %v389_v17 = vld [vmem:[#allocation3 + $0x110] sm:$0xff]  ;;  %v398_v19 = vld [vmem:[#allocation3 + $0x158] sm:$0xff]  ;;  %v6310_v21 = vpack.c.bf16 %v399_v11, %v395_v10  ;;  %v6387_v63 = vshrl.u32 %v86_v62, 7 }
  0x49   :  { %v393_v18 = vld [vmem:[#allocation3 + $0x130] sm:$0xff]  ;;  %v402_v23 = vld [vmem:[#allocation3 + $0x178] sm:$0xff]  ;;  %v6313_v24 = vpack.c.bf16 %v408_v13, %v404_v12  ;;  %v403_v26 = vld [vmem:[#allocation3 + $0x180] sm:$0xff] }
  0x4a   :  { %4519 = vmatmul.mubr.msk.f32.gmra.mrb[6].mxu1 %vm106_vm0, %v75_v28  ;;  %4644 = vmatpush1.bf16.msra.mxu0 %v6284_v58  ;;  %v407_v27 = vld [vmem:[#allocation3 + $0x1a0] sm:$0xff]  ;;  %v412_v28 = vld [vmem:[#allocation3 + $0x1c8] sm:$0xff]  ;;  %v6316_v30 = vpack.c.bf16 %v393_v18, %v389_v17  ;;  %v6319_v31 = vpack.c.bf16 %v402_v23, %v398_v19  ;;  %v397_v32 = vld [vmem:[#allocation3 + $0x150] sm:$0xff]  ;;  %v7300_v1 = vsub.s32 0, %v6387_v63  ;;  %v7298_v5 = vsub.s32 1, %v6387_v63 }
  0x4b   :  { %4668 = vmatpush1.bf16.msra.mxu1 %v6278_v53  ;;  %554 = vmatprep.mubr.f32.mxu1 %v6106_v0  ;;  %v416_v29 = vld [vmem:[#allocation3 + $0x1e8] sm:$0xff]  ;;  %v401_v34 = vld [vmem:[#allocation3 + $0x170] sm:$0xff]  ;;  %v406_v35 = vld [vmem:[#allocation3 + $0x198] sm:$0xff]  ;;  %v6322_v37 = vpack.c.bf16 %v407_v27, %v403_v26  ;;  %v7299_v13 = vsub.s32 2, %v6387_v63  ;;  %v7297_v18 = vsub.s32 3, %v6387_v63 }
  0x4c   :  { %4670 = vmatprep.subr.bf16.mxu1 %v6281_v54  ;;  %4646 = vmatprep.subr.bf16.mxu0 %v6287_v60  ;;  %v410_v38 = vld [vmem:[#allocation3 + $0x1b8] sm:$0xff]  ;;  %v6325_v39 = vpack.c.bf16 %v416_v29, %v412_v28  ;;  %v411_v40 = vld [vmem:[#allocation3 + $0x1c0] sm:$0xff]  ;;  %v6328_v44 = vpack.c.bf16 %v401_v34, %v397_v32  ;;  %v405_v47 = vld [vmem:[#allocation3 + $0x190] sm:$0xff] }
  0x4d   :  { %v415_v43 = vld [vmem:[#allocation3 + $0x1e0] sm:$0xff]  ;;  %v6331_v45 = vpack.c.bf16 %v410_v38, %v406_v35  ;;  %v409_v49 = vld [vmem:[#allocation3 + $0x1b0] sm:$0xff]  ;;  %v414_v51 = vld [vmem:[#allocation3 + $0x1d8] sm:$0xff] }
  0x4e   :  { %4648 = vmatpush1.bf16.msra.mxu0 %v6298_v7  ;;  %v6334_v50 = vpack.c.bf16 %v415_v43, %v411_v40  ;;  %v418_v52 = vld [vmem:[#allocation3 + $0x1f8] sm:$0xff]  ;;  %v6338_v55 = vpack.c.bf16 %v409_v49, %v405_v47  ;;  %v413_v57 = vld [vmem:[#allocation3 + $0x1d0] sm:$0xff] }
  0x4f   :  { %4672 = vmatpush1.bf16.msra.mxu1 %v6291_v2  ;;  %4650 = vmatprep.subr.bf16.mxu0 %v6301_v9  ;;  %v6341_v56 = vpack.c.bf16 %v418_v52, %v414_v51  ;;  %v417_v59 = vld [vmem:[#allocation3 + $0x1f0] sm:$0xff] }
  0x50   :  { %4674 = vmatprep.subr.bf16.mxu1 %v6295_v3  ;;  %v6346_v61 = vpack.c.bf16 %v417_v59, %v413_v57  ;;  %v84_v4 = vld [vmem:[%s7289_s2] sm:$0xf] }
  0x51   :  { %v93_v6 = vrot.slane %v84_v4, %v7298_v5  ;;  %v97_v32 = vrot.slane %v84_v4, %v7299_v13  ;;  %v101_v35 = vrot.slane %v84_v4, %v7297_v18 }
  0x52   :  { %4652 = vmatpush1.bf16.msra.mxu0 %v6310_v21 }
  0x53   :  { %4676 = vmatpush1.bf16.msra.mxu1 %v6304_v14  ;;  %4654 = vmatprep.subr.bf16.mxu0 %v6313_v24 }
  0x54   :  { %4678 = vmatprep.subr.bf16.mxu1 %v6307_v15 }
  0x56   :  { %4656 = vmatpush1.bf16.msra.mxu0 %v6322_v37 }
  0x57   :  { %4680 = vmatpush1.bf16.msra.mxu1 %v6316_v30  ;;  %4658 = vmatprep.subr.bf16.mxu0 %v6325_v39 }
  0x58   :  { %4682 = vmatprep.subr.bf16.mxu1 %v6319_v31 }
  0x5a   :  { %4660 = vmatpush1.bf16.msra.mxu0 %v6334_v50 }
  0x5b   :  { %4684 = vmatpush1.bf16.msra.mxu1 %v6328_v44  ;;  %4694 = vmatprep.subr.bf16.mxu0 %v6242_v16 }
  0x5c   :  { %4686 = vmatprep.subr.bf16.mxu1 %v6331_v45 }
  0x5d   :  { %484 = vmatmul.mubr.f32.vlgmr.msra.gmra.mrb[0].mxu0 %v6106_v0 }
  0x5e   :  { %4696 = vmatpush1.bf16.msra.mxu0 %v6247_v22  ;;  %744 = vmatprep.mubr.f32.mxu0 %v6106_v0 }
  0x5f   :  { %4688 = vmatpush1.bf16.msra.mxu1 %v6338_v55  ;;  %4698 = vmatprep.subr.bf16.mxu0 %v6250_v25 }
  0x60   :  { %4690 = vmatprep.subr.bf16.mxu1 %v6341_v56 }
  0x62   :  { %4700 = vmatpush1.bf16.msra.mxu0 %v6258_v33 }
  0x63   :  { %4692 = vmatpush1.bf16.msra.mxu1 %v6346_v61  ;;  %4702 = vmatprep.subr.bf16.mxu0 %v6261_v36 }
  0x64   :  { %4726 = vmatprep.subr.bf16.mxu1 %v6244_v20 }
  0x66   :  { %555 = vmatmul.mubr.f32.vlgmr.msra.gmra.mrb[8].mxu1 %v6106_v0  ;;  %4704 = vmatpush1.bf16.msra.mxu0 %v6270_v46 }
  0x67   :  { %4728 = vmatpush1.bf16.msra.mxu1 %v6265_v41  ;;  %815 = vmatprep.mubr.f32.mxu1 %v6106_v0 }
  0x68   :  { %4730 = vmatprep.subr.bf16.mxu1 %v6267_v42  ;;  %4706 = vmatprep.subr.bf16.mxu0 %v6273_v48 }
  0x6a   :  { %4708 = vmatpush1.bf16.msra.mxu0 %v6284_v58 }
  0x6b   :  { %4732 = vmatpush1.bf16.msra.mxu1 %v6278_v53  ;;  %4710 = vmatprep.subr.bf16.mxu0 %v6287_v60 }
  0x6c   :  { %4734 = vmatprep.subr.bf16.mxu1 %v6281_v54 }
  0x6e   :  { %4712 = vmatpush1.bf16.msra.mxu0 %v6298_v7 }
  0x6f   :  { %4736 = vmatpush1.bf16.msra.mxu1 %v6291_v2  ;;  %4714 = vmatprep.subr.bf16.mxu0 %v6301_v9 }
  0x70   :  { %4738 = vmatprep.subr.bf16.mxu1 %v6295_v3 }
  0x72   :  { %4716 = vmatpush1.bf16.msra.mxu0 %v6310_v21 }
  0x73   :  { %4740 = vmatpush1.bf16.msra.mxu1 %v6304_v14  ;;  %4718 = vmatprep.subr.bf16.mxu0 %v6313_v24 }
  0x74   :  { %4742 = vmatprep.subr.bf16.mxu1 %v6307_v15 }
  0x76   :  { %4720 = vmatpush1.bf16.msra.mxu0 %v6322_v37 }
  0x77   :  { %4744 = vmatpush1.bf16.msra.mxu1 %v6316_v30  ;;  %4722 = vmatprep.subr.bf16.mxu0 %v6325_v39 }
  0x78   :  { %4746 = vmatprep.subr.bf16.mxu1 %v6319_v31 }
  0x7a   :  { %4724 = vmatpush1.bf16.msra.mxu0 %v6334_v50 }
  0x7b   :  { %4748 = vmatpush1.bf16.msra.mxu1 %v6328_v44  ;;  %4758 = vmatprep.subr.bf16.mxu0 %v6242_v16  ;;  %v89_v16 = vrot.slane %v84_v4, %v7300_v1 }
  0x7c   :  { %4750 = vmatprep.subr.bf16.mxu1 %v6331_v45 }
  0x7f   :  { %4752 = vmatpush1.bf16.msra.mxu1 %v6338_v55 }
  0x80   :  { %4754 = vmatprep.subr.bf16.mxu1 %v6341_v56 }
  0x83   :  { %4756 = vmatpush1.bf16.msra.mxu1 %v6346_v61 }
  0x84   :  { %4790 = vmatprep.subr.bf16.mxu1 %v6244_v20  ;;  %v6107_v20 = vmov 1983009808  }
  0x85   :  { %v280_v11 = vunpack.c.l.s4 %v6107_v20 }
  0x87   :  { %v281_v27 = vunpack.c.0.s8 %v280_v11 }
  0x89   :  { %v6405_v47 = vsub.s32 %v281_v27, %v6387_v63 }
 0x111   :  { %v179_v8 = vpop.f32.mrb[0].mxu1 }
 0x112   :  { %v180_v10 = vadd.f32 %v179_v8, %v89_v16  ;;  %v181_v12 = vpop.f32.mrb[1].mxu1 }
 0x113   :  { %v182_v17 = vadd.f32 %v181_v12, %v93_v6 }
 0x115   :  { %v275_v19 = vcombine.low %v180_v10, %v182_v17  ;;  %v276_v23 = vcombine.high %v180_v10, %v182_v17  ;;  %v185_v26 = vpop.f32.mrb[2].mxu1 }
 0x116   :  { %v186_v28 = vadd.f32 %v185_v26, %v89_v16  ;;  %v187_v29 = vpop.f32.mrb[3].mxu1 }
 0x117   :  { %v188_v34 = vadd.f32 %v187_v29, %v93_v6  ;;  %v6408_v16 = vrot.slane %v275_v19, %v6405_v47  ;;  %v6411_v10 = vrot.slane %v276_v23, %v6405_v47 }
 0x119   :  { %v311_v38 = vcombine.low %v186_v28, %v188_v34  ;;  %v312_v40 = vcombine.high %v186_v28, %v188_v34  ;;  %v256_v43 = vpop.f32.mrb[4].mxu1 }
 0x11a   :  { %v257_v49 = vadd.f32 %v256_v43, %v97_v32  ;;  %v258_v51 = vpop.f32.mrb[5].mxu1 }
 0x11b   :  { %v259_v52 = vadd.f32 %v258_v51, %v101_v35  ;;  %v6428_v28 = vrot.slane %v311_v38, %v6405_v47  ;;  %v6431_v29 = vrot.slane %v312_v40, %v6405_v47 }
 0x11d   :  { %v277_v57 = vcombine.low %v257_v49, %v259_v52  ;;  %v278_v59 = vcombine.high %v257_v49, %v259_v52  ;;  %v262_v62 = vpop.f32.mrb[6].mxu1 }
 0x11e   :  { %v263_v8 = vadd.f32 %v262_v62, %v97_v32  ;;  %v264_v6 = vpop.f32.mrb[7].mxu1 }
 0x11f   :  { %v6414_v4 = vrot.slane %v277_v57, %v6405_v47  ;;  %v6417_v20 = vrot.slane %v278_v59, %v6405_v47  ;;  %v265_v11 = vadd.f32 %v264_v6, %v101_v35 }
 0x121   :  { %v307_v12 = vcombine.low %v6408_v16, %v6414_v4  ;;  %v308_v17 = vcombine.high %v6408_v16, %v6414_v4  ;;  %v309_v19 = vcombine.low %v6411_v10, %v6417_v20  ;;  %v310_v23 = vcombine.high %v6411_v10, %v6417_v20  ;;  %v1139_v16 = vld [vmem:[#allocation3 + $0x8] sm:$0xff] }
 0x122   :  { %v313_v26 = vcombine.low %v263_v8, %v265_v11  ;;  %v314_v27 = vcombine.high %v263_v8, %v265_v11  ;;  %v1143_v4 = vld [vmem:[#allocation3 + $0x28] sm:$0xff] }
 0x124   :  { %v6434_v32 = vrot.slane %v313_v26, %v6405_v47  ;;  %v6437_v34 = vrot.slane %v314_v27, %v6405_v47 }
 0x126   :  { %v343_v35 = vcombine.low %v6428_v28, %v6434_v32 }
 0x130   :  { %v485_v40 = vpop.f32.mrb[0].mxu0 }
 0x131   :  { %v487_v51 = vpop.f32.mrb[1].mxu0 }
 0x132   :  { %v565_v52 = vcombine.low %v485_v40, %v487_v51 }
 0x134   :  { %v573_v62 = vrot.slane %v565_v52, %v6405_v47 }
 0x139   :  { %v556_v57 = vpop.f32.mrb[8].mxu1 }
 0x13a   :  { %v558_v59 = vpop.f32.mrb[9].mxu1 }
 0x13b   :  { %v566_v8 = vcombine.low %v556_v57, %v558_v59 }
 0x13d   :  { %v580_v6 = vrot.slane %v566_v8, %v6405_v47 }
 0x13f   :  { %v581_v11 = vcombine.low %v573_v62, %v580_v6 }
 0x141   :  { %v583_v26 = vadd.f32 %v581_v11, %v307_v12  ;;  %v1138_v11 = vld [vmem:[#allocation3] sm:$0xff] }
 0x143   :  { %v4520_v27 = vmul.f32 -1.442695, %v583_v26  ;;  %v591_v18 = vrot.slane %v583_v26, 2  ;;  %v602_v13 = vrot.slane %v583_v26, 6  ;;  %v599_v49 = vrot.slane %v583_v26, 4  ;;  %v1142_v26 = vld [vmem:[#allocation3 + $0x20] sm:$0xff] }
 0x145   :  { %5751 = vpow2.f32 %v4520_v27  ;;  %v4521_v5 = vmul.f32 -1.442695, %v591_v18  ;;  %v4522_v1 = vmul.f32 -1.442695, %v602_v13 }
 0x147   :  { %5753 = vpow2.f32 %v4521_v5 }
 0x148   :  { %5755 = vpow2.f32 %v4522_v1 }
 0x14f   :  { %v5752_v38 = vpop.eup %5751 }
 0x150   :  { %v587_v43 = vadd.f32 1.0, %v5752_v38 }
 0x151   :  { %v5754_v40 = vpop.eup %5753 }
 0x152   :  { %5757 = vrcp.f32 %v587_v43  ;;  %v596_v51 = vadd.f32 1.0, %v5754_v40  ;;  %v5756_v52 = vpop.eup %5755  ;;  %v6495_v43 = vpack.c.bf16 %v1143_v4, %v1139_v16  ;;  %v6499_v40 = vpack.c.bf16 %v1142_v26, %v1138_v11  ;;  %v1177_v4 = vld [vmem:[#allocation3 + $0x138] sm:$0xff]  ;;  %v1172_v26 = vld [vmem:[#allocation3 + $0x110] sm:$0xff] }
 0x153   :  { %5759 = vtanh.f32 %v599_v49  ;;  %v607_v62 = vadd.f32 1.0, %v5756_v52  ;;  %v1145_v49 = vld [vmem:[#allocation3 + $0x38] sm:$0xff]  ;;  %v1144_v52 = vld [vmem:[#allocation3 + $0x30] sm:$0xff] }
 0x154   :  { %5761 = vrcp.f32 %v596_v51  ;;  %v1140_v51 = vld [vmem:[#allocation3 + $0x10] sm:$0xff] }
 0x155   :  { %5763 = vrcp.f32 %v607_v62  ;;  %v1149_v62 = vld [vmem:[#allocation3 + $0x58] sm:$0xff] }
 0x15c   :  { %v5758_v57 = vpop.eup %5757 }
 0x15d   :  { %v5760_v59 = vpop.eup %5759 }
 0x15e   :  { %v5762_v12 = vpop.eup %5761  ;;  %v611_v6 = vmul.f32 %v5760_v59, %v5758_v57  ;;  %v6502_v57 = vpack.c.bf16 %v1144_v52, %v1140_v51  ;;  %v1147_v59 = vld [vmem:[#allocation3 + $0x48] sm:$0xff]  ;;  %v1176_v51 = vld [vmem:[#allocation3 + $0x130] sm:$0xff] }
 0x15f   :  { %v610_v8 = vmul.f32 0.0, %v5762_v12  ;;  %v5764_v5 = vpop.eup %5763  ;;  %v1151_v12 = vld [vmem:[#allocation3 + $0x68] sm:$0xff] }
 0x160   :  { %v1179_v52 = vld [vmem:[#allocation3 + $0x148] sm:$0xff] }
 0x161   :  { %v6449_v18 = vadd.f32 %v611_v6, %v610_v8  ;;  %v6507_v8 = vpack.c.bf16 %v1151_v12, %v1147_v59  ;;  %v1153_v6 = vld [vmem:[#allocation3 + $0x78] sm:$0xff]  ;;  %v1183_v59 = vld [vmem:[#allocation3 + $0x168] sm:$0xff] }
 0x162   :  { %v1181_v12 = vld [vmem:[#allocation3 + $0x158] sm:$0xff] }
 0x163   :  { %5765 = vtanh.f32 %v6449_v18 }
 0x16d   :  { %v5766_v13 = vpop.eup %5765 }
 0x16e   :  { %v614_v38 = vmul.f32 %v5766_v13, %v5764_v5  ;;  %v1150_v5 = vld [vmem:[#allocation3 + $0x60] sm:$0xff]  ;;  %v6509_v13 = vpack.c.bf16 %v1153_v6, %v1149_v62  ;;  %v1185_v62 = vld [vmem:[#allocation3 + $0x178] sm:$0xff] }
 0x170   :  { %615 = vst [vmem:[#allocation2] sm:$0x3] %v614_v38  ;;  %745 = vmatmul.mubr.f32.vlgmr.msra.gmra.mrb[2].mxu0 %v614_v38  ;;  %816 = vmatmul.mubr.f32.vlgmr.msra.gmra.mrb[10].mxu1 %v614_v38 }
 0x171   :  { %4760 = vmatpush1.bf16.msra.mxu0 %v6247_v22  ;;  %4792 = vmatpush1.bf16.msra.mxu1 %v6265_v41 }
 0x172   :  { %4762 = vmatprep.subr.bf16.mxu0 %v6250_v25  ;;  %4794 = vmatprep.subr.bf16.mxu1 %v6267_v42 }
 0x173   :  { %1005 = vmatprep.mubr.f32.mxu0 %v6106_v0  ;;  %1076 = vmatprep.mubr.f32.mxu1 %v6106_v0 }
 0x175   :  { %4764 = vmatpush1.bf16.msra.mxu0 %v6258_v33  ;;  %4796 = vmatpush1.bf16.msra.mxu1 %v6278_v53 }
 0x176   :  { %4766 = vmatprep.subr.bf16.mxu0 %v6261_v36  ;;  %4798 = vmatprep.subr.bf16.mxu1 %v6281_v54 }
 0x179   :  { %4768 = vmatpush1.bf16.msra.mxu0 %v6270_v46  ;;  %4800 = vmatpush1.bf16.msra.mxu1 %v6291_v2 }
 0x17a   :  { %4770 = vmatprep.subr.bf16.mxu0 %v6273_v48  ;;  %4802 = vmatprep.subr.bf16.mxu1 %v6295_v3 }
 0x17d   :  { %4772 = vmatpush1.bf16.msra.mxu0 %v6284_v58  ;;  %4804 = vmatpush1.bf16.msra.mxu1 %v6304_v14 }
 0x17e   :  { %4774 = vmatprep.subr.bf16.mxu0 %v6287_v60  ;;  %4806 = vmatprep.subr.bf16.mxu1 %v6307_v15 }
 0x181   :  { %4776 = vmatpush1.bf16.msra.mxu0 %v6298_v7  ;;  %4808 = vmatpush1.bf16.msra.mxu1 %v6316_v30 }
 0x182   :  { %4778 = vmatprep.subr.bf16.mxu0 %v6301_v9  ;;  %4810 = vmatprep.subr.bf16.mxu1 %v6319_v31 }
 0x185   :  { %4780 = vmatpush1.bf16.msra.mxu0 %v6310_v21  ;;  %4812 = vmatpush1.bf16.msra.mxu1 %v6328_v44 }
 0x186   :  { %4782 = vmatprep.subr.bf16.mxu0 %v6313_v24  ;;  %4814 = vmatprep.subr.bf16.mxu1 %v6331_v45 }
 0x189   :  { %4784 = vmatpush1.bf16.msra.mxu0 %v6322_v37  ;;  %4816 = vmatpush1.bf16.msra.mxu1 %v6338_v55 }
 0x18a   :  { %4786 = vmatprep.subr.bf16.mxu0 %v6325_v39  ;;  %4818 = vmatprep.subr.bf16.mxu1 %v6341_v56 }
 0x18d   :  { %4788 = vmatpush1.bf16.msra.mxu0 %v6334_v50  ;;  %4820 = vmatpush1.bf16.msra.mxu1 %v6346_v61 }
 0x18e   :  { %4822 = vmatprep.subr.bf16.mxu0 %v6495_v43 }
 0x243   :  { %v746_v22 = vpop.f32.mrb[2].mxu0  ;;  %v817_v25 = vpop.f32.mrb[10].mxu1 }
 0x244   :  { %v748_v33 = vpop.f32.mrb[3].mxu0  ;;  %v819_v36 = vpop.f32.mrb[11].mxu1 }
 0x245   :  { %v826_v41 = vcombine.low %v746_v22, %v748_v33  ;;  %v827_v42 = vcombine.low %v817_v25, %v819_v36  ;;  %v1148_v22 = vld [vmem:[#allocation3 + $0x50] sm:$0xff]  ;;  %v1155_v33 = vld [vmem:[#allocation3 + $0x88] sm:$0xff] }
 0x246   :  { %v1152_v25 = vld [vmem:[#allocation3 + $0x70] sm:$0xff] }
 0x247   :  { %v834_v46 = vrot.slane %v826_v41, %v6405_v47  ;;  %v841_v48 = vrot.slane %v827_v42, %v6405_v47  ;;  %v6514_v36 = vpack.c.bf16 %v1152_v25, %v1148_v22  ;;  %v1159_v41 = vld [vmem:[#allocation3 + $0xa8] sm:$0xff]  ;;  %v1157_v42 = vld [vmem:[#allocation3 + $0x98] sm:$0xff]  ;;  %v1178_v22 = vld [vmem:[#allocation3 + $0x140] sm:$0xff] }
 0x248   :  { %v1182_v25 = vld [vmem:[#allocation3 + $0x160] sm:$0xff] }
 0x249   :  { %v842_v53 = vcombine.low %v834_v46, %v841_v48  ;;  %v1161_v46 = vld [vmem:[#allocation3 + $0xb8] sm:$0xff]  ;;  %v6518_v48 = vpack.c.bf16 %v1159_v41, %v1155_v33  ;;  %v1180_v33 = vld [vmem:[#allocation3 + $0x150] sm:$0xff]  ;;  %v6555_v41 = vpack.c.bf16 %v1185_v62, %v1181_v12 }
 0x24a   :  { %v1200_v12 = vld [vmem:[#allocation3 + $0x1f0] sm:$0xff] }
 0x24b   :  { %v844_v54 = vadd.f32 %v842_v53, %v308_v17  ;;  %v1141_v17 = vld [vmem:[#allocation3 + $0x18] sm:$0xff]  ;;  %v6520_v53 = vpack.c.bf16 %v1161_v46, %v1157_v42  ;;  %v1184_v42 = vld [vmem:[#allocation3 + $0x170] sm:$0xff]  ;;  %v1187_v46 = vld [vmem:[#allocation3 + $0x188] sm:$0xff] }
 0x24c   :  { %v6497_v27 = vpack.c.bf16 %v1145_v49, %v1141_v17  ;;  %v1170_v17 = vld [vmem:[#allocation3 + $0x100] sm:$0xff] }
 0x24d   :  { %v4523_v58 = vmul.f32 -1.442695, %v844_v54  ;;  %v852_v60 = vrot.slane %v844_v54, 2  ;;  %v863_v3 = vrot.slane %v844_v54, 6  ;;  %v860_v14 = vrot.slane %v844_v54, 4  ;;  %v1154_v54 = vld [vmem:[#allocation3 + $0x80] sm:$0xff] }
 0x24e   :  { %4854 = vmatprep.subr.bf16.mxu1 %v6497_v27  ;;  %v1174_v49 = vld [vmem:[#allocation3 + $0x120] sm:$0xff] }
 0x24f   :  { %5767 = vpow2.f32 %v4523_v58  ;;  %v4524_v2 = vmul.f32 -1.442695, %v852_v60  ;;  %v4525_v7 = vmul.f32 -1.442695, %v863_v3  ;;  %v1158_v58 = vld [vmem:[#allocation3 + $0xa0] sm:$0xff]  ;;  %v1156_v60 = vld [vmem:[#allocation3 + $0x90] sm:$0xff]  ;;  %v6546_v6 = vpack.c.bf16 %v1174_v49, %v1170_v17 }
 0x250   :  { %v1160_v3 = vld [vmem:[#allocation3 + $0xb0] sm:$0xff] }
 0x251   :  { %5769 = vpow2.f32 %v4524_v2  ;;  %v6523_v2 = vpack.c.bf16 %v1158_v58, %v1154_v54  ;;  %v1191_v54 = vld [vmem:[#allocation3 + $0x1a8] sm:$0xff]  ;;  %v1189_v58 = vld [vmem:[#allocation3 + $0x198] sm:$0xff] }
 0x252   :  { %5771 = vpow2.f32 %v4525_v7  ;;  %v1163_v7 = vld [vmem:[#allocation3 + $0xc8] sm:$0xff] }
 0x259   :  { %v5768_v9 = vpop.eup %5767 }
 0x25a   :  { %v848_v15 = vadd.f32 1.0, %v5768_v9  ;;  %v1167_v9 = vld [vmem:[#allocation3 + $0xe8] sm:$0xff] }
 0x25b   :  { %v5770_v21 = vpop.eup %5769 }
 0x25c   :  { %5773 = vrcp.f32 %v848_v15  ;;  %v857_v24 = vadd.f32 1.0, %v5770_v21  ;;  %v5772_v30 = vpop.eup %5771  ;;  %v6529_v15 = vpack.c.bf16 %v1167_v9, %v1163_v7  ;;  %v1165_v21 = vld [vmem:[#allocation3 + $0xd8] sm:$0xff]  ;;  %v6562_v7 = vpack.c.bf16 %v1184_v42, %v1180_v33 }
 0x25d   :  { %5775 = vtanh.f32 %v860_v14  ;;  %v868_v44 = vadd.f32 1.0, %v5772_v30  ;;  %v6527_v14 = vpack.c.bf16 %v1160_v3, %v1156_v60  ;;  %v1162_v30 = vld [vmem:[#allocation3 + $0xc0] sm:$0xff]  ;;  %v1193_v60 = vld [vmem:[#allocation3 + $0x1b8] sm:$0xff]  ;;  %v6558_v3 = vpack.c.bf16 %v1182_v25, %v1178_v22 }
 0x25e   :  { %5777 = vrcp.f32 %v857_v24  ;;  %v1169_v24 = vld [vmem:[#allocation3 + $0xf8] sm:$0xff]  ;;  %v6564_v9 = vpack.c.bf16 %v1191_v54, %v1187_v46 }
 0x25f   :  { %5779 = vrcp.f32 %v868_v44  ;;  %v1168_v44 = vld [vmem:[#allocation3 + $0xf0] sm:$0xff] }
 0x266   :  { %v5774_v31 = vpop.eup %5773 }
 0x267   :  { %v5776_v37 = vpop.eup %5775 }
 0x268   :  { %v5778_v39 = vpop.eup %5777  ;;  %v872_v50 = vmul.f32 %v5776_v37, %v5774_v31  ;;  %v6531_v31 = vpack.c.bf16 %v1169_v24, %v1165_v21  ;;  %v1166_v37 = vld [vmem:[#allocation3 + $0xe0] sm:$0xff] }
 0x269   :  { %v871_v45 = vmul.f32 %v5778_v39, %v6449_v18  ;;  %v5780_v56 = vpop.eup %5779  ;;  %v1146_v18 = vld [vmem:[#allocation3 + $0x40] sm:$0xff]  ;;  %v1164_v39 = vld [vmem:[#allocation3 + $0xd0] sm:$0xff] }
 0x26a   :  { %v6511_v38 = vpack.c.bf16 %v1150_v5, %v1146_v18  ;;  %v6550_v18 = vpack.c.bf16 %v1176_v51, %v1172_v26  ;;  %v6552_v5 = vpack.c.bf16 %v1183_v59, %v1179_v52  ;;  %v1186_v21 = vld [vmem:[#allocation3 + $0x180] sm:$0xff]  ;;  %v1196_v59 = vld [vmem:[#allocation3 + $0x1d0] sm:$0xff] }
 0x26b   :  { %v6490_v55 = vadd.f32 %v872_v50, %v871_v45  ;;  %v6534_v45 = vpack.c.bf16 %v1166_v37, %v1162_v30  ;;  %v1171_v50 = vld [vmem:[#allocation3 + $0x108] sm:$0xff]  ;;  %v1190_v24 = vld [vmem:[#allocation3 + $0x1a0] sm:$0xff]  ;;  %v1188_v30 = vld [vmem:[#allocation3 + $0x190] sm:$0xff]  ;;  %v6567_v37 = vpack.c.bf16 %v1193_v60, %v1189_v58  ;;  %v6586_v22 = vpack.c.bf16 %v1200_v12, %v1196_v59 }
 0x26c   :  { %v1194_v26 = vld [vmem:[#allocation3 + $0x1c0] sm:$0xff] }
 0x26d   :  { %5781 = vtanh.f32 %v6490_v55  ;;  %v1198_v51 = vld [vmem:[#allocation3 + $0x1e0] sm:$0xff] }
 0x26e   :  { %v6582_v62 = vpack.c.bf16 %v1198_v51, %v1194_v26 }
 0x277   :  { %v5782_v61 = vpop.eup %5781 }
 0x278   :  { %v875_v1 = vmul.f32 %v5782_v61, %v5780_v56  ;;  %v1175_v56 = vld [vmem:[#allocation3 + $0x128] sm:$0xff]  ;;  %v1173_v61 = vld [vmem:[#allocation3 + $0x118] sm:$0xff] }
 0x279   :  { %v6540_v16 = vpack.c.bf16 %v1175_v56, %v1171_v50  ;;  %v6543_v11 = vpack.c.bf16 %v1177_v4, %v1173_v61  ;;  %v1199_v50 = vld [vmem:[#allocation3 + $0x1e8] sm:$0xff]  ;;  %v1197_v56 = vld [vmem:[#allocation3 + $0x1d8] sm:$0xff]  ;;  %v6570_v4 = vpack.c.bf16 %v1190_v24, %v1186_v21 }
 0x27a   :  { %876 = vst [vmem:[#allocation2 + $0x2] sm:$0x3] %v875_v1  ;;  %1006 = vmatmul.mubr.f32.vlgmr.msra.gmra.mrb[4].mxu0 %v875_v1  ;;  %1077 = vmatmul.mubr.f32.vlgmr.msra.gmra.mrb[12].mxu1 %v875_v1  ;;  %v6538_v1 = vpack.c.bf16 %v1168_v44, %v1164_v39  ;;  %v1192_v39 = vld [vmem:[#allocation3 + $0x1b0] sm:$0xff]  ;;  %v1195_v44 = vld [vmem:[#allocation3 + $0x1c8] sm:$0xff]  ;;  %v1201_v61 = vld [vmem:[#allocation3 + $0x1f8] sm:$0xff] }
 0x27b   :  { %1266 = vmatprep.mubr.f32.mxu0 %v6106_v0  ;;  %1337 = vmatprep.mubr.f32.mxu1 %v6106_v0  ;;  %v6574_v17 = vpack.c.bf16 %v1192_v39, %v1188_v30  ;;  %v6576_v49 = vpack.c.bf16 %v1199_v50, %v1195_v44  ;;  %v6579_v52 = vpack.c.bf16 %v1201_v61, %v1197_v56 }
 0x27c   :  { %4824 = vmatpush1.bf16.msra.mxu0 %v6499_v40  ;;  %4856 = vmatpush1.bf16.msra.mxu1 %v6502_v57 }
 0x27d   :  { %4826 = vmatprep.subr.bf16.mxu0 %v6507_v8  ;;  %4858 = vmatprep.subr.bf16.mxu1 %v6509_v13 }
 0x280   :  { %4828 = vmatpush1.bf16.msra.mxu0 %v6511_v38  ;;  %4860 = vmatpush1.bf16.msra.mxu1 %v6514_v36 }
 0x281   :  { %4830 = vmatprep.subr.bf16.mxu0 %v6518_v48  ;;  %4862 = vmatprep.subr.bf16.mxu1 %v6520_v53 }
 0x284   :  { %4832 = vmatpush1.bf16.msra.mxu0 %v6523_v2  ;;  %4864 = vmatpush1.bf16.msra.mxu1 %v6527_v14 }
 0x285   :  { %4834 = vmatprep.subr.bf16.mxu0 %v6529_v15  ;;  %4866 = vmatprep.subr.bf16.mxu1 %v6531_v31 }
 0x288   :  { %4836 = vmatpush1.bf16.msra.mxu0 %v6534_v45  ;;  %4868 = vmatpush1.bf16.msra.mxu1 %v6538_v1 }
 0x289   :  { %4838 = vmatprep.subr.bf16.mxu0 %v6540_v16  ;;  %4870 = vmatprep.subr.bf16.mxu1 %v6543_v11 }
 0x28c   :  { %4840 = vmatpush1.bf16.msra.mxu0 %v6546_v6  ;;  %4872 = vmatpush1.bf16.msra.mxu1 %v6550_v18 }
 0x28d   :  { %4842 = vmatprep.subr.bf16.mxu0 %v6552_v5  ;;  %4874 = vmatprep.subr.bf16.mxu1 %v6555_v41 }
 0x290   :  { %4844 = vmatpush1.bf16.msra.mxu0 %v6558_v3  ;;  %4876 = vmatpush1.bf16.msra.mxu1 %v6562_v7 }
 0x291   :  { %4846 = vmatprep.subr.bf16.mxu0 %v6564_v9  ;;  %4878 = vmatprep.subr.bf16.mxu1 %v6567_v37 }
 0x294   :  { %4848 = vmatpush1.bf16.msra.mxu0 %v6570_v4  ;;  %4880 = vmatpush1.bf16.msra.mxu1 %v6574_v17 }
 0x295   :  { %4850 = vmatprep.subr.bf16.mxu0 %v6576_v49  ;;  %4882 = vmatprep.subr.bf16.mxu1 %v6579_v52 }
 0x298   :  { %4852 = vmatpush1.bf16.msra.mxu0 %v6582_v62  ;;  %4884 = vmatpush1.bf16.msra.mxu1 %v6586_v22 }
 0x299   :  { %4886 = vmatprep.subr.bf16.mxu0 %v6495_v43  ;;  %4918 = vmatprep.subr.bf16.mxu1 %v6497_v27 }
 0x34d   :  { %v1007_v25 = vpop.f32.mrb[4].mxu0  ;;  %v1078_v33 = vpop.f32.mrb[12].mxu1 }
 0x34e   :  { %v1009_v42 = vpop.f32.mrb[5].mxu0  ;;  %v1080_v46 = vpop.f32.mrb[13].mxu1 }
 0x34f   :  { %v1087_v54 = vcombine.low %v1007_v25, %v1009_v42  ;;  %v1088_v58 = vcombine.low %v1078_v33, %v1080_v46 }
 0x351   :  { %v1095_v60 = vrot.slane %v1087_v54, %v6405_v47  ;;  %v1102_v21 = vrot.slane %v1088_v58, %v6405_v47 }
 0x353   :  { %v1103_v24 = vcombine.low %v1095_v60, %v1102_v21 }
 0x355   :  { %v1105_v30 = vadd.f32 %v1103_v24, %v309_v19 }
 0x357   :  { %v4526_v39 = vmul.f32 -1.442695, %v1105_v30  ;;  %v1113_v44 = vrot.slane %v1105_v30, 2  ;;  %v1124_v56 = vrot.slane %v1105_v30, 6  ;;  %v1121_v51 = vrot.slane %v1105_v30, 4 }
 0x359   :  { %5783 = vpow2.f32 %v4526_v39  ;;  %v4527_v50 = vmul.f32 -1.442695, %v1113_v44  ;;  %v4528_v61 = vmul.f32 -1.442695, %v1124_v56 }
 0x35b   :  { %5785 = vpow2.f32 %v4527_v50 }
 0x35c   :  { %5787 = vpow2.f32 %v4528_v61 }
 0x363   :  { %v5784_v26 = vpop.eup %5783 }
 0x364   :  { %v1109_v59 = vadd.f32 1.0, %v5784_v26 }
 0x365   :  { %v5786_v12 = vpop.eup %5785 }
 0x366   :  { %5789 = vrcp.f32 %v1109_v59  ;;  %v1118_v25 = vadd.f32 1.0, %v5786_v12  ;;  %v5788_v33 = vpop.eup %5787 }
 0x367   :  { %5791 = vtanh.f32 %v1121_v51  ;;  %v1129_v54 = vadd.f32 1.0, %v5788_v33 }
 0x368   :  { %5793 = vrcp.f32 %v1118_v25 }
 0x369   :  { %5795 = vrcp.f32 %v1129_v54 }
 0x370   :  { %v5790_v42 = vpop.eup %5789 }
 0x371   :  { %v5792_v46 = vpop.eup %5791 }
 0x372   :  { %v5794_v19 = vpop.eup %5793  ;;  %v1133_v60 = vmul.f32 %v5792_v46, %v5790_v42 }
 0x373   :  { %v1132_v58 = vmul.f32 %v5794_v19, %v6490_v55  ;;  %v5796_v24 = vpop.eup %5795 }
 0x375   :  { %v6599_v21 = vadd.f32 %v1133_v60, %v1132_v58 }
 0x377   :  { %5797 = vtanh.f32 %v6599_v21 }
 0x381   :  { %v5798_v30 = vpop.eup %5797 }
 0x382   :  { %v1136_v39 = vmul.f32 %v5798_v30, %v5796_v24 }
 0x384   :  { %1137 = vst [vmem:[#allocation2 + $0x4] sm:$0x3] %v1136_v39  ;;  %1267 = vmatmul.mubr.f32.vlgmr.msra.gmra.mrb[6].mxu0 %v1136_v39  ;;  %1338 = vmatmul.mubr.f32.vlgmr.msra.gmra.mrb[14].mxu1 %v1136_v39 }
 0x385   :  { %4888 = vmatpush1.bf16.msra.mxu0 %v6499_v40  ;;  %4920 = vmatpush1.bf16.msra.mxu1 %v6502_v57 }
 0x386   :  { %4890 = vmatprep.subr.bf16.mxu0 %v6507_v8  ;;  %4922 = vmatprep.subr.bf16.mxu1 %v6509_v13 }
 0x387   :  { %1527 = vmatprep.mubr.f32.mxu0 %v6106_v0  ;;  %1598 = vmatprep.mubr.f32.mxu1 %v6106_v0 }
 0x389   :  { %4892 = vmatpush1.bf16.msra.mxu0 %v6511_v38  ;;  %4924 = vmatpush1.bf16.msra.mxu1 %v6514_v36 }
 0x38a   :  { %4894 = vmatprep.subr.bf16.mxu0 %v6518_v48  ;;  %4926 = vmatprep.subr.bf16.mxu1 %v6520_v53 }
 0x38d   :  { %4896 = vmatpush1.bf16.msra.mxu0 %v6523_v2  ;;  %4928 = vmatpush1.bf16.msra.mxu1 %v6527_v14 }
 0x38e   :  { %4898 = vmatprep.subr.bf16.mxu0 %v6529_v15  ;;  %4930 = vmatprep.subr.bf16.mxu1 %v6531_v31 }
 0x391   :  { %4900 = vmatpush1.bf16.msra.mxu0 %v6534_v45  ;;  %4932 = vmatpush1.bf16.msra.mxu1 %v6538_v1 }
 0x392   :  { %4902 = vmatprep.subr.bf16.mxu0 %v6540_v16  ;;  %4934 = vmatprep.subr.bf16.mxu1 %v6543_v11 }
 0x395   :  { %4904 = vmatpush1.bf16.msra.mxu0 %v6546_v6  ;;  %4936 = vmatpush1.bf16.msra.mxu1 %v6550_v18 }
 0x396   :  { %4906 = vmatprep.subr.bf16.mxu0 %v6552_v5  ;;  %4938 = vmatprep.subr.bf16.mxu1 %v6555_v41 }
 0x399   :  { %4908 = vmatpush1.bf16.msra.mxu0 %v6558_v3  ;;  %4940 = vmatpush1.bf16.msra.mxu1 %v6562_v7 }
 0x39a   :  { %4910 = vmatprep.subr.bf16.mxu0 %v6564_v9  ;;  %4942 = vmatprep.subr.bf16.mxu1 %v6567_v37 }
 0x39d   :  { %4912 = vmatpush1.bf16.msra.mxu0 %v6570_v4  ;;  %4944 = vmatpush1.bf16.msra.mxu1 %v6574_v17 }
 0x39e   :  { %4914 = vmatprep.subr.bf16.mxu0 %v6576_v49  ;;  %4946 = vmatprep.subr.bf16.mxu1 %v6579_v52 }
 0x3a1   :  { %4916 = vmatpush1.bf16.msra.mxu0 %v6582_v62  ;;  %4948 = vmatpush1.bf16.msra.mxu1 %v6586_v22 }
 0x3a2   :  { %4950 = vmatprep.subr.bf16.mxu0 %v6495_v43  ;;  %4982 = vmatprep.subr.bf16.mxu1 %v6497_v27 }
 0x457   :  { %v1268_v55 = vpop.f32.mrb[6].mxu0  ;;  %v1339_v44 = vpop.f32.mrb[14].mxu1 }
 0x458   :  { %v1270_v50 = vpop.f32.mrb[7].mxu0  ;;  %v1341_v56 = vpop.f32.mrb[15].mxu1 }
 0x459   :  { %v1348_v61 = vcombine.low %v1268_v55, %v1270_v50  ;;  %v1349_v26 = vcombine.low %v1339_v44, %v1341_v56 }
 0x45b   :  { %v1356_v51 = vrot.slane %v1348_v61, %v6405_v47  ;;  %v1363_v59 = vrot.slane %v1349_v26, %v6405_v47 }
 0x45d   :  { %v1364_v12 = vcombine.low %v1356_v51, %v1363_v59 }
 0x45f   :  { %v1366_v25 = vadd.f32 %v1364_v12, %v310_v23 }
 0x461   :  { %v4529_v33 = vmul.f32 -1.442695, %v1366_v25  ;;  %v1374_v42 = vrot.slane %v1366_v25, 2  ;;  %v1385_v19 = vrot.slane %v1366_v25, 6  ;;  %v1382_v60 = vrot.slane %v1366_v25, 4 }
 0x463   :  { %5799 = vpow2.f32 %v4529_v33  ;;  %v4530_v46 = vmul.f32 -1.442695, %v1374_v42  ;;  %v4531_v54 = vmul.f32 -1.442695, %v1385_v19 }
 0x465   :  { %5801 = vpow2.f32 %v4530_v46 }
 0x466   :  { %5803 = vpow2.f32 %v4531_v54 }
 0x46d   :  { %v5800_v58 = vpop.eup %5799 }
 0x46e   :  { %v1370_v24 = vadd.f32 1.0, %v5800_v58 }
 0x46f   :  { %v5802_v30 = vpop.eup %5801 }
 0x470   :  { %5805 = vrcp.f32 %v1370_v24  ;;  %v1379_v39 = vadd.f32 1.0, %v5802_v30  ;;  %v5804_v55 = vpop.eup %5803 }
 0x471   :  { %5807 = vtanh.f32 %v1382_v60  ;;  %v1390_v23 = vadd.f32 1.0, %v5804_v55 }
 0x472   :  { %5809 = vrcp.f32 %v1379_v39 }
 0x473   :  { %5811 = vrcp.f32 %v1390_v23 }
 0x47a   :  { %v5806_v44 = vpop.eup %5805 }
 0x47b   :  { %v5808_v10 = vpop.eup %5807 }
 0x47c   :  { %v5810_v20 = vpop.eup %5809  ;;  %v1394_v56 = vmul.f32 %v5808_v10, %v5806_v44 }
 0x47d   :  { %v1393_v50 = vmul.f32 %v5810_v20, %v6599_v21  ;;  %v5812_v26 = vpop.eup %5811 }
 0x47f   :  { %v6642_v61 = vadd.f32 %v1394_v56, %v1393_v50 }
 0x481   :  { %5813 = vtanh.f32 %v6642_v61 }
 0x48b   :  { %v5814_v51 = vpop.eup %5813 }
 0x48c   :  { %v1397_v59 = vmul.f32 %v5814_v51, %v5812_v26 }
 0x48e   :  { %1398 = vst [vmem:[#allocation2 + $0x6] sm:$0x3] %v1397_v59  ;;  %1528 = vmatmul.mubr.f32.vlgmr.msra.gmra.mrb[8].mxu0 %v1397_v59  ;;  %1599 = vmatmul.mubr.f32.vlgmr.msra.gmra.mrb[16].mxu1 %v1397_v59 }
 0x48f   :  { %4952 = vmatpush1.bf16.msra.mxu0 %v6499_v40  ;;  %4984 = vmatpush1.bf16.msra.mxu1 %v6502_v57 }
 0x490   :  { %4954 = vmatprep.subr.bf16.mxu0 %v6507_v8  ;;  %4986 = vmatprep.subr.bf16.mxu1 %v6509_v13 }
 0x491   :  { %1788 = vmatprep.mubr.f32.mxu0 %v6106_v0  ;;  %1859 = vmatprep.mubr.f32.mxu1 %v6106_v0 }
 0x493   :  { %4956 = vmatpush1.bf16.msra.mxu0 %v6511_v38  ;;  %4988 = vmatpush1.bf16.msra.mxu1 %v6514_v36 }
 0x494   :  { %4958 = vmatprep.subr.bf16.mxu0 %v6518_v48  ;;  %4990 = vmatprep.subr.bf16.mxu1 %v6520_v53 }
 0x497   :  { %4960 = vmatpush1.bf16.msra.mxu0 %v6523_v2  ;;  %4992 = vmatpush1.bf16.msra.mxu1 %v6527_v14 }
 0x498   :  { %4962 = vmatprep.subr.bf16.mxu0 %v6529_v15  ;;  %4994 = vmatprep.subr.bf16.mxu1 %v6531_v31 }
 0x49b   :  { %4964 = vmatpush1.bf16.msra.mxu0 %v6534_v45  ;;  %4996 = vmatpush1.bf16.msra.mxu1 %v6538_v1 }
 0x49c   :  { %4966 = vmatprep.subr.bf16.mxu0 %v6540_v16  ;;  %4998 = vmatprep.subr.bf16.mxu1 %v6543_v11 }
 0x49f   :  { %4968 = vmatpush1.bf16.msra.mxu0 %v6546_v6  ;;  %5000 = vmatpush1.bf16.msra.mxu1 %v6550_v18 }
 0x4a0   :  { %4970 = vmatprep.subr.bf16.mxu0 %v6552_v5  ;;  %5002 = vmatprep.subr.bf16.mxu1 %v6555_v41 }
 0x4a3   :  { %4972 = vmatpush1.bf16.msra.mxu0 %v6558_v3  ;;  %5004 = vmatpush1.bf16.msra.mxu1 %v6562_v7 }
 0x4a4   :  { %4974 = vmatprep.subr.bf16.mxu0 %v6564_v9  ;;  %5006 = vmatprep.subr.bf16.mxu1 %v6567_v37 }
 0x4a7   :  { %4976 = vmatpush1.bf16.msra.mxu0 %v6570_v4  ;;  %5008 = vmatpush1.bf16.msra.mxu1 %v6574_v17 }
 0x4a8   :  { %4978 = vmatprep.subr.bf16.mxu0 %v6576_v49  ;;  %5010 = vmatprep.subr.bf16.mxu1 %v6579_v52 }
 0x4ab   :  { %4980 = vmatpush1.bf16.msra.mxu0 %v6582_v62  ;;  %5012 = vmatpush1.bf16.msra.mxu1 %v6586_v22 }
 0x4ac   :  { %5014 = vmatprep.subr.bf16.mxu0 %v6495_v43  ;;  %5046 = vmatprep.subr.bf16.mxu1 %v6497_v27 }
 0x561   :  { %v1529_v21 = vpop.f32.mrb[8].mxu0  ;;  %v1600_v12 = vpop.f32.mrb[16].mxu1 }
 0x562   :  { %v1531_v25 = vpop.f32.mrb[9].mxu0  ;;  %v1602_v33 = vpop.f32.mrb[17].mxu1 }
 0x563   :  { %v1609_v42 = vcombine.low %v1529_v21, %v1531_v25  ;;  %v1610_v46 = vcombine.low %v1600_v12, %v1602_v33 }
 0x565   :  { %v1617_v19 = vrot.slane %v1609_v42, %v6405_v47  ;;  %v1624_v54 = vrot.slane %v1610_v46, %v6405_v47  ;;  %v2187_v46 = vld [vmem:[#allocation3 + $0x28] sm:$0xff] }
 0x567   :  { %v1625_v58 = vcombine.low %v1617_v19, %v1624_v54  ;;  %v2185_v19 = vld [vmem:[#allocation3 + $0x18] sm:$0xff] }
 0x569   :  { %v1627_v60 = vadd.f32 %v1625_v58, %v343_v35  ;;  %v2189_v58 = vld [vmem:[#allocation3 + $0x38] sm:$0xff] }
 0x56b   :  { %v4532_v24 = vmul.f32 -1.442695, %v1627_v60  ;;  %v1635_v30 = vrot.slane %v1627_v60, 2  ;;  %v1646_v27 = vrot.slane %v1627_v60, 6  ;;  %v1643_v44 = vrot.slane %v1627_v60, 4  ;;  %v2182_v60 = vld [vmem:[#allocation3] sm:$0xff] }
 0x56d   :  { %5815 = vpow2.f32 %v4532_v24  ;;  %v4533_v43 = vmul.f32 -1.442695, %v1635_v30  ;;  %v4534_v39 = vmul.f32 -1.442695, %v1646_v27  ;;  %v2186_v24 = vld [vmem:[#allocation3 + $0x20] sm:$0xff]  ;;  %v5109_v30 = vpack.c.bf16 %v2189_v58, %v2185_v19  ;;  %v2184_v27 = vld [vmem:[#allocation3 + $0x10] sm:$0xff] }
 0x56e   :  { %v2225_v19 = vld [vmem:[#allocation3 + $0x158] sm:$0xff] }
 0x56f   :  { %5817 = vpow2.f32 %v4533_v43  ;;  %v5079_v43 = vpack.c.bf16 %v2186_v24, %v2182_v60  ;;  %v2229_v58 = vld [vmem:[#allocation3 + $0x178] sm:$0xff] }
 0x570   :  { %5819 = vpow2.f32 %v4534_v39  ;;  %v2188_v39 = vld [vmem:[#allocation3 + $0x30] sm:$0xff] }
 0x577   :  { %v5816_v55 = vpop.eup %5815 }
 0x578   :  { %v1631_v10 = vadd.f32 1.0, %v5816_v55  ;;  %v5111_v55 = vpack.c.bf16 %v2188_v39, %v2184_v27  ;;  %v2224_v27 = vld [vmem:[#allocation3 + $0x150] sm:$0xff]  ;;  %v5129_v39 = vpack.c.bf16 %v2229_v58, %v2225_v19 }
 0x579   :  { %v5818_v20 = vpop.eup %5817 }
 0x57a   :  { %5821 = vrcp.f32 %v1631_v10  ;;  %v1640_v23 = vadd.f32 1.0, %v5818_v20  ;;  %v5820_v50 = vpop.eup %5819  ;;  %v2195_v10 = vld [vmem:[#allocation3 + $0x68] sm:$0xff]  ;;  %v2193_v20 = vld [vmem:[#allocation3 + $0x58] sm:$0xff] }
 0x57b   :  { %5823 = vtanh.f32 %v1643_v44  ;;  %v1651_v51 = vadd.f32 1.0, %v5820_v50  ;;  %v2191_v44 = vld [vmem:[#allocation3 + $0x48] sm:$0xff]  ;;  %v2197_v50 = vld [vmem:[#allocation3 + $0x78] sm:$0xff] }
 0x57c   :  { %5825 = vrcp.f32 %v1640_v23  ;;  %v5081_v23 = vpack.c.bf16 %v2195_v10, %v2191_v44  ;;  %v2231_v44 = vld [vmem:[#allocation3 + $0x188] sm:$0xff] }
 0x57d   :  { %5827 = vrcp.f32 %v1651_v51  ;;  %v2235_v10 = vld [vmem:[#allocation3 + $0x1a8] sm:$0xff] }
 0x584   :  { %v5822_v56 = vpop.eup %5821 }
 0x585   :  { %v5824_v26 = vpop.eup %5823 }
 0x586   :  { %v5826_v35 = vpop.eup %5825  ;;  %v1655_v21 = vmul.f32 %v5824_v26, %v5822_v56  ;;  %v2190_v56 = vld [vmem:[#allocation3 + $0x40] sm:$0xff] }
 0x587   :  { %v1654_v59 = vmul.f32 %v5826_v35, %v6642_v61  ;;  %v5828_v25 = vpop.eup %5827  ;;  %v2183_v61 = vld [vmem:[#allocation3 + $0x8] sm:$0xff]  ;;  %v2194_v26 = vld [vmem:[#allocation3 + $0x60] sm:$0xff]  ;;  %v5113_v35 = vpack.c.bf16 %v2197_v50, %v2193_v20  ;;  %v2233_v20 = vld [vmem:[#allocation3 + $0x198] sm:$0xff] }
 0x588   :  { %v5077_v54 = vpack.c.bf16 %v2187_v46, %v2183_v61  ;;  %v5083_v51 = vpack.c.bf16 %v2194_v26, %v2190_v56  ;;  %v2223_v61 = vld [vmem:[#allocation3 + $0x148] sm:$0xff]  ;;  %v5101_v26 = vpack.c.bf16 %v2235_v10, %v2231_v44 }
 0x589   :  { %v6685_v12 = vadd.f32 %v1655_v21, %v1654_v59  ;;  %v2192_v59 = vld [vmem:[#allocation3 + $0x50] sm:$0xff]  ;;  %v2227_v46 = vld [vmem:[#allocation3 + $0x168] sm:$0xff] }
 0x58a   :  { %v2196_v21 = vld [vmem:[#allocation3 + $0x70] sm:$0xff]  ;;  %v5097_v24 = vpack.c.bf16 %v2227_v46, %v2223_v61 }
 0x58b   :  { %5829 = vtanh.f32 %v6685_v12 }
 0x595   :  { %v5830_v33 = vpop.eup %5829 }
 0x596   :  { %v1658_v42 = vmul.f32 %v5830_v33, %v5828_v25  ;;  %v2199_v25 = vld [vmem:[#allocation3 + $0x88] sm:$0xff] }
 0x597   :  { %v2203_v33 = vld [vmem:[#allocation3 + $0xa8] sm:$0xff] }
 0x598   :  { %1659 = vst [vmem:[#allocation2 + $0x8] sm:$0x3] %v1658_v42  ;;  %1789 = vmatmul.mubr.f32.vlgmr.msra.gmra.mrb[10].mxu0 %v1658_v42  ;;  %1860 = vmatmul.mubr.f32.vlgmr.msra.gmra.mrb[18].mxu1 %v1658_v42  ;;  %v2201_v42 = vld [vmem:[#allocation3 + $0x98] sm:$0xff] }
 0x599   :  { %5016 = vmatpush1.bf16.msra.mxu0 %v6499_v40  ;;  %5048 = vmatpush1.bf16.msra.mxu1 %v6502_v57 }
 0x59a   :  { %5018 = vmatprep.subr.bf16.mxu0 %v6507_v8  ;;  %5050 = vmatprep.subr.bf16.mxu1 %v6509_v13 }
 0x59b   :  { %2049 = vmatprep.mubr.f32.mxu0 %v6106_v0  ;;  %2120 = vmatprep.mubr.f32.mxu1 %v6106_v0 }
 0x59d   :  { %5020 = vmatpush1.bf16.msra.mxu0 %v6511_v38  ;;  %5052 = vmatpush1.bf16.msra.mxu1 %v6514_v36 }
 0x59e   :  { %5022 = vmatprep.subr.bf16.mxu0 %v6518_v48  ;;  %5054 = vmatprep.subr.bf16.mxu1 %v6520_v53 }
 0x5a1   :  { %5024 = vmatpush1.bf16.msra.mxu0 %v6523_v2  ;;  %5056 = vmatpush1.bf16.msra.mxu1 %v6527_v14  ;;  %v7301_v14 = vcombine.high %v6428_v28, %v6434_v32 }
 0x5a2   :  { %5026 = vmatprep.subr.bf16.mxu0 %v6529_v15  ;;  %5058 = vmatprep.subr.bf16.mxu1 %v6531_v31 }
 0x5a5   :  { %5028 = vmatpush1.bf16.msra.mxu0 %v6534_v45  ;;  %5060 = vmatpush1.bf16.msra.mxu1 %v6538_v1 }
 0x5a6   :  { %5030 = vmatprep.subr.bf16.mxu0 %v6540_v16  ;;  %5062 = vmatprep.subr.bf16.mxu1 %v6543_v11 }
 0x5a9   :  { %5032 = vmatpush1.bf16.msra.mxu0 %v6546_v6  ;;  %5064 = vmatpush1.bf16.msra.mxu1 %v6550_v18 }
 0x5aa   :  { %5034 = vmatprep.subr.bf16.mxu0 %v6552_v5  ;;  %5066 = vmatprep.subr.bf16.mxu1 %v6555_v41 }
 0x5ad   :  { %5036 = vmatpush1.bf16.msra.mxu0 %v6558_v3  ;;  %5068 = vmatpush1.bf16.msra.mxu1 %v6562_v7 }
 0x5ae   :  { %5038 = vmatprep.subr.bf16.mxu0 %v6564_v9  ;;  %5070 = vmatprep.subr.bf16.mxu1 %v6567_v37 }
 0x5b1   :  { %5040 = vmatpush1.bf16.msra.mxu0 %v6570_v4  ;;  %5072 = vmatpush1.bf16.msra.mxu1 %v6574_v17 }
 0x5b2   :  { %5042 = vmatprep.subr.bf16.mxu0 %v6576_v49  ;;  %5074 = vmatprep.subr.bf16.mxu1 %v6579_v52 }
 0x5b5   :  { %5044 = vmatpush1.bf16.msra.mxu0 %v6582_v62  ;;  %5076 = vmatpush1.bf16.msra.mxu1 %v6586_v22 }
 0x5b6   :  { %5078 = vmatprep.subr.bf16.mxu0 %v5077_v54  ;;  %5110 = vmatprep.subr.bf16.mxu1 %v5109_v30  ;;  %v2222_v30 = vld [vmem:[#allocation3 + $0x140] sm:$0xff] }
 0x66b   :  { %v1790_v40 = vpop.f32.mrb[10].mxu0  ;;  %v1861_v57 = vpop.f32.mrb[18].mxu1 }
 0x66c   :  { %v1792_v8 = vpop.f32.mrb[11].mxu0  ;;  %v1863_v13 = vpop.f32.mrb[19].mxu1 }
 0x66d   :  { %v1870_v38 = vcombine.low %v1790_v40, %v1792_v8  ;;  %v1871_v36 = vcombine.low %v1861_v57, %v1863_v13  ;;  %v5085_v40 = vpack.c.bf16 %v2203_v33, %v2199_v25  ;;  %v2205_v57 = vld [vmem:[#allocation3 + $0xb8] sm:$0xff]  ;;  %v2198_v8 = vld [vmem:[#allocation3 + $0x80] sm:$0xff]  ;;  %v2239_v25 = vld [vmem:[#allocation3 + $0x1c8] sm:$0xff] }
 0x66e   :  { %v2202_v13 = vld [vmem:[#allocation3 + $0xa0] sm:$0xff]  ;;  %v2243_v33 = vld [vmem:[#allocation3 + $0x1e8] sm:$0xff] }
 0x66f   :  { %v1878_v48 = vrot.slane %v1870_v38, %v6405_v47  ;;  %v1885_v53 = vrot.slane %v1871_v36, %v6405_v47  ;;  %v5117_v38 = vpack.c.bf16 %v2205_v57, %v2201_v42  ;;  %v5087_v36 = vpack.c.bf16 %v2202_v13, %v2198_v8  ;;  %v2241_v42 = vld [vmem:[#allocation3 + $0x1d8] sm:$0xff] }
 0x670   :  { %v5105_v13 = vpack.c.bf16 %v2243_v33, %v2239_v25 }
 0x671   :  { %v1886_v2 = vcombine.low %v1878_v48, %v1885_v53  ;;  %v2200_v48 = vld [vmem:[#allocation3 + $0x90] sm:$0xff] }
 0x672   :  { %v2204_v53 = vld [vmem:[#allocation3 + $0xb0] sm:$0xff] }
 0x673   :  { %v1888_v15 = vadd.f32 %v1886_v2, %v7301_v14  ;;  %v2207_v2 = vld [vmem:[#allocation3 + $0xc8] sm:$0xff]  ;;  %v5119_v14 = vpack.c.bf16 %v2204_v53, %v2200_v48  ;;  %v2240_v48 = vld [vmem:[#allocation3 + $0x1d0] sm:$0xff] }
 0x675   :  { %v4535_v31 = vmul.f32 -1.442695, %v1888_v15  ;;  %v1896_v45 = vrot.slane %v1888_v15, 2  ;;  %v1907_v16 = vrot.slane %v1888_v15, 6  ;;  %v1904_v18 = vrot.slane %v1888_v15, 4  ;;  %v2211_v15 = vld [vmem:[#allocation3 + $0xe8] sm:$0xff] }
 0x677   :  { %5831 = vpow2.f32 %v4535_v31  ;;  %v4536_v1 = vmul.f32 -1.442695, %v1896_v45  ;;  %v4537_v11 = vmul.f32 -1.442695, %v1907_v16  ;;  %v2209_v31 = vld [vmem:[#allocation3 + $0xd8] sm:$0xff] }
 0x678   :  { %v2213_v45 = vld [vmem:[#allocation3 + $0xf8] sm:$0xff] }
 0x679   :  { %5833 = vpow2.f32 %v4536_v1  ;;  %v5089_v1 = vpack.c.bf16 %v2211_v15, %v2207_v2  ;;  %v5121_v16 = vpack.c.bf16 %v2213_v45, %v2209_v31  ;;  %v2244_v2 = vld [vmem:[#allocation3 + $0x1f0] sm:$0xff]  ;;  %v2450_v15 = vld [vmem:[#allocation6 + $0x28] sm:$0xff]  ;;  %v2448_v31 = vld [vmem:[#allocation6 + $0x18] sm:$0xff] }
 0x67a   :  { %5835 = vpow2.f32 %v4537_v11  ;;  %v2206_v11 = vld [vmem:[#allocation3 + $0xc0] sm:$0xff]  ;;  %v2452_v45 = vld [vmem:[#allocation6 + $0x38] sm:$0xff] }
 0x681   :  { %v5832_v6 = vpop.eup %5831 }
 0x682   :  { %v1892_v5 = vadd.f32 1.0, %v5832_v6  ;;  %v2210_v6 = vld [vmem:[#allocation3 + $0xe0] sm:$0xff] }
 0x683   :  { %v5834_v41 = vpop.eup %5833 }
 0x684   :  { %5837 = vrcp.f32 %v1892_v5  ;;  %v1901_v3 = vadd.f32 1.0, %v5834_v41  ;;  %v5836_v7 = vpop.eup %5835  ;;  %v5091_v5 = vpack.c.bf16 %v2210_v6, %v2206_v11  ;;  %v2212_v41 = vld [vmem:[#allocation3 + $0xf0] sm:$0xff]  ;;  %v5173_v6 = vpack.c.bf16 %v2452_v45, %v2448_v31  ;;  %v2461_v45 = vld [vmem:[#allocation6 + $0x80] sm:$0xff] }
 0x685   :  { %5839 = vtanh.f32 %v1904_v18  ;;  %v1912_v37 = vadd.f32 1.0, %v5836_v7  ;;  %v2208_v18 = vld [vmem:[#allocation3 + $0xd0] sm:$0xff]  ;;  %v2219_v7 = vld [vmem:[#allocation3 + $0x128] sm:$0xff] }
 0x686   :  { %5841 = vrcp.f32 %v1901_v3  ;;  %v2215_v3 = vld [vmem:[#allocation3 + $0x108] sm:$0xff] }
 0x687   :  { %5843 = vrcp.f32 %v1912_v37  ;;  %v2221_v37 = vld [vmem:[#allocation3 + $0x138] sm:$0xff] }
 0x68e   :  { %v5838_v9 = vpop.eup %5837 }
 0x68f   :  { %v5840_v28 = vpop.eup %5839 }
 0x690   :  { %v5842_v32 = vpop.eup %5841  ;;  %v1916_v17 = vmul.f32 %v5840_v28, %v5838_v9  ;;  %v5123_v9 = vpack.c.bf16 %v2212_v41, %v2208_v18  ;;  %v5093_v28 = vpack.c.bf16 %v2219_v7, %v2215_v3 }
 0x691   :  { %v1915_v4 = vmul.f32 %v5842_v32, %v6685_v12  ;;  %v5844_v52 = vpop.eup %5843  ;;  %v5115_v12 = vpack.c.bf16 %v2196_v21, %v2192_v59  ;;  %v2217_v32 = vld [vmem:[#allocation3 + $0x118] sm:$0xff]  ;;  %v2232_v59 = vld [vmem:[#allocation3 + $0x190] sm:$0xff] }
 0x693   :  { %v6726_v49 = vadd.f32 %v1916_v17, %v1915_v4  ;;  %v2214_v4 = vld [vmem:[#allocation3 + $0x100] sm:$0xff]  ;;  %v5125_v17 = vpack.c.bf16 %v2221_v37, %v2217_v32 }
 0x695   :  { %5845 = vtanh.f32 %v6726_v49 }
 0x69f   :  { %v5846_v62 = vpop.eup %5845 }
 0x6a0   :  { %v1919_v22 = vmul.f32 %v5846_v62, %v5844_v52  ;;  %v2218_v52 = vld [vmem:[#allocation3 + $0x120] sm:$0xff]  ;;  %v2216_v62 = vld [vmem:[#allocation3 + $0x110] sm:$0xff] }
 0x6a1   :  { %v5095_v54 = vpack.c.bf16 %v2218_v52, %v2214_v4  ;;  %v7302_v4 = vcombine.low %v6431_v29, %v6437_v34 }
 0x6a2   :  { %1920 = vst [vmem:[#allocation2 + $0xa] sm:$0x3] %v1919_v22  ;;  %2050 = vmatmul.mubr.f32.vlgmr.msra.gmra.mrb[12].mxu0 %v1919_v22  ;;  %2121 = vmatmul.mubr.f32.vlgmr.msra.gmra.mrb[20].mxu1 %v1919_v22  ;;  %v2220_v22 = vld [vmem:[#allocation3 + $0x130] sm:$0xff] }
 0x6a3   :  { %2310 = vmatprep.mubr.f32.mxu0 %v6106_v0  ;;  %2381 = vmatprep.mubr.f32.mxu1 %v6106_v0  ;;  %v5127_v60 = vpack.c.bf16 %v2220_v22, %v2216_v62 }
 0x6a4   :  { %5080 = vmatpush1.bf16.msra.mxu0 %v5079_v43  ;;  %5112 = vmatpush1.bf16.msra.mxu1 %v5111_v55  ;;  %v2226_v43 = vld [vmem:[#allocation3 + $0x160] sm:$0xff]  ;;  %v2228_v55 = vld [vmem:[#allocation3 + $0x170] sm:$0xff] }
 0x6a5   :  { %5082 = vmatprep.subr.bf16.mxu0 %v5081_v23  ;;  %5114 = vmatprep.subr.bf16.mxu1 %v5113_v35  ;;  %v2237_v23 = vld [vmem:[#allocation3 + $0x1b8] sm:$0xff]  ;;  %v5099_v50 = vpack.c.bf16 %v2226_v43, %v2222_v30  ;;  %v5131_v56 = vpack.c.bf16 %v2228_v55, %v2224_v27  ;;  %v2230_v35 = vld [vmem:[#allocation3 + $0x180] sm:$0xff] }
 0x6a6   :  { %v5133_v21 = vpack.c.bf16 %v2237_v23, %v2233_v20  ;;  %v2445_v23 = vld [vmem:[#allocation6] sm:$0xff] }
 0x6a8   :  { %5084 = vmatpush1.bf16.msra.mxu0 %v5083_v51  ;;  %5116 = vmatpush1.bf16.msra.mxu1 %v5115_v12  ;;  %v2234_v51 = vld [vmem:[#allocation3 + $0x1a0] sm:$0xff]  ;;  %v2236_v12 = vld [vmem:[#allocation3 + $0x1b0] sm:$0xff] }
 0x6a9   :  { %5086 = vmatprep.subr.bf16.mxu0 %v5085_v40  ;;  %5118 = vmatprep.subr.bf16.mxu1 %v5117_v38  ;;  %v2245_v40 = vld [vmem:[#allocation3 + $0x1f8] sm:$0xff]  ;;  %v5103_v57 = vpack.c.bf16 %v2234_v51, %v2230_v35  ;;  %v5135_v8 = vpack.c.bf16 %v2236_v12, %v2232_v59  ;;  %v2238_v38 = vld [vmem:[#allocation3 + $0x1c0] sm:$0xff]  ;;  %v2454_v35 = vld [vmem:[#allocation6 + $0x48] sm:$0xff] }
 0x6aa   :  { %v5137_v53 = vpack.c.bf16 %v2245_v40, %v2241_v42  ;;  %v2458_v51 = vld [vmem:[#allocation6 + $0x68] sm:$0xff]  ;;  %v2456_v59 = vld [vmem:[#allocation6 + $0x58] sm:$0xff]  ;;  %v2453_v40 = vld [vmem:[#allocation6 + $0x40] sm:$0xff] }
 0x6ac   :  { %5088 = vmatpush1.bf16.msra.mxu0 %v5087_v36  ;;  %5120 = vmatpush1.bf16.msra.mxu1 %v5119_v14  ;;  %v2242_v36 = vld [vmem:[#allocation3 + $0x1e0] sm:$0xff]  ;;  %v2446_v14 = vld [vmem:[#allocation6 + $0x8] sm:$0xff] }
 0x6ad   :  { %5090 = vmatprep.subr.bf16.mxu0 %v5089_v1  ;;  %5122 = vmatprep.subr.bf16.mxu1 %v5121_v16  ;;  %v5107_v1 = vpack.c.bf16 %v2242_v36, %v2238_v38  ;;  %v5139_v16 = vpack.c.bf16 %v2244_v2, %v2240_v48  ;;  %v5141_v11 = vpack.c.bf16 %v2450_v15, %v2446_v14  ;;  %v2455_v38 = vld [vmem:[#allocation6 + $0x50] sm:$0xff]  ;;  %v2462_v48 = vld [vmem:[#allocation6 + $0x88] sm:$0xff]  ;;  %v2464_v2 = vld [vmem:[#allocation6 + $0x98] sm:$0xff] }
 0x6ae   :  { %v2459_v36 = vld [vmem:[#allocation6 + $0x70] sm:$0xff]  ;;  %v2468_v14 = vld [vmem:[#allocation6 + $0xb8] sm:$0xff] }
 0x6af   :  { %v5179_v31 = vpack.c.bf16 %v2459_v36, %v2455_v38 }
 0x6b0   :  { %5092 = vmatpush1.bf16.msra.mxu0 %v5091_v5  ;;  %5124 = vmatpush1.bf16.msra.mxu1 %v5123_v9 }
 0x6b1   :  { %5094 = vmatprep.subr.bf16.mxu0 %v5093_v28  ;;  %5126 = vmatprep.subr.bf16.mxu1 %v5125_v17 }
 0x6b4   :  { %5096 = vmatpush1.bf16.msra.mxu0 %v5095_v54  ;;  %5128 = vmatpush1.bf16.msra.mxu1 %v5127_v60 }
 0x6b5   :  { %5098 = vmatprep.subr.bf16.mxu0 %v5097_v24  ;;  %5130 = vmatprep.subr.bf16.mxu1 %v5129_v39 }
 0x6b8   :  { %5100 = vmatpush1.bf16.msra.mxu0 %v5099_v50  ;;  %5132 = vmatpush1.bf16.msra.mxu1 %v5131_v56  ;;  %v2449_v50 = vld [vmem:[#allocation6 + $0x20] sm:$0xff]  ;;  %v2447_v56 = vld [vmem:[#allocation6 + $0x10] sm:$0xff] }
 0x6b9   :  { %5102 = vmatprep.subr.bf16.mxu0 %v5101_v26  ;;  %5134 = vmatprep.subr.bf16.mxu1 %v5133_v21  ;;  %v2451_v26 = vld [vmem:[#allocation6 + $0x30] sm:$0xff]  ;;  %v2460_v21 = vld [vmem:[#allocation6 + $0x78] sm:$0xff]  ;;  %v5143_v33 = vpack.c.bf16 %v2449_v50, %v2445_v23 }
 0x6ba   :  { %v5175_v42 = vpack.c.bf16 %v2451_v26, %v2447_v56  ;;  %v2492_v23 = vld [vmem:[#allocation6 + $0x178] sm:$0xff]  ;;  %v2485_v26 = vld [vmem:[#allocation6 + $0x140] sm:$0xff] }
 0x6bc   :  { %5104 = vmatpush1.bf16.msra.mxu0 %v5103_v57  ;;  %5136 = vmatpush1.bf16.msra.mxu1 %v5135_v8  ;;  %v5145_v8 = vpack.c.bf16 %v2458_v51, %v2454_v35  ;;  %v2489_v35 = vld [vmem:[#allocation6 + $0x160] sm:$0xff] }
 0x6bd   :  { %5106 = vmatprep.subr.bf16.mxu0 %v5105_v13  ;;  %5138 = vmatprep.subr.bf16.mxu1 %v5137_v53  ;;  %v5177_v13 = vpack.c.bf16 %v2460_v21, %v2456_v59  ;;  %v2466_v53 = vld [vmem:[#allocation6 + $0xa8] sm:$0xff]  ;;  %v2487_v21 = vld [vmem:[#allocation6 + $0x150] sm:$0xff] }
 0x6c0   :  { %5108 = vmatpush1.bf16.msra.mxu0 %v5107_v1  ;;  %5140 = vmatpush1.bf16.msra.mxu1 %v5139_v16  ;;  %v2465_v1 = vld [vmem:[#allocation6 + $0xa0] sm:$0xff]  ;;  %v5149_v16 = vpack.c.bf16 %v2466_v53, %v2462_v48  ;;  %v2495_v48 = vld [vmem:[#allocation6 + $0x190] sm:$0xff] }
 0x6c1   :  { %5142 = vmatprep.subr.bf16.mxu0 %v5141_v11  ;;  %5174 = vmatprep.subr.bf16.mxu1 %v5173_v6  ;;  %v5181_v11 = vpack.c.bf16 %v2468_v14, %v2464_v2  ;;  %v2463_v6 = vld [vmem:[#allocation6 + $0x90] sm:$0xff]  ;;  %v2502_v2 = vld [vmem:[#allocation6 + $0x1c8] sm:$0xff] }
 0x6c2   :  { %v2499_v53 = vld [vmem:[#allocation6 + $0x1b0] sm:$0xff]  ;;  %v2506_v14 = vld [vmem:[#allocation6 + $0x1e8] sm:$0xff] }
 0x775   :  { %v2051_v18 = vpop.f32.mrb[12].mxu0  ;;  %v2122_v5 = vpop.f32.mrb[20].mxu1 }
 0x776   :  { %v2053_v41 = vpop.f32.mrb[13].mxu0  ;;  %v2124_v3 = vpop.f32.mrb[21].mxu1 }
 0x777   :  { %v2131_v7 = vcombine.low %v2051_v18, %v2053_v41  ;;  %v2132_v9 = vcombine.low %v2122_v5, %v2124_v3  ;;  %v2467_v18 = vld [vmem:[#allocation6 + $0xb0] sm:$0xff]  ;;  %v2470_v5 = vld [vmem:[#allocation6 + $0xc8] sm:$0xff]  ;;  %v2472_v3 = vld [vmem:[#allocation6 + $0xd8] sm:$0xff] }
 0x778   :  { %v2474_v41 = vld [vmem:[#allocation6 + $0xe8] sm:$0xff] }
 0x779   :  { %v2139_v28 = vrot.slane %v2131_v7, %v6405_v47  ;;  %v2146_v32 = vrot.slane %v2132_v9, %v6405_v47  ;;  %v2476_v7 = vld [vmem:[#allocation6 + $0xf8] sm:$0xff]  ;;  %v5151_v9 = vpack.c.bf16 %v2465_v1, %v2461_v45  ;;  %v5199_v1 = vpack.c.bf16 %v2499_v53, %v2495_v48  ;;  %v2797_v48 = vld [vmem:[#allocation8 + $0xc0] sm:$0xff] }
 0x77a   :  { %v2801_v53 = vld [vmem:[#allocation8 + $0xe0] sm:$0xff] }
 0x77b   :  { %v2147_v37 = vcombine.low %v2139_v28, %v2146_v32  ;;  %v5183_v28 = vpack.c.bf16 %v2467_v18, %v2463_v6  ;;  %v2469_v32 = vld [vmem:[#allocation6 + $0xc0] sm:$0xff] }
 0x77c   :  { %v2505_v18 = vld [vmem:[#allocation6 + $0x1e0] sm:$0xff] }
 0x77d   :  { %v2149_v17 = vadd.f32 %v2147_v37, %v7302_v4  ;;  %v2473_v37 = vld [vmem:[#allocation6 + $0xe0] sm:$0xff]  ;;  %v5153_v4 = vpack.c.bf16 %v2474_v41, %v2470_v5  ;;  %v2503_v5 = vld [vmem:[#allocation6 + $0x1d0] sm:$0xff] }
 0x77e   :  { %v2507_v41 = vld [vmem:[#allocation6 + $0x1f0] sm:$0xff] }
 0x77f   :  { %v4538_v52 = vmul.f32 -1.442695, %v2149_v17  ;;  %v2157_v62 = vrot.slane %v2149_v17, 2  ;;  %v2168_v61 = vrot.slane %v2149_v17, 6  ;;  %v2165_v54 = vrot.slane %v2149_v17, 4 }
 0x780   :  { %v5185_v17 = vpack.c.bf16 %v2476_v7, %v2472_v3  ;;  %v5203_v7 = vpack.c.bf16 %v2507_v41, %v2503_v5  ;;  %v2805_v5 = vld [vmem:[#allocation8 + $0x100] sm:$0xff] }
 0x781   :  { %5847 = vpow2.f32 %v4538_v52  ;;  %v4539_v22 = vmul.f32 -1.442695, %v2157_v62  ;;  %v4540_v46 = vmul.f32 -1.442695, %v2168_v61  ;;  %v2471_v52 = vld [vmem:[#allocation6 + $0xd0] sm:$0xff]  ;;  %v2482_v61 = vld [vmem:[#allocation6 + $0x128] sm:$0xff] }
 0x782   :  { %v2475_v62 = vld [vmem:[#allocation6 + $0xf0] sm:$0xff]  ;;  %v2809_v41 = vld [vmem:[#allocation8 + $0x120] sm:$0xff] }
 0x783   :  { %5849 = vpow2.f32 %v4539_v22  ;;  %v2478_v22 = vld [vmem:[#allocation6 + $0x108] sm:$0xff] }
 0x784   :  { %5851 = vpow2.f32 %v4540_v46  ;;  %v2480_v46 = vld [vmem:[#allocation6 + $0x118] sm:$0xff] }
 0x78b   :  { %v5848_v19 = vpop.eup %5847 }
 0x78c   :  { %v2153_v58 = vadd.f32 1.0, %v5848_v19  ;;  %v2484_v19 = vld [vmem:[#allocation6 + $0x138] sm:$0xff] }
 0x78d   :  { %v5850_v60 = vpop.eup %5849 }
 0x78e   :  { %5853 = vrcp.f32 %v2153_v58  ;;  %v2162_v24 = vadd.f32 1.0, %v5850_v60  ;;  %v5852_v30 = vpop.eup %5851  ;;  %v5187_v58 = vpack.c.bf16 %v2475_v62, %v2471_v52  ;;  %v2477_v60 = vld [vmem:[#allocation6 + $0x100] sm:$0xff] }
 0x78f   :  { %5855 = vtanh.f32 %v2165_v54  ;;  %v2173_v55 = vadd.f32 1.0, %v5852_v30  ;;  %v5155_v54 = vpack.c.bf16 %v2473_v37, %v2469_v32  ;;  %v5157_v30 = vpack.c.bf16 %v2482_v61, %v2478_v22  ;;  %v2778_v32 = vld [vmem:[#allocation8 + $0x28] sm:$0xff]  ;;  %v2776_v37 = vld [vmem:[#allocation8 + $0x18] sm:$0xff]  ;;  %v2773_v52 = vld [vmem:[#allocation8] sm:$0xff] }
 0x790   :  { %5857 = vrcp.f32 %v2162_v24  ;;  %v2481_v24 = vld [vmem:[#allocation6 + $0x120] sm:$0xff] }
 0x791   :  { %5859 = vrcp.f32 %v2173_v55  ;;  %v2486_v55 = vld [vmem:[#allocation6 + $0x148] sm:$0xff]  ;;  %v5159_v50 = vpack.c.bf16 %v2481_v24, %v2477_v60  ;;  %v2777_v62 = vld [vmem:[#allocation8 + $0x20] sm:$0xff]  ;;  %v2784_v24 = vld [vmem:[#allocation8 + $0x58] sm:$0xff] }
 0x792   :  { %v6748_v61 = vpack.c.bf16 %v2777_v62, %v2773_v52  ;;  %v2786_v60 = vld [vmem:[#allocation8 + $0x68] sm:$0xff]  ;;  %v2816_v52 = vld [vmem:[#allocation8 + $0x158] sm:$0xff] }
 0x798   :  { %v5854_v43 = vpop.eup %5853 }
 0x799   :  { %v5856_v27 = vpop.eup %5855 }
 0x79a   :  { %v5858_v39 = vpop.eup %5857  ;;  %v2177_v10 = vmul.f32 %v5856_v27, %v5854_v43  ;;  %v5189_v43 = vpack.c.bf16 %v2484_v19, %v2480_v46  ;;  %v2479_v27 = vld [vmem:[#allocation6 + $0x110] sm:$0xff] }
 0x79b   :  { %v2176_v44 = vmul.f32 %v5858_v39, %v6726_v49  ;;  %v5860_v12 = vpop.eup %5859  ;;  %v2457_v49 = vld [vmem:[#allocation6 + $0x60] sm:$0xff]  ;;  %v2483_v39 = vld [vmem:[#allocation6 + $0x130] sm:$0xff] }
 0x79c   :  { %v5147_v15 = vpack.c.bf16 %v2457_v49, %v2453_v40  ;;  %v5191_v56 = vpack.c.bf16 %v2483_v39, %v2479_v27  ;;  %v2500_v40 = vld [vmem:[#allocation6 + $0x1b8] sm:$0xff]  ;;  %v5163_v49 = vpack.c.bf16 %v2489_v35, %v2485_v26  ;;  %v2775_v46 = vld [vmem:[#allocation8 + $0x10] sm:$0xff]  ;;  %v2781_v27 = vld [vmem:[#allocation8 + $0x40] sm:$0xff] }
 0x79d   :  { %v6737_v20 = vadd.f32 %v2177_v10, %v2176_v44  ;;  %v2490_v44 = vld [vmem:[#allocation6 + $0x168] sm:$0xff]  ;;  %v2488_v10 = vld [vmem:[#allocation6 + $0x158] sm:$0xff]  ;;  %v2779_v19 = vld [vmem:[#allocation8 + $0x30] sm:$0xff] }
 0x79e   :  { %v5161_v51 = vpack.c.bf16 %v2490_v44, %v2486_v55  ;;  %v5193_v59 = vpack.c.bf16 %v2492_v23, %v2488_v10  ;;  %v2785_v39 = vld [vmem:[#allocation8 + $0x60] sm:$0xff]  ;;  %v2783_v10 = vld [vmem:[#allocation8 + $0x50] sm:$0xff]  ;;  %v2794_v26 = vld [vmem:[#allocation8 + $0xa8] sm:$0xff] }
 0x79f   :  { %5861 = vtanh.f32 %v6737_v20  ;;  %v6760_v44 = vpack.c.bf16 %v2785_v39, %v2781_v27  ;;  %v2787_v23 = vld [vmem:[#allocation8 + $0x70] sm:$0xff]  ;;  %v2792_v35 = vld [vmem:[#allocation8 + $0x98] sm:$0xff]  ;;  %v2822_v39 = vld [vmem:[#allocation8 + $0x188] sm:$0xff] }
 0x7a0   :  { %v2819_v27 = vld [vmem:[#allocation8 + $0x170] sm:$0xff] }
 0x7a9   :  { %v5862_v25 = vpop.eup %5861 }
 0x7aa   :  { %v2180_v57 = vmul.f32 %v5862_v25, %v5860_v12  ;;  %v2491_v12 = vld [vmem:[#allocation6 + $0x170] sm:$0xff]  ;;  %v2494_v25 = vld [vmem:[#allocation6 + $0x188] sm:$0xff] }
 0x7ac   :  { %2181 = vst [vmem:[#allocation2 + $0xc] sm:$0x3] %v2180_v57  ;;  %2311 = vmatmul.mubr.f32.vlgmr.msra.gmra.mrb[14].mxu0 %v2180_v57  ;;  %2382 = vmatmul.mubr.f32.vlgmr.msra.gmra.mrb[22].mxu1 %v2180_v57  ;;  %v5195_v57 = vpack.c.bf16 %v2491_v12, %v2487_v21  ;;  %v2789_v21 = vld [vmem:[#allocation8 + $0x80] sm:$0xff] }
 0x7ad   :  { %5144 = vmatpush1.bf16.msra.mxu0 %v5143_v33  ;;  %5176 = vmatpush1.bf16.msra.mxu1 %v5175_v42  ;;  %v2498_v33 = vld [vmem:[#allocation6 + $0x1a8] sm:$0xff]  ;;  %v2496_v42 = vld [vmem:[#allocation6 + $0x198] sm:$0xff]  ;;  %v2793_v12 = vld [vmem:[#allocation8 + $0xa0] sm:$0xff] }
 0x7ae   :  { %5146 = vmatprep.subr.bf16.mxu0 %v5145_v8  ;;  %5178 = vmatprep.subr.bf16.mxu1 %v5177_v13  ;;  %v2493_v8 = vld [vmem:[#allocation6 + $0x180] sm:$0xff]  ;;  %v5165_v38 = vpack.c.bf16 %v2498_v33, %v2494_v25  ;;  %v5197_v36 = vpack.c.bf16 %v2500_v40, %v2496_v42  ;;  %v6772_v33 = vpack.c.bf16 %v2793_v12, %v2789_v21  ;;  %v2791_v42 = vld [vmem:[#allocation8 + $0x90] sm:$0xff] }
 0x7af   :  { %2595 = vmatprep.mubr.f32.mxu0 %v6106_v0  ;;  %2672 = vmatprep.mubr.f32.mxu1 %v6106_v0  ;;  %v2497_v13 = vld [vmem:[#allocation6 + $0x1a0] sm:$0xff]  ;;  %v2795_v40 = vld [vmem:[#allocation8 + $0xb0] sm:$0xff] }
 0x7b0   :  { %v5167_v45 = vpack.c.bf16 %v2497_v13, %v2493_v8  ;;  %v2802_v8 = vld [vmem:[#allocation8 + $0xe8] sm:$0xff]  ;;  %v2800_v13 = vld [vmem:[#allocation8 + $0xd8] sm:$0xff]  ;;  %v2821_v21 = vld [vmem:[#allocation8 + $0x180] sm:$0xff] }
 0x7b1   :  { %5148 = vmatpush1.bf16.msra.mxu0 %v5147_v15  ;;  %5180 = vmatpush1.bf16.msra.mxu1 %v5179_v31  ;;  %v2504_v15 = vld [vmem:[#allocation6 + $0x1d8] sm:$0xff]  ;;  %v2825_v12 = vld [vmem:[#allocation8 + $0x1a0] sm:$0xff] }
 0x7b2   :  { %5150 = vmatprep.subr.bf16.mxu0 %v5149_v16  ;;  %5182 = vmatprep.subr.bf16.mxu1 %v5181_v11  ;;  %v2508_v31 = vld [vmem:[#allocation6 + $0x1f8] sm:$0xff]  ;;  %v2501_v16 = vld [vmem:[#allocation6 + $0x1c0] sm:$0xff]  ;;  %v5169_v11 = vpack.c.bf16 %v2506_v14, %v2502_v2  ;;  %v6784_v14 = vpack.c.bf16 %v2801_v53, %v2797_v48 }
 0x7b3   :  { %v5201_v6 = vpack.c.bf16 %v2508_v31, %v2504_v15  ;;  %v5171_v3 = vpack.c.bf16 %v2505_v18, %v2501_v16  ;;  %v2799_v15 = vld [vmem:[#allocation8 + $0xd0] sm:$0xff]  ;;  %v2810_v16 = vld [vmem:[#allocation8 + $0x128] sm:$0xff]  ;;  %v2812_v18 = vld [vmem:[#allocation8 + $0x138] sm:$0xff] }
 0x7b4   :  { %v2803_v31 = vld [vmem:[#allocation8 + $0xf0] sm:$0xff]  ;;  %v2832_v48 = vld [vmem:[#allocation8 + $0x1d8] sm:$0xff] }
 0x7b5   :  { %5152 = vmatpush1.bf16.msra.mxu0 %v5151_v9  ;;  %5184 = vmatpush1.bf16.msra.mxu1 %v5183_v28  ;;  %v2443_v9 = vld [vmem:[#allocation2] sm:$0xff]  ;;  %v2774_v28 = vld [vmem:[#allocation8 + $0x8] sm:$0xff] }
 0x7b6   :  { %5154 = vmatprep.subr.bf16.mxu0 %v5153_v4  ;;  %5186 = vmatprep.subr.bf16.mxu1 %v5185_v17  ;;  %v6744_v4 = vpack.c.bf16 %v2778_v32, %v2774_v28  ;;  %v2780_v17 = vld [vmem:[#allocation8 + $0x38] sm:$0xff]  ;;  %v2811_v28 = vld [vmem:[#allocation8 + $0x130] sm:$0xff] }
 0x7b7   :  { %v6746_v22 = vpack.c.bf16 %v2780_v17, %v2776_v37  ;;  %v2814_v37 = vld [vmem:[#allocation8 + $0x148] sm:$0xff] }
 0x7b8   :  { %v2818_v17 = vld [vmem:[#allocation8 + $0x168] sm:$0xff] }
 0x7b9   :  { %5156 = vmatpush1.bf16.msra.mxu0 %v5155_v54  ;;  %5188 = vmatpush1.bf16.msra.mxu1 %v5187_v58  ;;  %v6751_v54 = vpack.c.bf16 %v2779_v19, %v2775_v46  ;;  %v2782_v58 = vld [vmem:[#allocation8 + $0x48] sm:$0xff]  ;;  %v6804_v62 = vpack.c.bf16 %v2818_v17, %v2814_v37  ;;  %v2820_v46 = vld [vmem:[#allocation8 + $0x178] sm:$0xff]  ;;  %v2813_v19 = vld [vmem:[#allocation8 + $0x140] sm:$0xff] }
 0x7ba   :  { %5158 = vmatprep.subr.bf16.mxu0 %v5157_v30  ;;  %5190 = vmatprep.subr.bf16.mxu1 %v5189_v43  ;;  %v6756_v30 = vpack.c.bf16 %v2786_v60, %v2782_v58  ;;  %v2788_v43 = vld [vmem:[#allocation8 + $0x78] sm:$0xff]  ;;  %v2817_v58 = vld [vmem:[#allocation8 + $0x160] sm:$0xff]  ;;  %v6806_v60 = vpack.c.bf16 %v2820_v46, %v2816_v52 }
 0x7bb   :  { %v6758_v55 = vpack.c.bf16 %v2788_v43, %v2784_v24  ;;  %v6808_v24 = vpack.c.bf16 %v2817_v58, %v2813_v19  ;;  %v2815_v43 = vld [vmem:[#allocation8 + $0x150] sm:$0xff] }
 0x7bd   :  { %5160 = vmatpush1.bf16.msra.mxu0 %v5159_v50  ;;  %5192 = vmatpush1.bf16.msra.mxu1 %v5191_v56  ;;  %v6763_v50 = vpack.c.bf16 %v2787_v23, %v2783_v10  ;;  %v2790_v56 = vld [vmem:[#allocation8 + $0x88] sm:$0xff]  ;;  %v6811_v10 = vpack.c.bf16 %v2819_v27, %v2815_v43  ;;  %v7303_v27 = vcombine.high %v6431_v29, %v6437_v34  ;;  %v2509_v29 = vld [vmem:[%s7292_s5] sm:$0xf]  ;;  %v7304_v34 = vsub.s32 0, %v6387_v63 }
 0x7be   :  { %5162 = vmatprep.subr.bf16.mxu0 %v5161_v51  ;;  %5194 = vmatprep.subr.bf16.mxu1 %v5193_v59  ;;  %v6768_v51 = vpack.c.bf16 %v2794_v26, %v2790_v56  ;;  %v2796_v59 = vld [vmem:[#allocation8 + $0xb8] sm:$0xff]  ;;  %v2826_v23 = vld [vmem:[#allocation8 + $0x1a8] sm:$0xff] }
 0x7bf   :  { %v6770_v25 = vpack.c.bf16 %v2796_v59, %v2792_v35  ;;  %v2824_v56 = vld [vmem:[#allocation8 + $0x198] sm:$0xff]  ;;  %v6815_v35 = vpack.c.bf16 %v2826_v23, %v2822_v39 }
 0x7c0   :  { %v2828_v26 = vld [vmem:[#allocation8 + $0x1b8] sm:$0xff] }
 0x7c1   :  { %5164 = vmatpush1.bf16.msra.mxu0 %v5163_v49  ;;  %5196 = vmatpush1.bf16.msra.mxu1 %v5195_v57  ;;  %v6775_v49 = vpack.c.bf16 %v2795_v40, %v2791_v42  ;;  %v2798_v57 = vld [vmem:[#allocation8 + $0xc8] sm:$0xff]  ;;  %v6817_v59 = vpack.c.bf16 %v2828_v26, %v2824_v56  ;;  %v2823_v42 = vld [vmem:[#allocation8 + $0x190] sm:$0xff]  ;;  %v6820_v40 = vpack.c.bf16 %v2825_v12, %v2821_v21 }
 0x7c2   :  { %5166 = vmatprep.subr.bf16.mxu0 %v5165_v38  ;;  %5198 = vmatprep.subr.bf16.mxu1 %v5197_v36  ;;  %v6780_v38 = vpack.c.bf16 %v2802_v8, %v2798_v57  ;;  %v2804_v36 = vld [vmem:[#allocation8 + $0xf8] sm:$0xff]  ;;  %v2827_v57 = vld [vmem:[#allocation8 + $0x1b0] sm:$0xff] }
 0x7c3   :  { %v6782_v2 = vpack.c.bf16 %v2804_v36, %v2800_v13  ;;  %v6824_v8 = vpack.c.bf16 %v2827_v57, %v2823_v42  ;;  %v2830_v13 = vld [vmem:[#allocation8 + $0x1c8] sm:$0xff] }
 0x7c4   :  { %v2834_v36 = vld [vmem:[#allocation8 + $0x1e8] sm:$0xff] }
 0x7c5   :  { %5168 = vmatpush1.bf16.msra.mxu0 %v5167_v45  ;;  %5200 = vmatpush1.bf16.msra.mxu1 %v5199_v1  ;;  %v6787_v45 = vpack.c.bf16 %v2803_v31, %v2799_v15  ;;  %v2806_v1 = vld [vmem:[#allocation8 + $0x108] sm:$0xff]  ;;  %v6828_v53 = vpack.c.bf16 %v2834_v36, %v2830_v13  ;;  %v2836_v15 = vld [vmem:[#allocation8 + $0x1f8] sm:$0xff]  ;;  %v2829_v31 = vld [vmem:[#allocation8 + $0x1c0] sm:$0xff] }
 0x7c6   :  { %5170 = vmatprep.subr.bf16.mxu0 %v5169_v11  ;;  %5202 = vmatprep.subr.bf16.mxu1 %v5201_v6  ;;  %v2808_v11 = vld [vmem:[#allocation8 + $0x118] sm:$0xff]  ;;  %v6792_v6 = vpack.c.bf16 %v2810_v16, %v2806_v1  ;;  %v2833_v1 = vld [vmem:[#allocation8 + $0x1e0] sm:$0xff]  ;;  %v6830_v16 = vpack.c.bf16 %v2836_v15, %v2832_v48  ;;  %v6852_v15 = vrot.slane %v2509_v29, %v7304_v34 }
 0x7c9   :  { %5172 = vmatpush1.bf16.msra.mxu0 %v5171_v3  ;;  %5204 = vmatpush1.bf16.msra.mxu1 %v5203_v7  ;;  %v6794_v3 = vpack.c.bf16 %v2812_v18, %v2808_v11  ;;  %v6796_v7 = vpack.c.bf16 %v2809_v41, %v2805_v5  ;;  %v6832_v11 = vpack.c.bf16 %v2833_v1, %v2829_v31  ;;  %v2831_v18 = vld [vmem:[#allocation8 + $0x1d0] sm:$0xff]  ;;  %v7305_v31 = vsub.s32 2, %v6387_v63 }
 0x7ca   :  { %5206 = vmatprep.subr.bf16.mxu0 %v6744_v4  ;;  %5238 = vmatprep.subr.bf16.mxu1 %v6746_v22  ;;  %v2835_v5 = vld [vmem:[#allocation8 + $0x1f0] sm:$0xff] }
 0x7cb   :  { %v6835_v41 = vpack.c.bf16 %v2835_v5, %v2831_v18  ;;  %v6856_v1 = vrot.slane %v2509_v29, %v7305_v31  ;;  %v7306_v18 = vsub.s32 1, %v6387_v63 }
 0x7cc   :  { %2596 = vmatmul.mubr.f32.vlgmr.msra.gmra.mrb[16].mxu0 %v2443_v9  ;;  %2673 = vmatmul.mubr.f32.vlgmr.msra.gmra.mrb[24].mxu1 %v2443_v9  ;;  %v2807_v9 = vld [vmem:[#allocation8 + $0x110] sm:$0xff] }
 0x7cd   :  { %2601 = vmatprep.mubr.f32.mxu0 %v6106_v0  ;;  %2678 = vmatprep.mubr.f32.mxu1 %v6106_v0  ;;  %v6799_v32 = vpack.c.bf16 %v2811_v28, %v2807_v9  ;;  %v6860_v5 = vrot.slane %v2509_v29, %v7306_v18 }
 0x7ce   :  { %5208 = vmatpush1.bf16.msra.mxu0 %v6748_v61  ;;  %5240 = vmatpush1.bf16.msra.mxu1 %v6751_v54 }
 0x7cf   :  { %5210 = vmatprep.subr.bf16.mxu0 %v6756_v30  ;;  %5242 = vmatprep.subr.bf16.mxu1 %v6758_v55 }
 0x7d2   :  { %5212 = vmatpush1.bf16.msra.mxu0 %v6760_v44  ;;  %5244 = vmatpush1.bf16.msra.mxu1 %v6763_v50 }
 0x7d3   :  { %5214 = vmatprep.subr.bf16.mxu0 %v6768_v51  ;;  %5246 = vmatprep.subr.bf16.mxu1 %v6770_v25 }
 0x7d6   :  { %5216 = vmatpush1.bf16.msra.mxu0 %v6772_v33  ;;  %5248 = vmatpush1.bf16.msra.mxu1 %v6775_v49 }
 0x7d7   :  { %5218 = vmatprep.subr.bf16.mxu0 %v6780_v38  ;;  %5250 = vmatprep.subr.bf16.mxu1 %v6782_v2 }
 0x7da   :  { %5220 = vmatpush1.bf16.msra.mxu0 %v6784_v14  ;;  %5252 = vmatpush1.bf16.msra.mxu1 %v6787_v45 }
 0x7db   :  { %5222 = vmatprep.subr.bf16.mxu0 %v6792_v6  ;;  %5254 = vmatprep.subr.bf16.mxu1 %v6794_v3 }
 0x7de   :  { %5224 = vmatpush1.bf16.msra.mxu0 %v6796_v7  ;;  %5256 = vmatpush1.bf16.msra.mxu1 %v6799_v32 }
 0x7df   :  { %5226 = vmatprep.subr.bf16.mxu0 %v6804_v62  ;;  %5258 = vmatprep.subr.bf16.mxu1 %v6806_v60 }
 0x7e2   :  { %5228 = vmatpush1.bf16.msra.mxu0 %v6808_v24  ;;  %5260 = vmatpush1.bf16.msra.mxu1 %v6811_v10 }
 0x7e3   :  { %5230 = vmatprep.subr.bf16.mxu0 %v6815_v35  ;;  %5262 = vmatprep.subr.bf16.mxu1 %v6817_v59 }
 0x7e6   :  { %5232 = vmatpush1.bf16.msra.mxu0 %v6820_v40  ;;  %5264 = vmatpush1.bf16.msra.mxu1 %v6824_v8 }
 0x7e7   :  { %5234 = vmatprep.subr.bf16.mxu0 %v6828_v53  ;;  %5266 = vmatprep.subr.bf16.mxu1 %v6830_v16 }
 0x7ea   :  { %5236 = vmatpush1.bf16.msra.mxu0 %v6832_v11  ;;  %5268 = vmatpush1.bf16.msra.mxu1 %v6835_v41 }
 0x7eb   :  { %5270 = vmatprep.subr.bf16.mxu0 %v6744_v4  ;;  %5302 = vmatprep.subr.bf16.mxu1 %v6746_v22 }
 0x87f   :  { %v2312_v9 = vpop.f32.mrb[14].mxu0  ;;  %v2383_v28 = vpop.f32.mrb[22].mxu1 }
 0x880   :  { %v2314_v37 = vpop.f32.mrb[15].mxu0  ;;  %v2385_v17 = vpop.f32.mrb[23].mxu1 }
 0x881   :  { %v2392_v52 = vcombine.low %v2312_v9, %v2314_v37  ;;  %v2393_v46 = vcombine.low %v2383_v28, %v2385_v17  ;;  %v7307_v9 = vsub.s32 3, %v6387_v63 }
 0x883   :  { %v2400_v19 = vrot.slane %v2392_v52, %v6405_v47  ;;  %v2407_v58 = vrot.slane %v2393_v46, %v6405_v47  ;;  %v6864_v28 = vrot.slane %v2509_v29, %v7307_v9 }
 0x885   :  { %v2408_v43 = vcombine.low %v2400_v19, %v2407_v58 }
 0x887   :  { %v2410_v39 = vadd.f32 %v2408_v43, %v7303_v27 }
 0x889   :  { %v4541_v23 = vmul.f32 -1.442695, %v2410_v39  ;;  %v2418_v56 = vrot.slane %v2410_v39, 2  ;;  %v2429_v21 = vrot.slane %v2410_v39, 6  ;;  %v2426_v57 = vrot.slane %v2410_v39, 4 }
 0x88b   :  { %5863 = vpow2.f32 %v4541_v23  ;;  %v4542_v26 = vmul.f32 -1.442695, %v2418_v56  ;;  %v4543_v12 = vmul.f32 -1.442695, %v2429_v21 }
 0x88d   :  { %5865 = vpow2.f32 %v4542_v26 }
 0x88e   :  { %5867 = vpow2.f32 %v4543_v12 }
 0x895   :  { %v5864_v42 = vpop.eup %5863 }
 0x896   :  { %v2414_v13 = vadd.f32 1.0, %v5864_v42 }
 0x897   :  { %v5866_v36 = vpop.eup %5865 }
 0x898   :  { %5869 = vrcp.f32 %v2414_v13  ;;  %v2423_v48 = vadd.f32 1.0, %v5866_v36  ;;  %v5868_v43 = vpop.eup %5867 }
 0x899   :  { %5871 = vtanh.f32 %v2426_v57  ;;  %v2434_v42 = vadd.f32 1.0, %v5868_v43 }
 0x89a   :  { %5873 = vrcp.f32 %v2423_v48 }
 0x89b   :  { %5875 = vrcp.f32 %v2434_v42 }
 0x89f   :  { %v2597_v37 = vpop.f32.mrb[16].mxu0  ;;  %v2674_v17 = vpop.f32.mrb[24].mxu1 }
 0x8a0   :  { %v2598_v52 = vadd.f32 %v2597_v37, %v6852_v15  ;;  %v2675_v46 = vadd.f32 %v2674_v17, %v6856_v1  ;;  %v2599_v19 = vpop.f32.mrb[17].mxu0  ;;  %v2676_v58 = vpop.f32.mrb[25].mxu1 }
 0x8a1   :  { %v2600_v27 = vadd.f32 %v2599_v19, %v6860_v5  ;;  %v2677_v39 = vadd.f32 %v2676_v58, %v6864_v28 }
 0x8a2   :  { %v5870_v23 = vpop.eup %5869 }
 0x8a3   :  { %v5872_v56 = vpop.eup %5871  ;;  %v2693_v26 = vcombine.low %v2598_v52, %v2600_v27  ;;  %v2694_v21 = vcombine.high %v2598_v52, %v2600_v27  ;;  %v2695_v63 = vcombine.low %v2675_v46, %v2677_v39  ;;  %v2696_v13 = vcombine.high %v2675_v46, %v2677_v39 }
 0x8a4   :  { %v5874_v12 = vpop.eup %5873  ;;  %v2438_v57 = vmul.f32 %v5872_v56, %v5870_v23 }
 0x8a5   :  { %v2437_v36 = vmul.f32 %v5874_v12, %v6737_v20  ;;  %v6872_v48 = vrot.slane %v2693_v26, %v6405_v47  ;;  %v6875_v29 = vrot.slane %v2694_v21, %v6405_v47  ;;  %v6878_v34 = vrot.slane %v2695_v63, %v6405_v47  ;;  %v5876_v52 = vpop.eup %5875 }
 0x8a6   :  { %v6881_v31 = vrot.slane %v2696_v13, %v6405_v47 }
 0x8a7   :  { %v2439_v18 = vadd.f32 %v2438_v57, %v2437_v36  ;;  %v2725_v9 = vcombine.low %v6872_v48, %v6878_v34  ;;  %v2726_v37 = vcombine.high %v6872_v48, %v6878_v34 }
 0x8a8   :  { %v2727_v20 = vcombine.low %v6875_v29, %v6881_v31  ;;  %v2728_v17 = vcombine.high %v6875_v29, %v6881_v31 }
 0x8a9   :  { %5877 = vtanh.f32 %v2439_v18 }
 0x8b3   :  { %v5878_v46 = vpop.eup %5877 }
 0x8b4   :  { %v2441_v19 = vmul.f32 %v5878_v46, %v5876_v52 }
 0x8b6   :  { %2442 = vst [vmem:[#allocation2 + $0xe] sm:$0x3] %v2441_v19 }
 0x8bd   :  { %v2444_v58 = vld [vmem:[#allocation2 + $0x8] sm:$0xff] }
 0x8be   :  { %2602 = vmatmul.mubr.f32.gmra.mrb[18].mxu0 %v2444_v58  ;;  %2679 = vmatmul.mubr.f32.gmra.mrb[26].mxu1 %v2444_v58 }
 0x8bf   :  { %2901 = vmatprep.mubr.f32.mxu0 %v6106_v0  ;;  %2972 = vmatprep.mubr.f32.mxu1 %v6106_v0 }
 0x8c2   :  { %2902 = vmatmul.mubr.f32.vlgmr.msra.gmra.mrb[20].mxu0 %v6106_v0  ;;  %2973 = vmatmul.mubr.f32.vlgmr.msra.gmra.mrb[28].mxu1 %v6106_v0 }
 0x8c3   :  { %5272 = vmatpush1.bf16.msra.mxu0 %v6748_v61  ;;  %5304 = vmatpush1.bf16.msra.mxu1 %v6751_v54 }
 0x8c4   :  { %5274 = vmatprep.subr.bf16.mxu0 %v6756_v30  ;;  %5306 = vmatprep.subr.bf16.mxu1 %v6758_v55 }
 0x8c5   :  { %3097 = vmatprep.mubr.f32.mxu0 %v6106_v0  ;;  %3168 = vmatprep.mubr.f32.mxu1 %v6106_v0 }
 0x8c7   :  { %5276 = vmatpush1.bf16.msra.mxu0 %v6760_v44  ;;  %5308 = vmatpush1.bf16.msra.mxu1 %v6763_v50 }
 0x8c8   :  { %5278 = vmatprep.subr.bf16.mxu0 %v6768_v51  ;;  %5310 = vmatprep.subr.bf16.mxu1 %v6770_v25 }
 0x8cb   :  { %5280 = vmatpush1.bf16.msra.mxu0 %v6772_v33  ;;  %5312 = vmatpush1.bf16.msra.mxu1 %v6775_v49 }
 0x8cc   :  { %5282 = vmatprep.subr.bf16.mxu0 %v6780_v38  ;;  %5314 = vmatprep.subr.bf16.mxu1 %v6782_v2 }
 0x8cf   :  { %5284 = vmatpush1.bf16.msra.mxu0 %v6784_v14  ;;  %5316 = vmatpush1.bf16.msra.mxu1 %v6787_v45 }
 0x8d0   :  { %5286 = vmatprep.subr.bf16.mxu0 %v6792_v6  ;;  %5318 = vmatprep.subr.bf16.mxu1 %v6794_v3 }
 0x8d3   :  { %5288 = vmatpush1.bf16.msra.mxu0 %v6796_v7  ;;  %5320 = vmatpush1.bf16.msra.mxu1 %v6799_v32 }
 0x8d4   :  { %5290 = vmatprep.subr.bf16.mxu0 %v6804_v62  ;;  %5322 = vmatprep.subr.bf16.mxu1 %v6806_v60 }
 0x8d7   :  { %5292 = vmatpush1.bf16.msra.mxu0 %v6808_v24  ;;  %5324 = vmatpush1.bf16.msra.mxu1 %v6811_v10 }
 0x8d8   :  { %5294 = vmatprep.subr.bf16.mxu0 %v6815_v35  ;;  %5326 = vmatprep.subr.bf16.mxu1 %v6817_v59 }
 0x8db   :  { %5296 = vmatpush1.bf16.msra.mxu0 %v6820_v40  ;;  %5328 = vmatpush1.bf16.msra.mxu1 %v6824_v8 }
 0x8dc   :  { %5298 = vmatprep.subr.bf16.mxu0 %v6828_v53  ;;  %5330 = vmatprep.subr.bf16.mxu1 %v6830_v16 }
 0x8df   :  { %5300 = vmatpush1.bf16.msra.mxu0 %v6832_v11  ;;  %5332 = vmatpush1.bf16.msra.mxu1 %v6835_v41 }
 0x8e0   :  { %5334 = vmatprep.subr.bf16.mxu0 %v6744_v4  ;;  %5366 = vmatprep.subr.bf16.mxu1 %v6746_v22 }
 0x991   :  { %v2603_v43 = vpop.f32.mrb[18].mxu0  ;;  %v2680_v27 = vpop.f32.mrb[26].mxu1 }
 0x992   :  { %v2604_v39 = vadd.f32 %v2603_v43, %v6852_v15  ;;  %v2681_v23 = vadd.f32 %v2680_v27, %v6856_v1  ;;  %v2605_v56 = vpop.f32.mrb[19].mxu0  ;;  %v2682_v26 = vpop.f32.mrb[27].mxu1 }
 0x993   :  { %v2606_v21 = vadd.f32 %v2605_v56, %v6860_v5  ;;  %v2683_v63 = vadd.f32 %v2682_v26, %v6864_v28 }
 0x995   :  { %v2729_v12 = vcombine.low %v2604_v39, %v2606_v21  ;;  %v2730_v42 = vcombine.high %v2604_v39, %v2606_v21  ;;  %v2731_v57 = vcombine.low %v2681_v23, %v2683_v63  ;;  %v2732_v13 = vcombine.high %v2681_v23, %v2683_v63  ;;  %v2903_v36 = vpop.f32.mrb[20].mxu0  ;;  %v2974_v18 = vpop.f32.mrb[28].mxu1 }
 0x996   :  { %v2905_v52 = vpop.f32.mrb[21].mxu0  ;;  %v2976_v46 = vpop.f32.mrb[29].mxu1 }
 0x997   :  { %v6934_v19 = vrot.slane %v2729_v12, %v6405_v47  ;;  %v6937_v15 = vrot.slane %v2730_v42, %v6405_v47  ;;  %v6940_v1 = vrot.slane %v2731_v57, %v6405_v47  ;;  %v6943_v5 = vrot.slane %v2732_v13, %v6405_v47 }
 0x998   :  { %v2983_v28 = vcombine.low %v2903_v36, %v2905_v52  ;;  %v2984_v58 = vcombine.low %v2974_v18, %v2976_v46 }
 0x999   :  { %v2761_v43 = vcombine.low %v6934_v19, %v6940_v1 }
 0x99a   :  { %v2991_v56 = vrot.slane %v2983_v28, %v6405_v47  ;;  %v2998_v26 = vrot.slane %v2984_v58, %v6405_v47 }
 0x99c   :  { %v2999_v21 = vcombine.low %v2991_v56, %v2998_v26 }
 0x99e   :  { %v3001_v63 = vadd.f32 %v2999_v21, %v2725_v9 }
 0x9a0   :  { %v4544_v12 = vmul.f32 -1.442695, %v3001_v63  ;;  %v3009_v42 = vrot.slane %v3001_v63, 2  ;;  %v3020_v13 = vrot.slane %v3001_v63, 6  ;;  %v3017_v52 = vrot.slane %v3001_v63, 4 }
 0x9a2   :  { %5879 = vpow2.f32 %v4544_v12  ;;  %v4545_v57 = vmul.f32 -1.442695, %v3009_v42  ;;  %v4546_v36 = vmul.f32 -1.442695, %v3020_v13 }
 0x9a4   :  { %5881 = vpow2.f32 %v4545_v57 }
 0x9a5   :  { %5883 = vpow2.f32 %v4546_v36 }
 0x9ac   :  { %v5880_v18 = vpop.eup %5879 }
 0x9ad   :  { %v3005_v46 = vadd.f32 1.0, %v5880_v18 }
 0x9ae   :  { %v5882_v23 = vpop.eup %5881 }
 0x9af   :  { %5885 = vrcp.f32 %v3005_v46  ;;  %v3014_v28 = vadd.f32 1.0, %v5882_v23  ;;  %v5884_v58 = vpop.eup %5883 }
 0x9b0   :  { %5887 = vtanh.f32 %v3017_v52  ;;  %v3025_v21 = vadd.f32 1.0, %v5884_v58 }
 0x9b1   :  { %5889 = vrcp.f32 %v3014_v28 }
 0x9b2   :  { %5891 = vrcp.f32 %v3025_v21 }
 0x9b9   :  { %v5886_v56 = vpop.eup %5885 }
 0x9ba   :  { %v5888_v26 = vpop.eup %5887 }
 0x9bb   :  { %v5890_v9 = vpop.eup %5889  ;;  %v3029_v12 = vmul.f32 %v5888_v26, %v5886_v56 }
 0x9bc   :  { %v3028_v39 = vmul.f32 0.0, %v5890_v9  ;;  %v5892_v63 = vpop.eup %5891 }
 0x9be   :  { %v6958_v42 = vadd.f32 %v3029_v12, %v3028_v39 }
 0x9c0   :  { %5893 = vtanh.f32 %v6958_v42 }
 0x9ca   :  { %v5894_v57 = vpop.eup %5893 }
 0x9cb   :  { %v3032_v13 = vmul.f32 %v5894_v57, %v5892_v63 }
 0x9cd   :  { %3098 = vmatmul.mubr.f32.vlgmr.msra.gmra.mrb[22].mxu0 %v3032_v13  ;;  %3169 = vmatmul.mubr.f32.vlgmr.msra.gmra.mrb[30].mxu1 %v3032_v13 }
 0x9ce   :  { %5336 = vmatpush1.bf16.msra.mxu0 %v6748_v61  ;;  %5368 = vmatpush1.bf16.msra.mxu1 %v6751_v54 }
 0x9cf   :  { %5338 = vmatprep.subr.bf16.mxu0 %v6756_v30  ;;  %5370 = vmatprep.subr.bf16.mxu1 %v6758_v55 }
 0x9d0   :  { %3293 = vmatprep.mubr.f32.mxu0 %v6106_v0  ;;  %3364 = vmatprep.mubr.f32.mxu1 %v6106_v0 }
 0x9d2   :  { %5340 = vmatpush1.bf16.msra.mxu0 %v6760_v44  ;;  %5372 = vmatpush1.bf16.msra.mxu1 %v6763_v50 }
 0x9d3   :  { %5342 = vmatprep.subr.bf16.mxu0 %v6768_v51  ;;  %5374 = vmatprep.subr.bf16.mxu1 %v6770_v25 }
 0x9d6   :  { %5344 = vmatpush1.bf16.msra.mxu0 %v6772_v33  ;;  %5376 = vmatpush1.bf16.msra.mxu1 %v6775_v49 }
 0x9d7   :  { %5346 = vmatprep.subr.bf16.mxu0 %v6780_v38  ;;  %5378 = vmatprep.subr.bf16.mxu1 %v6782_v2 }
 0x9da   :  { %5348 = vmatpush1.bf16.msra.mxu0 %v6784_v14  ;;  %5380 = vmatpush1.bf16.msra.mxu1 %v6787_v45 }
 0x9db   :  { %5350 = vmatprep.subr.bf16.mxu0 %v6792_v6  ;;  %5382 = vmatprep.subr.bf16.mxu1 %v6794_v3 }
 0x9de   :  { %5352 = vmatpush1.bf16.msra.mxu0 %v6796_v7  ;;  %5384 = vmatpush1.bf16.msra.mxu1 %v6799_v32 }
 0x9df   :  { %5354 = vmatprep.subr.bf16.mxu0 %v6804_v62  ;;  %5386 = vmatprep.subr.bf16.mxu1 %v6806_v60 }
 0x9e2   :  { %5356 = vmatpush1.bf16.msra.mxu0 %v6808_v24  ;;  %5388 = vmatpush1.bf16.msra.mxu1 %v6811_v10 }
 0x9e3   :  { %5358 = vmatprep.subr.bf16.mxu0 %v6815_v35  ;;  %5390 = vmatprep.subr.bf16.mxu1 %v6817_v59 }
 0x9e6   :  { %5360 = vmatpush1.bf16.msra.mxu0 %v6820_v40  ;;  %5392 = vmatpush1.bf16.msra.mxu1 %v6824_v8 }
 0x9e7   :  { %5362 = vmatprep.subr.bf16.mxu0 %v6828_v53  ;;  %5394 = vmatprep.subr.bf16.mxu1 %v6830_v16 }
 0x9ea   :  { %5364 = vmatpush1.bf16.msra.mxu0 %v6832_v11  ;;  %5396 = vmatpush1.bf16.msra.mxu1 %v6835_v41 }
 0x9eb   :  { %5398 = vmatprep.subr.bf16.mxu0 %v6744_v4  ;;  %5430 = vmatprep.subr.bf16.mxu1 %v6746_v22 }
 0xaa0   :  { %v3099_v39 = vpop.f32.mrb[22].mxu0  ;;  %v3170_v23 = vpop.f32.mrb[30].mxu1 }
 0xaa1   :  { %v3101_v36 = vpop.f32.mrb[23].mxu0  ;;  %v3172_v18 = vpop.f32.mrb[31].mxu1 }
 0xaa2   :  { %v3179_v52 = vcombine.low %v3099_v39, %v3101_v36  ;;  %v3180_v46 = vcombine.low %v3170_v23, %v3172_v18 }
 0xaa4   :  { %v3187_v28 = vrot.slane %v3179_v52, %v6405_v47  ;;  %v3194_v58 = vrot.slane %v3180_v46, %v6405_v47 }
 0xaa6   :  { %v3195_v56 = vcombine.low %v3187_v28, %v3194_v58 }
 0xaa8   :  { %v3197_v26 = vadd.f32 %v3195_v56, %v2726_v37 }
 0xaaa   :  { %v4547_v9 = vmul.f32 -1.442695, %v3197_v26  ;;  %v3205_v21 = vrot.slane %v3197_v26, 2  ;;  %v3216_v63 = vrot.slane %v3197_v26, 6  ;;  %v3213_v27 = vrot.slane %v3197_v26, 4 }
 0xaac   :  { %5895 = vpow2.f32 %v4547_v9  ;;  %v4548_v12 = vmul.f32 -1.442695, %v3205_v21  ;;  %v4549_v57 = vmul.f32 -1.442695, %v3216_v63 }
 0xaae   :  { %5897 = vpow2.f32 %v4548_v12 }
 0xaaf   :  { %5899 = vpow2.f32 %v4549_v57 }
 0xab6   :  { %v5896_v13 = vpop.eup %5895 }
 0xab7   :  { %v3201_v39 = vadd.f32 1.0, %v5896_v13 }
 0xab8   :  { %v5898_v23 = vpop.eup %5897 }
 0xab9   :  { %5901 = vrcp.f32 %v3201_v39  ;;  %v3210_v36 = vadd.f32 1.0, %v5898_v23  ;;  %v5900_v18 = vpop.eup %5899 }
 0xaba   :  { %5903 = vtanh.f32 %v3213_v27  ;;  %v3221_v37 = vadd.f32 1.0, %v5900_v18 }
 0xabb   :  { %5905 = vrcp.f32 %v3210_v36 }
 0xabc   :  { %5907 = vrcp.f32 %v3221_v37 }
 0xac3   :  { %v5902_v52 = vpop.eup %5901 }
 0xac4   :  { %v5904_v48 = vpop.eup %5903 }
 0xac5   :  { %v5906_v34 = vpop.eup %5905  ;;  %v3225_v28 = vmul.f32 %v5904_v48, %v5902_v52 }
 0xac6   :  { %v3224_v46 = vmul.f32 %v5906_v34, %v6958_v42  ;;  %v5908_v56 = vpop.eup %5907 }
 0xac8   :  { %v7001_v58 = vadd.f32 %v3225_v28, %v3224_v46 }
 0xaca   :  { %5909 = vtanh.f32 %v7001_v58 }
 0xad4   :  { %v5910_v26 = vpop.eup %5909 }
 0xad5   :  { %v3228_v9 = vmul.f32 %v5910_v26, %v5908_v56 }
 0xad7   :  { %3294 = vmatmul.mubr.f32.vlgmr.msra.gmra.mrb[24].mxu0 %v3228_v9  ;;  %3365 = vmatmul.mubr.f32.vlgmr.msra.gmra.mrb[32].mxu1 %v3228_v9 }
 0xad8   :  { %5400 = vmatpush1.bf16.msra.mxu0 %v6748_v61  ;;  %5432 = vmatpush1.bf16.msra.mxu1 %v6751_v54 }
 0xad9   :  { %5402 = vmatprep.subr.bf16.mxu0 %v6756_v30  ;;  %5434 = vmatprep.subr.bf16.mxu1 %v6758_v55 }
 0xada   :  { %3489 = vmatprep.mubr.f32.mxu0 %v6106_v0  ;;  %3560 = vmatprep.mubr.f32.mxu1 %v6106_v0 }
 0xadc   :  { %5404 = vmatpush1.bf16.msra.mxu0 %v6760_v44  ;;  %5436 = vmatpush1.bf16.msra.mxu1 %v6763_v50 }
 0xadd   :  { %5406 = vmatprep.subr.bf16.mxu0 %v6768_v51  ;;  %5438 = vmatprep.subr.bf16.mxu1 %v6770_v25 }
 0xae0   :  { %5408 = vmatpush1.bf16.msra.mxu0 %v6772_v33  ;;  %5440 = vmatpush1.bf16.msra.mxu1 %v6775_v49 }
 0xae1   :  { %5410 = vmatprep.subr.bf16.mxu0 %v6780_v38  ;;  %5442 = vmatprep.subr.bf16.mxu1 %v6782_v2 }
 0xae4   :  { %5412 = vmatpush1.bf16.msra.mxu0 %v6784_v14  ;;  %5444 = vmatpush1.bf16.msra.mxu1 %v6787_v45 }
 0xae5   :  { %5414 = vmatprep.subr.bf16.mxu0 %v6792_v6  ;;  %5446 = vmatprep.subr.bf16.mxu1 %v6794_v3 }
 0xae8   :  { %5416 = vmatpush1.bf16.msra.mxu0 %v6796_v7  ;;  %5448 = vmatpush1.bf16.msra.mxu1 %v6799_v32 }
 0xae9   :  { %5418 = vmatprep.subr.bf16.mxu0 %v6804_v62  ;;  %5450 = vmatprep.subr.bf16.mxu1 %v6806_v60 }
 0xaec   :  { %5420 = vmatpush1.bf16.msra.mxu0 %v6808_v24  ;;  %5452 = vmatpush1.bf16.msra.mxu1 %v6811_v10 }
 0xaed   :  { %5422 = vmatprep.subr.bf16.mxu0 %v6815_v35  ;;  %5454 = vmatprep.subr.bf16.mxu1 %v6817_v59 }
 0xaf0   :  { %5424 = vmatpush1.bf16.msra.mxu0 %v6820_v40  ;;  %5456 = vmatpush1.bf16.msra.mxu1 %v6824_v8 }
 0xaf1   :  { %5426 = vmatprep.subr.bf16.mxu0 %v6828_v53  ;;  %5458 = vmatprep.subr.bf16.mxu1 %v6830_v16 }
 0xaf4   :  { %5428 = vmatpush1.bf16.msra.mxu0 %v6832_v11  ;;  %5460 = vmatpush1.bf16.msra.mxu1 %v6835_v41 }
 0xaf5   :  { %5462 = vmatprep.subr.bf16.mxu0 %v6744_v4  ;;  %5494 = vmatprep.subr.bf16.mxu1 %v6746_v22 }
 0xbaa   :  { %v3295_v27 = vpop.f32.mrb[24].mxu0  ;;  %v3366_v42 = vpop.f32.mrb[32].mxu1 }
 0xbab   :  { %v3297_v21 = vpop.f32.mrb[25].mxu0  ;;  %v3368_v12 = vpop.f32.mrb[33].mxu1 }
 0xbac   :  { %v3375_v63 = vcombine.low %v3295_v27, %v3297_v21  ;;  %v3376_v57 = vcombine.low %v3366_v42, %v3368_v12 }
 0xbae   :  { %v3383_v13 = vrot.slane %v3375_v63, %v6405_v47  ;;  %v3390_v39 = vrot.slane %v3376_v57, %v6405_v47 }
 0xbb0   :  { %v3391_v23 = vcombine.low %v3383_v13, %v3390_v39 }
 0xbb2   :  { %v3393_v36 = vadd.f32 %v3391_v23, %v2727_v20 }
 0xbb4   :  { %v4550_v18 = vmul.f32 -1.442695, %v3393_v36  ;;  %v3401_v52 = vrot.slane %v3393_v36, 2  ;;  %v3412_v34 = vrot.slane %v3393_v36, 6  ;;  %v3409_v28 = vrot.slane %v3393_v36, 4 }
 0xbb6   :  { %5911 = vpow2.f32 %v4550_v18  ;;  %v4551_v48 = vmul.f32 -1.442695, %v3401_v52  ;;  %v4552_v37 = vmul.f32 -1.442695, %v3412_v34 }
 0xbb8   :  { %5913 = vpow2.f32 %v4551_v48 }
 0xbb9   :  { %5915 = vpow2.f32 %v4552_v37 }
 0xbc0   :  { %v5912_v46 = vpop.eup %5911 }
 0xbc1   :  { %v3397_v56 = vadd.f32 1.0, %v5912_v46 }
 0xbc2   :  { %v5914_v26 = vpop.eup %5913 }
 0xbc3   :  { %5917 = vrcp.f32 %v3397_v56  ;;  %v3406_v9 = vadd.f32 1.0, %v5914_v26  ;;  %v5916_v27 = vpop.eup %5915 }
 0xbc4   :  { %5919 = vtanh.f32 %v3409_v28  ;;  %v3417_v12 = vadd.f32 1.0, %v5916_v27 }
 0xbc5   :  { %5921 = vrcp.f32 %v3406_v9 }
 0xbc6   :  { %5923 = vrcp.f32 %v3417_v12 }
 0xbcd   :  { %v5918_v42 = vpop.eup %5917 }
 0xbce   :  { %v5920_v21 = vpop.eup %5919 }
 0xbcf   :  { %v5922_v20 = vpop.eup %5921  ;;  %v3421_v57 = vmul.f32 %v5920_v21, %v5918_v42 }
 0xbd0   :  { %v3420_v63 = vmul.f32 %v5922_v20, %v7001_v58  ;;  %v5924_v39 = vpop.eup %5923 }
 0xbd2   :  { %v7044_v13 = vadd.f32 %v3421_v57, %v3420_v63 }
 0xbd4   :  { %5925 = vtanh.f32 %v7044_v13 }
 0xbde   :  { %v5926_v23 = vpop.eup %5925 }
 0xbdf   :  { %v3424_v36 = vmul.f32 %v5926_v23, %v5924_v39 }
 0xbe1   :  { %3490 = vmatmul.mubr.f32.vlgmr.msra.gmra.mrb[26].mxu0 %v3424_v36  ;;  %3561 = vmatmul.mubr.f32.vlgmr.msra.gmra.mrb[34].mxu1 %v3424_v36 }
 0xbe2   :  { %5464 = vmatpush1.bf16.msra.mxu0 %v6748_v61  ;;  %5496 = vmatpush1.bf16.msra.mxu1 %v6751_v54 }
 0xbe3   :  { %5466 = vmatprep.subr.bf16.mxu0 %v6756_v30  ;;  %5498 = vmatprep.subr.bf16.mxu1 %v6758_v55 }
 0xbe4   :  { %3685 = vmatprep.mubr.f32.mxu0 %v6106_v0  ;;  %3756 = vmatprep.mubr.f32.mxu1 %v6106_v0 }
 0xbe6   :  { %5468 = vmatpush1.bf16.msra.mxu0 %v6760_v44  ;;  %5500 = vmatpush1.bf16.msra.mxu1 %v6763_v50 }
 0xbe7   :  { %5470 = vmatprep.subr.bf16.mxu0 %v6768_v51  ;;  %5502 = vmatprep.subr.bf16.mxu1 %v6770_v25 }
 0xbea   :  { %5472 = vmatpush1.bf16.msra.mxu0 %v6772_v33  ;;  %5504 = vmatpush1.bf16.msra.mxu1 %v6775_v49 }
 0xbeb   :  { %5474 = vmatprep.subr.bf16.mxu0 %v6780_v38  ;;  %5506 = vmatprep.subr.bf16.mxu1 %v6782_v2 }
 0xbee   :  { %5476 = vmatpush1.bf16.msra.mxu0 %v6784_v14  ;;  %5508 = vmatpush1.bf16.msra.mxu1 %v6787_v45 }
 0xbef   :  { %5478 = vmatprep.subr.bf16.mxu0 %v6792_v6  ;;  %5510 = vmatprep.subr.bf16.mxu1 %v6794_v3 }
 0xbf2   :  { %5480 = vmatpush1.bf16.msra.mxu0 %v6796_v7  ;;  %5512 = vmatpush1.bf16.msra.mxu1 %v6799_v32 }
 0xbf3   :  { %5482 = vmatprep.subr.bf16.mxu0 %v6804_v62  ;;  %5514 = vmatprep.subr.bf16.mxu1 %v6806_v60 }
 0xbf6   :  { %5484 = vmatpush1.bf16.msra.mxu0 %v6808_v24  ;;  %5516 = vmatpush1.bf16.msra.mxu1 %v6811_v10 }
 0xbf7   :  { %5486 = vmatprep.subr.bf16.mxu0 %v6815_v35  ;;  %5518 = vmatprep.subr.bf16.mxu1 %v6817_v59 }
 0xbfa   :  { %5488 = vmatpush1.bf16.msra.mxu0 %v6820_v40  ;;  %5520 = vmatpush1.bf16.msra.mxu1 %v6824_v8 }
 0xbfb   :  { %5490 = vmatprep.subr.bf16.mxu0 %v6828_v53  ;;  %5522 = vmatprep.subr.bf16.mxu1 %v6830_v16 }
 0xbfe   :  { %5492 = vmatpush1.bf16.msra.mxu0 %v6832_v11  ;;  %5524 = vmatpush1.bf16.msra.mxu1 %v6835_v41 }
 0xbff   :  { %5526 = vmatprep.subr.bf16.mxu0 %v6744_v4  ;;  %5558 = vmatprep.subr.bf16.mxu1 %v6746_v22 }
 0xcb4   :  { %v3491_v58 = vpop.f32.mrb[26].mxu0  ;;  %v3562_v18 = vpop.f32.mrb[34].mxu1 }
 0xcb5   :  { %v3493_v52 = vpop.f32.mrb[27].mxu0  ;;  %v3564_v48 = vpop.f32.mrb[35].mxu1 }
 0xcb6   :  { %v3571_v34 = vcombine.low %v3491_v58, %v3493_v52  ;;  %v3572_v37 = vcombine.low %v3562_v18, %v3564_v48 }
 0xcb8   :  { %v3579_v46 = vrot.slane %v3571_v34, %v6405_v47  ;;  %v3586_v28 = vrot.slane %v3572_v37, %v6405_v47 }
 0xcba   :  { %v3587_v56 = vcombine.low %v3579_v46, %v3586_v28 }
 0xcbc   :  { %v3589_v26 = vadd.f32 %v3587_v56, %v2728_v17 }
 0xcbe   :  { %v4553_v9 = vmul.f32 -1.442695, %v3589_v26  ;;  %v3597_v27 = vrot.slane %v3589_v26, 2  ;;  %v3608_v21 = vrot.slane %v3589_v26, 6  ;;  %v3605_v63 = vrot.slane %v3589_v26, 4 }
 0xcc0   :  { %5927 = vpow2.f32 %v4553_v9  ;;  %v4554_v42 = vmul.f32 -1.442695, %v3597_v27  ;;  %v4555_v20 = vmul.f32 -1.442695, %v3608_v21 }
 0xcc2   :  { %5929 = vpow2.f32 %v4554_v42 }
 0xcc3   :  { %5931 = vpow2.f32 %v4555_v20 }
 0xcca   :  { %v5928_v12 = vpop.eup %5927 }
 0xccb   :  { %v3593_v57 = vadd.f32 1.0, %v5928_v12 }
 0xccc   :  { %v5930_v39 = vpop.eup %5929 }
 0xccd   :  { %5933 = vrcp.f32 %v3593_v57  ;;  %v3602_v23 = vadd.f32 1.0, %v5930_v39  ;;  %v5932_v36 = vpop.eup %5931 }
 0xcce   :  { %5935 = vtanh.f32 %v3605_v63  ;;  %v3613_v17 = vadd.f32 1.0, %v5932_v36 }
 0xccf   :  { %5937 = vrcp.f32 %v3602_v23 }
 0xcd0   :  { %5939 = vrcp.f32 %v3613_v17 }
 0xcd7   :  { %v5934_v58 = vpop.eup %5933 }
 0xcd8   :  { %v5936_v29 = vpop.eup %5935 }
 0xcd9   :  { %v5938_v31 = vpop.eup %5937  ;;  %v3617_v52 = vmul.f32 %v5936_v29, %v5934_v58 }
 0xcda   :  { %v3616_v18 = vmul.f32 %v5938_v31, %v7044_v13  ;;  %v5940_v34 = vpop.eup %5939 }
 0xcdc   :  { %v7087_v48 = vadd.f32 %v3617_v52, %v3616_v18 }
 0xcde   :  { %5941 = vtanh.f32 %v7087_v48 }
 0xce8   :  { %v5942_v37 = vpop.eup %5941 }
 0xce9   :  { %v3620_v46 = vmul.f32 %v5942_v37, %v5940_v34 }
 0xceb   :  { %3686 = vmatmul.mubr.f32.vlgmr.msra.gmra.mrb[28].mxu0 %v3620_v46  ;;  %3757 = vmatmul.mubr.f32.vlgmr.msra.gmra.mrb[36].mxu1 %v3620_v46 }
 0xcec   :  { %5528 = vmatpush1.bf16.msra.mxu0 %v6748_v61  ;;  %5560 = vmatpush1.bf16.msra.mxu1 %v6751_v54 }
 0xced   :  { %5530 = vmatprep.subr.bf16.mxu0 %v6756_v30  ;;  %5562 = vmatprep.subr.bf16.mxu1 %v6758_v55 }
 0xcee   :  { %3881 = vmatprep.mubr.f32.mxu0 %v6106_v0  ;;  %3952 = vmatprep.mubr.f32.mxu1 %v6106_v0 }
 0xcf0   :  { %5532 = vmatpush1.bf16.msra.mxu0 %v6760_v44  ;;  %5564 = vmatpush1.bf16.msra.mxu1 %v6763_v50 }
 0xcf1   :  { %5534 = vmatprep.subr.bf16.mxu0 %v6768_v51  ;;  %5566 = vmatprep.subr.bf16.mxu1 %v6770_v25 }
 0xcf4   :  { %5536 = vmatpush1.bf16.msra.mxu0 %v6772_v33  ;;  %5568 = vmatpush1.bf16.msra.mxu1 %v6775_v49 }
 0xcf5   :  { %5538 = vmatprep.subr.bf16.mxu0 %v6780_v38  ;;  %5570 = vmatprep.subr.bf16.mxu1 %v6782_v2 }
 0xcf8   :  { %5540 = vmatpush1.bf16.msra.mxu0 %v6784_v14  ;;  %5572 = vmatpush1.bf16.msra.mxu1 %v6787_v45 }
 0xcf9   :  { %5542 = vmatprep.subr.bf16.mxu0 %v6792_v6  ;;  %5574 = vmatprep.subr.bf16.mxu1 %v6794_v3 }
 0xcfc   :  { %5544 = vmatpush1.bf16.msra.mxu0 %v6796_v7  ;;  %5576 = vmatpush1.bf16.msra.mxu1 %v6799_v32 }
 0xcfd   :  { %5546 = vmatprep.subr.bf16.mxu0 %v6804_v62  ;;  %5578 = vmatprep.subr.bf16.mxu1 %v6806_v60 }
 0xd00   :  { %5548 = vmatpush1.bf16.msra.mxu0 %v6808_v24  ;;  %5580 = vmatpush1.bf16.msra.mxu1 %v6811_v10 }
 0xd01   :  { %5550 = vmatprep.subr.bf16.mxu0 %v6815_v35  ;;  %5582 = vmatprep.subr.bf16.mxu1 %v6817_v59 }
 0xd04   :  { %5552 = vmatpush1.bf16.msra.mxu0 %v6820_v40  ;;  %5584 = vmatpush1.bf16.msra.mxu1 %v6824_v8 }
 0xd05   :  { %5554 = vmatprep.subr.bf16.mxu0 %v6828_v53  ;;  %5586 = vmatprep.subr.bf16.mxu1 %v6830_v16 }
 0xd08   :  { %5556 = vmatpush1.bf16.msra.mxu0 %v6832_v11  ;;  %5588 = vmatpush1.bf16.msra.mxu1 %v6835_v41 }
 0xd09   :  { %5590 = vmatprep.subr.bf16.mxu0 %v6744_v4  ;;  %5622 = vmatprep.subr.bf16.mxu1 %v6746_v22 }
 0xdbe   :  { %v3687_v13 = vpop.f32.mrb[28].mxu0  ;;  %v3758_v28 = vpop.f32.mrb[36].mxu1 }
 0xdbf   :  { %v3689_v56 = vpop.f32.mrb[29].mxu0  ;;  %v3760_v26 = vpop.f32.mrb[37].mxu1 }
 0xdc0   :  { %v3767_v9 = vcombine.low %v3687_v13, %v3689_v56  ;;  %v3768_v27 = vcombine.low %v3758_v28, %v3760_v26 }
 0xdc2   :  { %v3775_v42 = vrot.slane %v3767_v9, %v6405_v47  ;;  %v3782_v21 = vrot.slane %v3768_v27, %v6405_v47 }
 0xdc4   :  { %v3783_v20 = vcombine.low %v3775_v42, %v3782_v21 }
 0xdc6   :  { %v3785_v12 = vadd.f32 %v3783_v20, %v2761_v43 }
 0xdc8   :  { %v4556_v63 = vmul.f32 -1.442695, %v3785_v12  ;;  %v3793_v57 = vrot.slane %v3785_v12, 2  ;;  %v3804_v23 = vrot.slane %v3785_v12, 6  ;;  %v3801_v29 = vrot.slane %v3785_v12, 4 }
 0xdca   :  { %5943 = vpow2.f32 %v4556_v63  ;;  %v4557_v39 = vmul.f32 -1.442695, %v3793_v57  ;;  %v4558_v36 = vmul.f32 -1.442695, %v3804_v23 }
 0xdcc   :  { %5945 = vpow2.f32 %v4557_v39 }
 0xdcd   :  { %5947 = vpow2.f32 %v4558_v36  ;;  %v7308_v36 = vcombine.high %v6934_v19, %v6940_v1 }
 0xdd4   :  { %v5944_v58 = vpop.eup %5943 }
 0xdd5   :  { %v3789_v31 = vadd.f32 1.0, %v5944_v58 }
 0xdd6   :  { %v5946_v17 = vpop.eup %5945 }
 0xdd7   :  { %5949 = vrcp.f32 %v3789_v31  ;;  %v3798_v18 = vadd.f32 1.0, %v5946_v17  ;;  %v5948_v52 = vpop.eup %5947 }
 0xdd8   :  { %5951 = vtanh.f32 %v3801_v29  ;;  %v3809_v46 = vadd.f32 1.0, %v5948_v52 }
 0xdd9   :  { %5953 = vrcp.f32 %v3798_v18 }
 0xdda   :  { %5955 = vrcp.f32 %v3809_v46 }
 0xde1   :  { %v5950_v34 = vpop.eup %5949 }
 0xde2   :  { %v5952_v37 = vpop.eup %5951 }
 0xde3   :  { %v5954_v43 = vpop.eup %5953  ;;  %v3813_v28 = vmul.f32 %v5952_v37, %v5950_v34 }
 0xde4   :  { %v3812_v13 = vmul.f32 %v5954_v43, %v7087_v48  ;;  %v5956_v26 = vpop.eup %5955 }
 0xde6   :  { %v7130_v56 = vadd.f32 %v3813_v28, %v3812_v13 }
 0xde8   :  { %5957 = vtanh.f32 %v7130_v56 }
 0xdf2   :  { %v5958_v9 = vpop.eup %5957 }
 0xdf3   :  { %v3816_v27 = vmul.f32 %v5958_v9, %v5956_v26 }
 0xdf5   :  { %3882 = vmatmul.mubr.f32.vlgmr.msra.gmra.mrb[30].mxu0 %v3816_v27  ;;  %3953 = vmatmul.mubr.f32.vlgmr.msra.gmra.mrb[38].mxu1 %v3816_v27 }
 0xdf6   :  { %5592 = vmatpush1.bf16.msra.mxu0 %v6748_v61  ;;  %5624 = vmatpush1.bf16.msra.mxu1 %v6751_v54 }
 0xdf7   :  { %5594 = vmatprep.subr.bf16.mxu0 %v6756_v30  ;;  %5626 = vmatprep.subr.bf16.mxu1 %v6758_v55 }
 0xdf8   :  { %4077 = vmatprep.mubr.f32.mxu0 %v6106_v0  ;;  %4148 = vmatprep.mubr.f32.mxu1 %v6106_v0 }
 0xdfa   :  { %5596 = vmatpush1.bf16.msra.mxu0 %v6760_v44  ;;  %5628 = vmatpush1.bf16.msra.mxu1 %v6763_v50 }
 0xdfb   :  { %5598 = vmatprep.subr.bf16.mxu0 %v6768_v51  ;;  %5630 = vmatprep.subr.bf16.mxu1 %v6770_v25 }
 0xdfe   :  { %5600 = vmatpush1.bf16.msra.mxu0 %v6772_v33  ;;  %5632 = vmatpush1.bf16.msra.mxu1 %v6775_v49 }
 0xdff   :  { %5602 = vmatprep.subr.bf16.mxu0 %v6780_v38  ;;  %5634 = vmatprep.subr.bf16.mxu1 %v6782_v2 }
 0xe02   :  { %5604 = vmatpush1.bf16.msra.mxu0 %v6784_v14  ;;  %5636 = vmatpush1.bf16.msra.mxu1 %v6787_v45 }
 0xe03   :  { %5606 = vmatprep.subr.bf16.mxu0 %v6792_v6  ;;  %5638 = vmatprep.subr.bf16.mxu1 %v6794_v3 }
 0xe06   :  { %5608 = vmatpush1.bf16.msra.mxu0 %v6796_v7  ;;  %5640 = vmatpush1.bf16.msra.mxu1 %v6799_v32 }
 0xe07   :  { %5610 = vmatprep.subr.bf16.mxu0 %v6804_v62  ;;  %5642 = vmatprep.subr.bf16.mxu1 %v6806_v60 }
 0xe0a   :  { %5612 = vmatpush1.bf16.msra.mxu0 %v6808_v24  ;;  %5644 = vmatpush1.bf16.msra.mxu1 %v6811_v10 }
 0xe0b   :  { %5614 = vmatprep.subr.bf16.mxu0 %v6815_v35  ;;  %5646 = vmatprep.subr.bf16.mxu1 %v6817_v59 }
 0xe0e   :  { %5616 = vmatpush1.bf16.msra.mxu0 %v6820_v40  ;;  %5648 = vmatpush1.bf16.msra.mxu1 %v6824_v8 }
 0xe0f   :  { %5618 = vmatprep.subr.bf16.mxu0 %v6828_v53  ;;  %5650 = vmatprep.subr.bf16.mxu1 %v6830_v16 }
 0xe12   :  { %5620 = vmatpush1.bf16.msra.mxu0 %v6832_v11  ;;  %5652 = vmatpush1.bf16.msra.mxu1 %v6835_v41 }
 0xe13   :  { %5654 = vmatprep.subr.bf16.mxu0 %v6744_v4  ;;  %5686 = vmatprep.subr.bf16.mxu1 %v6746_v22 }
 0xec8   :  { %v3883_v48 = vpop.f32.mrb[30].mxu0  ;;  %v3954_v42 = vpop.f32.mrb[38].mxu1 }
 0xec9   :  { %v3885_v21 = vpop.f32.mrb[31].mxu0  ;;  %v3956_v20 = vpop.f32.mrb[39].mxu1 }
 0xeca   :  { %v3963_v12 = vcombine.low %v3883_v48, %v3885_v21  ;;  %v3964_v63 = vcombine.low %v3954_v42, %v3956_v20 }
 0xecc   :  { %v3971_v57 = vrot.slane %v3963_v12, %v6405_v47  ;;  %v3978_v39 = vrot.slane %v3964_v63, %v6405_v47  ;;  %v4405_v12 = vld [vmem:[%s7294_s7] sm:$0xff]  ;;  %v4406_v63 = vld [vmem:[%s7294_s7 + $0x8] sm:$0xff] }
 0xece   :  { %v3979_v23 = vcombine.low %v3971_v57, %v3978_v39  ;;  %v5718_v57 = vpack.c.bf16 %v4406_v63, %v4405_v12  ;;  %v6108_v39 = vmov 0.0|0.0  }
 0xed0   :  { %v3981_v58 = vadd.f32 %v3979_v23, %v7308_v36  ;;  %v4407_v23 = vld [vmem:[%s7294_s7 + $0x10] sm:$0xff]  ;;  %v4408_v36 = vld [vmem:[%s7294_s7 + $0x18] sm:$0xff] }
 0xed2   :  { %v4559_v29 = vmul.f32 -1.442695, %v3981_v58  ;;  %v3989_v31 = vrot.slane %v3981_v58, 2  ;;  %v4000_v22 = vrot.slane %v3981_v58, 6  ;;  %v3997_v52 = vrot.slane %v3981_v58, 4 }
 0xed3   :  { %v5721_v58 = vpack.c.bf16 %v4408_v36, %v4407_v23 }
 0xed4   :  { %5959 = vpow2.f32 %v4559_v29  ;;  %v4560_v4 = vmul.f32 -1.442695, %v3989_v31  ;;  %v4561_v17 = vmul.f32 -1.442695, %v4000_v22  ;;  %v4409_v29 = vld [vmem:[%s7294_s7 + $0x20] sm:$0xff]  ;;  %v4410_v31 = vld [vmem:[%s7294_s7 + $0x28] sm:$0xff] }
 0xed5   :  { %v4411_v22 = vld [vmem:[%s7294_s7 + $0x30] sm:$0xff] }
 0xed6   :  { %5961 = vpow2.f32 %v4560_v4  ;;  %v5724_v4 = vpack.c.bf16 %v4410_v31, %v4409_v29 }
 0xed7   :  { %5963 = vpow2.f32 %v4561_v17  ;;  %v4412_v17 = vld [vmem:[%s7294_s7 + $0x38] sm:$0xff] }
 0xede   :  { %v5960_v18 = vpop.eup %5959 }
 0xedf   :  { %v3985_v34 = vadd.f32 1.0, %v5960_v18  ;;  %v5727_v18 = vpack.c.bf16 %v4412_v17, %v4411_v22 }
 0xee0   :  { %v5962_v37 = vpop.eup %5961 }
 0xee1   :  { %5965 = vrcp.f32 %v3985_v34  ;;  %v3994_v43 = vadd.f32 1.0, %v5962_v37  ;;  %v5964_v46 = vpop.eup %5963  ;;  %v4415_v37 = vld [vmem:[%s7294_s7 + $0x50] sm:$0xff] }
 0xee2   :  { %5967 = vtanh.f32 %v3997_v52  ;;  %v4005_v28 = vadd.f32 1.0, %v5964_v46  ;;  %v4413_v52 = vld [vmem:[%s7294_s7 + $0x40] sm:$0xff] }
 0xee3   :  { %5969 = vrcp.f32 %v3994_v43  ;;  %v4416_v43 = vld [vmem:[%s7294_s7 + $0x58] sm:$0xff] }
 0xee4   :  { %5971 = vrcp.f32 %v4005_v28  ;;  %v5733_v46 = vpack.c.bf16 %v4416_v43, %v4415_v37  ;;  %v4419_v28 = vld [vmem:[%s7294_s7 + $0x70] sm:$0xff] }
 0xeeb   :  { %v5966_v13 = vpop.eup %5965 }
 0xeec   :  { %v5968_v19 = vpop.eup %5967 }
 0xeed   :  { %v5970_v1 = vpop.eup %5969  ;;  %v4009_v9 = vmul.f32 %v5968_v19, %v5966_v13  ;;  %v4417_v13 = vld [vmem:[%s7294_s7 + $0x60] sm:$0xff]  ;;  %v4418_v19 = vld [vmem:[%s7294_s7 + $0x68] sm:$0xff] }
 0xeee   :  { %v4008_v26 = vmul.f32 %v5970_v1, %v7130_v56  ;;  %v5972_v48 = vpop.eup %5971  ;;  %v5736_v1 = vpack.c.bf16 %v4418_v19, %v4417_v13 }
 0xef0   :  { %v7173_v27 = vadd.f32 %v4009_v9, %v4008_v26  ;;  %v4420_v26 = vld [vmem:[%s7294_s7 + $0x78] sm:$0xff] }
 0xef1   :  { %v5739_v9 = vpack.c.bf16 %v4420_v26, %v4419_v28 }
 0xef2   :  { %5973 = vtanh.f32 %v7173_v27 }
 0xefc   :  { %v5974_v42 = vpop.eup %5973 }
 0xefd   :  { %v4012_v21 = vmul.f32 %v5974_v42, %v5972_v48 }
 0xeff   :  { %4078 = vmatmul.mubr.f32.vlgmr.msra.gmra.mrb[32].mxu0 %v4012_v21  ;;  %4149 = vmatmul.mubr.f32.vlgmr.msra.gmra.mrb[40].mxu1 %v4012_v21 }
 0xf00   :  { %5656 = vmatpush1.bf16.msra.mxu0 %v6748_v61  ;;  %5688 = vmatpush1.bf16.msra.mxu1 %v6751_v54 }
 0xf01   :  { %5658 = vmatprep.subr.bf16.mxu0 %v6756_v30  ;;  %5690 = vmatprep.subr.bf16.mxu1 %v6758_v55 }
 0xf02   :  { %4273 = vmatprep.mubr.f32.mxu0 %v6106_v0  ;;  %4344 = vmatprep.mubr.f32.mxu1 %v6106_v0 }
 0xf04   :  { %5660 = vmatpush1.bf16.msra.mxu0 %v6760_v44  ;;  %5692 = vmatpush1.bf16.msra.mxu1 %v6763_v50 }
 0xf05   :  { %5662 = vmatprep.subr.bf16.mxu0 %v6768_v51  ;;  %5694 = vmatprep.subr.bf16.mxu1 %v6770_v25 }
 0xf08   :  { %5664 = vmatpush1.bf16.msra.mxu0 %v6772_v33  ;;  %5696 = vmatpush1.bf16.msra.mxu1 %v6775_v49  ;;  %v7309_v49 = vcombine.low %v6937_v15, %v6943_v5 }
 0xf09   :  { %5666 = vmatprep.subr.bf16.mxu0 %v6780_v38  ;;  %5698 = vmatprep.subr.bf16.mxu1 %v6782_v2 }
 0xf0c   :  { %5668 = vmatpush1.bf16.msra.mxu0 %v6784_v14  ;;  %5700 = vmatpush1.bf16.msra.mxu1 %v6787_v45 }
 0xf0d   :  { %5670 = vmatprep.subr.bf16.mxu0 %v6792_v6  ;;  %5702 = vmatprep.subr.bf16.mxu1 %v6794_v3 }
 0xf10   :  { %5672 = vmatpush1.bf16.msra.mxu0 %v6796_v7  ;;  %5704 = vmatpush1.bf16.msra.mxu1 %v6799_v32 }
 0xf11   :  { %5674 = vmatprep.subr.bf16.mxu0 %v6804_v62  ;;  %5706 = vmatprep.subr.bf16.mxu1 %v6806_v60 }
 0xf14   :  { %5676 = vmatpush1.bf16.msra.mxu0 %v6808_v24  ;;  %5708 = vmatpush1.bf16.msra.mxu1 %v6811_v10 }
 0xf15   :  { %5678 = vmatprep.subr.bf16.mxu0 %v6815_v35  ;;  %5710 = vmatprep.subr.bf16.mxu1 %v6817_v59 }
 0xf18   :  { %5680 = vmatpush1.bf16.msra.mxu0 %v6820_v40  ;;  %5712 = vmatpush1.bf16.msra.mxu1 %v6824_v8 }
 0xf19   :  { %5682 = vmatprep.subr.bf16.mxu0 %v6828_v53  ;;  %5714 = vmatprep.subr.bf16.mxu1 %v6830_v16 }
 0xf1c   :  { %5684 = vmatpush1.bf16.msra.mxu0 %v6832_v11  ;;  %5716 = vmatpush1.bf16.msra.mxu1 %v6835_v41 }
 0xf1d   :  { %5717 = vmatprep.subr.bf16.mxu0 %v6108_v39 }
 0xfd2   :  { %v4079_v61 = vpop.f32.mrb[32].mxu0  ;;  %v4150_v54 = vpop.f32.mrb[40].mxu1 }
 0xfd3   :  { %v4081_v30 = vpop.f32.mrb[33].mxu0  ;;  %v4152_v55 = vpop.f32.mrb[41].mxu1 }
 0xfd4   :  { %v4159_v44 = vcombine.low %v4079_v61, %v4081_v30  ;;  %v4160_v50 = vcombine.low %v4150_v54, %v4152_v55 }
 0xfd6   :  { %v4167_v51 = vrot.slane %v4159_v44, %v6405_v47  ;;  %v4174_v25 = vrot.slane %v4160_v50, %v6405_v47  ;;  %v7310_v50 = vcombine.high %v6937_v15, %v6943_v5 }
 0xfd8   :  { %v4175_v33 = vcombine.low %v4167_v51, %v4174_v25 }
 0xfda   :  { %v4177_v38 = vadd.f32 %v4175_v33, %v7309_v49 }
 0xfdc   :  { %v4562_v2 = vmul.f32 -1.442695, %v4177_v38  ;;  %v4185_v14 = vrot.slane %v4177_v38, 2  ;;  %v4196_v6 = vrot.slane %v4177_v38, 6  ;;  %v4193_v32 = vrot.slane %v4177_v38, 4 }
 0xfde   :  { %5975 = vpow2.f32 %v4562_v2  ;;  %v4563_v45 = vmul.f32 -1.442695, %v4185_v14  ;;  %v4564_v3 = vmul.f32 -1.442695, %v4196_v6 }
 0xfe0   :  { %5977 = vpow2.f32 %v4563_v45 }
 0xfe1   :  { %5979 = vpow2.f32 %v4564_v3 }
 0xfe8   :  { %v5976_v7 = vpop.eup %5975 }
 0xfe9   :  { %v4181_v62 = vadd.f32 1.0, %v5976_v7 }
 0xfea   :  { %v5978_v60 = vpop.eup %5977 }
 0xfeb   :  { %5981 = vrcp.f32 %v4181_v62  ;;  %v4190_v24 = vadd.f32 1.0, %v5978_v60  ;;  %v5980_v10 = vpop.eup %5979 }
 0xfec   :  { %5983 = vtanh.f32 %v4193_v32  ;;  %v4201_v8 = vadd.f32 1.0, %v5980_v10 }
 0xfed   :  { %5985 = vrcp.f32 %v4190_v24 }
 0xfee   :  { %5987 = vrcp.f32 %v4201_v8  ;;  %v4568_v8 = vld [vmem:[%s7295_s8] ss:$0 sm:$0xff] }
 0xff5   :  { %v5982_v35 = vpop.eup %5981 }
 0xff6   :  { %v5984_v59 = vpop.eup %5983 }
 0xff7   :  { %v5986_v40 = vpop.eup %5985  ;;  %v4205_v16 = vmul.f32 %v5984_v59, %v5982_v35 }
 0xff8   :  { %v4204_v53 = vmul.f32 %v5986_v40, %v7173_v27  ;;  %v5988_v41 = vpop.eup %5987 }
 0xffa   :  { %v7214_v11 = vadd.f32 %v4205_v16, %v4204_v53 }
 0xffc   :  { %5989 = vtanh.f32 %v7214_v11 }
0x1006   :  { %v5990_v56 = vpop.eup %5989 }
0x1007   :  { %v4208_v20 = vmul.f32 %v5990_v56, %v5988_v41 }
0x1009   :  { %4274 = vmatmul.mubr.f32.vlgmr.msra.gmra.mrb[34].mxu0 %v4208_v20  ;;  %4345 = vmatmul.mubr.f32.vlgmr.msra.gmra.mrb[42].mxu1 %v4208_v20 }
0x100a   :  { %5719 = vmatpush3.bf16.msra.mxu0 %v5718_v57  ;;  %4618 = vmatprep.mubr.msk.f32.mxu0 %vm6109_vm1, %v6106_v0  ;;  %v4414_v0 = vld [vmem:[%s7294_s7 + $0x48] sm:$0xff] }
0x100b   :  { %5720 = vmatprep.subr.bf16.mxu0 %v6108_v39  ;;  %v5730_v34 = vpack.c.bf16 %v4414_v0, %v4413_v52 }
0x100e   :  { %5722 = vmatpush3.bf16.msra.mxu0 %v5721_v58 }
0x100f   :  { %5723 = vmatprep.subr.bf16.mxu0 %v6108_v39 }
0x1012   :  { %5725 = vmatpush3.bf16.msra.mxu0 %v5724_v4 }
0x1013   :  { %5726 = vmatprep.subr.bf16.mxu0 %v6108_v39 }
0x1016   :  { %5728 = vmatpush3.bf16.msra.mxu0 %v5727_v18 }
0x1017   :  { %5729 = vmatprep.subr.bf16.mxu0 %v6108_v39 }
0x101a   :  { %5731 = vmatpush3.bf16.msra.mxu0 %v5730_v34 }
0x101b   :  { %5732 = vmatprep.subr.bf16.mxu0 %v6108_v39 }
0x101e   :  { %5734 = vmatpush3.bf16.msra.mxu0 %v5733_v46 }
0x101f   :  { %5735 = vmatprep.subr.bf16.mxu0 %v6108_v39 }
0x1022   :  { %5737 = vmatpush3.bf16.msra.mxu0 %v5736_v1 }
0x1023   :  { %5738 = vmatprep.subr.bf16.mxu0 %v6108_v39 }
0x1026   :  { %5740 = vmatpush3.bf16.msra.mxu0 %v5739_v9 }
0x10dc   :  { %v4275_v27 = vpop.f32.mrb[34].mxu0  ;;  %v4346_v48 = vpop.f32.mrb[42].mxu1 }
0x10dd   :  { %v4277_v42 = vpop.f32.mrb[35].mxu0  ;;  %v4348_v21 = vpop.f32.mrb[43].mxu1 }
0x10de   :  { %v4355_v61 = vcombine.low %v4275_v27, %v4277_v42  ;;  %v4356_v54 = vcombine.low %v4346_v48, %v4348_v21 }
0x10e0   :  { %v4363_v30 = vrot.slane %v4355_v61, %v6405_v47  ;;  %v4370_v55 = vrot.slane %v4356_v54, %v6405_v47 }
0x10e2   :  { %v4371_v44 = vcombine.low %v4363_v30, %v4370_v55 }
0x10e4   :  { %v4373_v51 = vadd.f32 %v4371_v44, %v7310_v50 }
0x10e6   :  { %v4565_v25 = vmul.f32 -1.442695, %v4373_v51  ;;  %v4381_v33 = vrot.slane %v4373_v51, 2  ;;  %v4392_v38 = vrot.slane %v4373_v51, 6  ;;  %v4389_v45 = vrot.slane %v4373_v51, 4 }
0x10e8   :  { %5991 = vpow2.f32 %v4565_v25  ;;  %v4566_v49 = vmul.f32 -1.442695, %v4381_v33  ;;  %v4567_v2 = vmul.f32 -1.442695, %v4392_v38 }
0x10ea   :  { %5993 = vpow2.f32 %v4566_v49 }
0x10eb   :  { %5995 = vpow2.f32 %v4567_v2 }
0x10f2   :  { %v5992_v14 = vpop.eup %5991 }
0x10f3   :  { %v4377_v6 = vadd.f32 1.0, %v5992_v14 }
0x10f4   :  { %v5994_v3 = vpop.eup %5993 }
0x10f5   :  { %5997 = vrcp.f32 %v4377_v6  ;;  %v4386_v7 = vadd.f32 1.0, %v5994_v3  ;;  %v5996_v47 = vpop.eup %5995 }
0x10f6   :  { %5999 = vtanh.f32 %v4389_v45  ;;  %v4397_v62 = vadd.f32 1.0, %v5996_v47 }
0x10f7   :  { %6001 = vrcp.f32 %v4386_v7 }
0x10f8   :  { %6003 = vrcp.f32 %v4397_v62 }
0x10ff   :  { %v5998_v32 = vpop.eup %5997 }
0x1100   :  { %v6000_v15 = vpop.eup %5999 }
0x1101   :  { %v6002_v5 = vpop.eup %6001  ;;  %v4401_v24 = vmul.f32 %v6000_v15, %v5998_v32 }
0x1102   :  { %v4400_v60 = vmul.f32 %v6002_v5, %v7214_v11  ;;  %v6004_v35 = vpop.eup %6003 }
0x1104   :  { %v4402_v10 = vadd.f32 %v4401_v24, %v4400_v60 }
0x1106   :  { %6005 = vtanh.f32 %v4402_v10 }
0x1110   :  { %v6006_v59 = vpop.eup %6005 }
0x1111   :  { %v4404_v40 = vmul.f32 %v6006_v59, %v6004_v35 }
0x1113   :  { %4619 = vmatmul.mubr.f32.vlgmr.msra.gmra.mrb[36].mxu0 %v4404_v40 }
0x11e6   :  { %v4494_v53 = vpop.f32.mrb[36].mxu0 }
0x11e7   :  { %v4495_v16 = vadd.f32 %v4568_v8, %v4494_v53  ;;  %v4620_v41 = vpop.f32.mrb[37].mxu0 }
0x11e9   :  { %4499 = vst.msk [vmem:[#allocation9] sm:$0x3] %vm4498_vm2, %v4495_v16 }
0x11ea   :  { %6084 = shalt.err (!%p6081_p0)
}
0x11eb   :  { %s6085_s6 = scalar_lea.hbm %s7296_s9, 32 }
0x11ec   :  { %p6086_p1 = scmp.ne.s32.totalorder %s7296_s9, %s6085_s6  ;;  %p6089_p2 = scmp.lt.u32.totalorder %s6085_s6, %s7296_s9 }
0x11ee   :  { %p6091_p3 = pnand %p6089_p2, %p6086_p1 }
0x11f0   :  { %6094 = shalt.err (!%p6091_p3)
}
0x11f1   :  { %4509 = dma.vmem_to_hbm [thread:$0]  %s4507_s28, 32, %s7296_s9, [#allocation5]  }
0x11f2   :  { %6099 = dma.done.wait [#allocation5], 32  }
0x11f3   :  { %6100 = vsyncadd [#allocation5], 4294967264 }
0x11f4   :  { %4513 = vsyncpa [#allocation4], 1 }
0x11f5   :  { %4514 = vsyncpa [#allocation7], 1 }
0x11f6   :  { %4515 = vsyncpa [#allocation5], 1 }

</bundles_post_ra>
